<compile_context>
chip_gen: v7x
topology: tpu7x:2x2x1
jax: 0.10.0
libtpu: 0.0.40
codegen_flags: <defaults>
</compile_context>

<pallas_src>
import math

import jax
import jax.numpy as jnp
from jax import lax
from jax.experimental import pallas as pl
from jax.experimental.pallas import tpu as pltpu

# ----------------------------- tiny BERT config ------------------------------
VOCAB = 100
TYPE_VOCAB = 2
MAX_POS = 16
HIDDEN = 32          # args.bert_hidden_size (small synthetic)
N_HEADS = 4
D_HEAD = HIDDEN // N_HEADS
N_LAYERS = 2
INTERMEDIATE = 64
NUM_LABELS = 3       # args.num_labels
BATCH = 2
SEQ = 8
LN_EPS = 1e-12

# ------------- packed-parameter layouts (operand count: 18 -> 6) --------------
# `tables` (T_ROWS, HIDDEN) f32: embeddings + embedding LayerNorm + classifier.
T_WORD = 0
T_TYPE = T_WORD + VOCAB
T_POS = T_TYPE + TYPE_VOCAB
T_EMBG = T_POS + SEQ
T_EMBB = T_EMBG + 1
T_CLSB = T_EMBB + 1
T_CLSW = T_CLSB + 1
T_ROWS = T_CLSW + HIDDEN

# `wmats` (N_LAYERS*WM_ROWS, VEC_W) bf16: per layer [Wo | W1 | W2] stacked on rows.
VEC_W = max(HIDDEN, INTERMEDIATE)
WM_WO = 0
WM_W1 = HIDDEN
WM_W2 = 2 * HIDDEN
WM_ROWS = 2 * HIDDEN + INTERMEDIATE            # 128 rows / layer

# `lvecs` (N_LAYERS*LVEC_ROWS, VEC_W) f32: all per-layer bias / LayerNorm vectors.
ROW_BQ = 0                      # rows [0, nH): per-head q bias (pre-scaled)
ROW_BK = N_HEADS                # rows [nH, 2nH): per-head k bias
ROW_BV = 2 * N_HEADS            # rows [2nH, 3nH): per-head v bias
ROW_BO = 3 * N_HEADS
ROW_LN1G = ROW_BO + 1
ROW_LN1B = ROW_LN1G + 1
ROW_B1 = ROW_LN1B + 1
ROW_B2 = ROW_B1 + 1
ROW_LN2G = ROW_B2 + 1
ROW_LN2B = ROW_LN2G + 1
LVEC_ROWS = ROW_LN2B + 1        # 19 rows / layer


# ---------------------------- in-kernel helpers --------------------------------
def _layernorm(x, g, b):
    mu = jnp.mean(x, axis=-1, keepdims=True)
    d = x - mu
    var = jnp.mean(d * d, axis=-1, keepdims=True)
    return d * lax.rsqrt(var + LN_EPS) * g + b


def _gelu(x):
    # tanh-approx GELU: tanh runs on the EUP slot (co-issues with VPU work);
    # tiny numeric deviation vs exact-erf GELU.
    c = 0.7978845608028654  # sqrt(2/pi)
    return 0.5 * x * (1.0 + jnp.tanh(c * (x + 0.044715 * x * x * x)))


def _bf16(x):
    return x.astype(jnp.bfloat16)


# ------------------------------- fused kernel ----------------------------------
def _fused_forward_kernel(ids_ref, bias_ref, tables_ref, wqkv_ref, wmats_ref,
                          lvecs_ref, o_ref):
    """One grid step == one sequence. All weights VMEM-resident."""
    S, H, I, nH, dH = SEQ, HIDDEN, INTERMEDIATE, N_HEADS, D_HEAD
    f32 = jnp.float32

    def lvec(row, width):                       # (1, width) packed vector row
        return lvecs_ref[row:row + 1, 0:width]

    # ---- embeddings, fused in-kernel (one-hot gather on the MXU) -------------
    wid = ids_ref[0, :, 0:1]                    # (S, 1) word ids
    tid = ids_ref[0, :, 1:2]                    # (S, 1) token-type ids
    onehot_w = (wid == lax.broadcasted_iota(jnp.int32, (S, VOCAB), 1)).astype(f32)
    word = jnp.dot(onehot_w, tables_ref[T_WORD:T_WORD + VOCAB, :],
                   preferred_element_type=f32)                      # (S, H)
    typ = jnp.where(tid == 0,
                    tables_ref[T_TYPE:T_TYPE + 1, :],
                    tables_ref[T_TYPE + 1:T_TYPE + 2, :])           # TYPE_VOCAB == 2
    pos = tables_ref[T_POS:T_POS + S, :]
    x = _layernorm(word + typ + pos,
                   tables_ref[T_EMBG:T_EMBG + 1, :],
                   tables_ref[T_EMBB:T_EMBB + 1, :])                # (S, H) f32

    # additive key mask, hoisted once (precomputed in the wrapper)
    bias = bias_ref[0]                                              # (1, S)

    for l in range(N_LAYERS):
        lb = l * LVEC_ROWS
        wb = l * WM_ROWS
        xb = _bf16(x)                                               # cast once / layer

        # ---- multi-head self-attention (per-head weight slabs, no lane slicing)
        attn = jnp.zeros((S, H), f32)
        for h in range(nH):
            wq = wqkv_ref[(l * 3 + 0) * nH + h]                     # (H, dH) bf16
            wk = wqkv_ref[(l * 3 + 1) * nH + h]
            wv = wqkv_ref[(l * 3 + 2) * nH + h]
            qh = jnp.dot(xb, wq, preferred_element_type=f32) + lvec(lb + ROW_BQ + h, dH)
            kh = jnp.dot(xb, wk, preferred_element_type=f32) + lvec(lb + ROW_BK + h, dH)
            vh = jnp.dot(xb, wv, preferred_element_type=f32) + lvec(lb + ROW_BV + h, dH)

            # scores = qh @ kh^T via contracting dim 1 of both (no XLU transpose)
            s = lax.dot_general(_bf16(qh), _bf16(kh),
                                (((1,), (1,)), ((), ())),
                                preferred_element_type=f32)          # (S, S)
            s = s + bias
            s = s - jnp.max(s, axis=-1, keepdims=True)
            e = jnp.exp(s)
            p = e * pl.reciprocal(jnp.sum(e, axis=-1, keepdims=True), approx=True)

            ctx = jnp.dot(_bf16(p), _bf16(vh), preferred_element_type=f32)  # (S, dH)
            wo_h = wmats_ref[wb + WM_WO + h * dH: wb + WM_WO + (h + 1) * dH, 0:H]
            attn = attn + jnp.dot(_bf16(ctx), wo_h, preferred_element_type=f32)

        attn = attn + lvec(lb + ROW_BO, H)
        x = _layernorm(x + attn, lvec(lb + ROW_LN1G, H), lvec(lb + ROW_LN1B, H))

        # ---- feed-forward (tanh GELU) + fused residual + LayerNorm ----------
        w1 = wmats_ref[wb + WM_W1: wb + WM_W1 + H, 0:I]              # (H, I) bf16
        w2 = wmats_ref[wb + WM_W2: wb + WM_W2 + I, 0:H]              # (I, H) bf16
        h1 = _gelu(jnp.dot(_bf16(x), w1, preferred_element_type=f32)
                   + lvec(lb + ROW_B1, I))
        ffn = jnp.dot(_bf16(h1), w2, preferred_element_type=f32) + lvec(lb + ROW_B2, H)
        x = _layernorm(x + ffn, lvec(lb + ROW_LN2G, H), lvec(lb + ROW_LN2B, H))

    # ---- CLS row (token 0) -> classifier: single matmul, single store -------
    cls_w = tables_ref[T_CLSW:T_CLSW + H, 0:NUM_LABELS]
    cls_b = tables_ref[T_CLSB:T_CLSB + 1, 0:NUM_LABELS]
    o_ref[0] = jnp.dot(x[0:1, :], cls_w, preferred_element_type=f32) + cls_b


# ------------------------------ forward wrapper --------------------------------
@jax.jit
def knowledge_selector_forward(params, input_ids, token_type_ids, attention_mask):
    B, S = input_ids.shape
    assert (B, S) == (BATCH, SEQ)

    # tiny host-side glue: pack the two id tensors and precompute the additive mask
    ids = jnp.stack([input_ids, token_type_ids], axis=-1).astype(jnp.int32)   # (B,S,2)
    bias = ((1.0 - attention_mask.astype(jnp.float32)) * -1e9).reshape(B, 1, S)

    # TODO(synk): at real BERT scale, stream per-layer weights via a grid axis /
    # pltpu.emit_pipeline instead of keeping all layers VMEM-resident (v7x 64 MiB).
    out = pl.pallas_call(
        _fused_forward_kernel,
        out_shape=jax.ShapeDtypeStruct((B, 1, NUM_LABELS), jnp.float32),
        grid=(B,),
        in_specs=[
            pl.BlockSpec((1, SEQ, 2), lambda i: (i, 0, 0)),            # ids (per seq)
            pl.BlockSpec((1, 1, SEQ), lambda i: (i, 0, 0)),            # additive mask
            pl.BlockSpec(params["tables"].shape, lambda i: (0, 0)),    # emb/LN/cls pack
            pl.BlockSpec(params["wqkv"].shape, lambda i: (0, 0, 0)),   # per-head QKV
            pl.BlockSpec(params["wmats"].shape, lambda i: (0, 0)),     # Wo|W1|W2 pack
            pl.BlockSpec(params["lvecs"].shape, lambda i: (0, 0)),     # bias/LN pack
        ],
        out_specs=pl.BlockSpec((1, 1, NUM_LABELS), lambda i: (i, 0, 0)),
        compiler_params=pltpu.CompilerParams(
            dimension_semantics=("parallel",)),                        # 2 TCs on v7x
    )(ids, bias, params["tables"], params["wqkv"], params["wmats"], params["lvecs"])
    return out.reshape(B, NUM_LABELS)


# ------------------------------ parameter init ---------------------------------
def init_params(key):
    keys = iter(jax.random.split(key, 4 + 6 * N_LAYERS))

    def nrm(shape):
        return 0.02 * jax.random.normal(next(keys), shape, jnp.float32)

    # packed tables: embeddings + embedding LayerNorm + classifier
    word = nrm((VOCAB, HIDDEN))
    typ = nrm((TYPE_VOCAB, HIDDEN))
    pos = nrm((MAX_POS, HIDDEN))
    cls_w = nrm((HIDDEN, NUM_LABELS))
    tables = jnp.zeros((T_ROWS, HIDDEN), jnp.float32)
    tables = tables.at[T_WORD:T_WORD + VOCAB].set(word)
    tables = tables.at[T_TYPE:T_TYPE + TYPE_VOCAB].set(typ)
    tables = tables.at[T_POS:T_POS + SEQ].set(pos[:SEQ])
    tables = tables.at[T_EMBG].set(jnp.ones((HIDDEN,), jnp.float32))   # emb LN gamma
    tables = tables.at[T_CLSW:T_CLSW + HIDDEN, :NUM_LABELS].set(cls_w)
    # emb LN beta (T_EMBB) and classifier bias (T_CLSB) stay zero.

    scale = 1.0 / math.sqrt(D_HEAD)          # folded into the Q projection weights
    wqkv_slabs = []
    wmats = jnp.zeros((N_LAYERS * WM_ROWS, VEC_W), jnp.float32)
    lvecs = jnp.zeros((N_LAYERS * LVEC_ROWS, VEC_W), jnp.float32)
    for l in range(N_LAYERS):
        wq = nrm((HIDDEN, HIDDEN)) * scale
        wk = nrm((HIDDEN, HIDDEN))
        wv = nrm((HIDDEN, HIDDEN))
        wo = nrm((HIDDEN, HIDDEN))
        w1 = nrm((HIDDEN, INTERMEDIATE))
        w2 = nrm((INTERMEDIATE, HIDDEN))
        for w in (wq, wk, wv):               # per-head (H, dH) slabs, index (l*3+m)*nH+h
            for h in range(N_HEADS):
                wqkv_slabs.append(w[:, h * D_HEAD:(h + 1) * D_HEAD])
        base = l * WM_ROWS
        wmats = wmats.at[base + WM_WO:base + WM_WO + HIDDEN, :HIDDEN].set(wo)
        wmats = wmats.at[base + WM_W1:base + WM_W1 + HIDDEN, :INTERMEDIATE].set(w1)
        wmats = wmats.at[base + WM_W2:base + WM_W2 + INTERMEDIATE, :HIDDEN].set(w2)
        lb = l * LVEC_ROWS
        lvecs = lvecs.at[lb + ROW_LN1G, :HIDDEN].set(1.0)
        lvecs = lvecs.at[lb + ROW_LN2G, :HIDDEN].set(1.0)
        # all attention/FFN biases and LN betas initialized to zero.

    return {
        "tables": tables,
        "wqkv": jnp.stack(wqkv_slabs).astype(jnp.bfloat16),   # (L*3*nH, H, dH)
        "wmats": wmats.astype(jnp.bfloat16),                  # (L*128, 64)
        "lvecs": lvecs,                                       # (L*19, 64) f32
    }


# ----------------------------------- main ---------------------------------------
if __name__ == "__main__":
    key = jax.random.PRNGKey(0)
    k_param, k_ids, k_types = jax.random.split(key, 3)

    params = init_params(k_param)
    input_ids = jax.random.randint(k_ids, (BATCH, SEQ), 0, VOCAB, dtype=jnp.int32)
    token_type_ids = jax.random.randint(
        k_types, (BATCH, SEQ), 0, TYPE_VOCAB, dtype=jnp.int32
    )
    attention_mask = jnp.ones((BATCH, SEQ), jnp.int32).at[1, SEQ - 2:].set(0)

    logits = knowledge_selector_forward(
        params, input_ids, token_type_ids, attention_mask
    )
    jax.block_until_ready(logits)
    assert logits.shape == (BATCH, NUM_LABELS)
    assert bool(jnp.all(jnp.isfinite(logits)))
    print("KERNEL_OK")
</pallas_src>

<mosaic_0001>
module attributes {stable_mosaic.version = 11 : i64} {
  func.func @_fused_forward_kernel(%arg0: i32, %arg1: memref<1x8x2xi32, #tpu.memory_space<vmem>>, %arg2: memref<1x1x8xf32, #tpu.memory_space<vmem>>, %arg3: memref<145x32xf32, #tpu.memory_space<vmem>>, %arg4: memref<24x32x8xbf16, #tpu.memory_space<vmem>>, %arg5: memref<256x64xbf16, #tpu.memory_space<vmem>>, %arg6: memref<38x64xf32, #tpu.memory_space<vmem>>, %arg7: memref<1x1x3xf32, #tpu.memory_space<vmem>>) attributes {dimension_semantics = [#tpu.dimension_semantics<parallel>], iteration_bounds = array<i64: 2>, scalar_prefetch = 0 : i64, scratch_operands = 0 : i64, tpu.core_type = #tpu.core_type<tc>, window_params = [{transform_indices = @transform_0, window_bounds = array<i64: 1, 8, 2>}, {transform_indices = @transform_1, window_bounds = array<i64: 1, 1, 8>}, {pipeline_mode = #tpu.pipeline_mode<synchronous>, transform_indices = @transform_2, window_bounds = array<i64: 145, 32>}, {pipeline_mode = #tpu.pipeline_mode<synchronous>, transform_indices = @transform_3, window_bounds = array<i64: 24, 32, 8>}, {pipeline_mode = #tpu.pipeline_mode<synchronous>, transform_indices = @transform_4, window_bounds = array<i64: 256, 64>}, {pipeline_mode = #tpu.pipeline_mode<synchronous>, transform_indices = @transform_5, window_bounds = array<i64: 38, 64>}, {transform_indices = @transform_6, window_bounds = array<i64: 1, 1, 3>}]} {
    %c0 = arith.constant 0 : index
    %c0_0 = arith.constant 0 : index
    %c0_1 = arith.constant 0 : index
    %0 = vector.load %arg1[%c0, %c0_0, %c0_1] : memref<1x8x2xi32, #tpu.memory_space<vmem>>, vector<1x8x1xi32>
    %1 = vector.shape_cast %0 : vector<1x8x1xi32> to vector<8x1xi32>
    %c0_2 = arith.constant 0 : index
    %c0_3 = arith.constant 0 : index
    %c1 = arith.constant 1 : index
    %2 = vector.load %arg1[%c0_2, %c0_3, %c1] : memref<1x8x2xi32, #tpu.memory_space<vmem>>, vector<1x8x1xi32>
    %3 = vector.shape_cast %2 : vector<1x8x1xi32> to vector<8x1xi32>
    %4 = tpu.iota {dimensions = array<i32: 1>} : vector<8x100xi32>
    %5 = vector.broadcast %1 : vector<8x1xi32> to vector<8x100xi32>
    %6 = arith.cmpi eq, %5, %4 : vector<8x100xi32>
    %7 = arith.extui %6 : vector<8x100xi1> to vector<8x100xi32>
    %8 = arith.sitofp %7 : vector<8x100xi32> to vector<8x100xf32>
    %c0_4 = arith.constant 0 : index
    %c0_5 = arith.constant 0 : index
    %9 = vector.load %arg3[%c0_4, %c0_5] : memref<145x32xf32, #tpu.memory_space<vmem>>, vector<100x32xf32>
    %cst = arith.constant dense<0.000000e+00> : vector<8x32xf32>
    %10 = tpu.matmul %8, %9, %cst {dimension_numbers = #tpu.dot_dimension_numbers<[1], [0], [0], [1], [0, 0, 1, 1], [], []>} : vector<8x100xf32>, vector<100x32xf32>, vector<8x32xf32> -> vector<8x32xf32>
    %c0_i32 = arith.constant 0 : i32
    %11 = vector.broadcast %c0_i32 : i32 to vector<8x1xi32>
    %12 = arith.cmpi eq, %3, %11 : vector<8x1xi32>
    %c100 = arith.constant 100 : index
    %c0_6 = arith.constant 0 : index
    %13 = vector.load %arg3[%c100, %c0_6] : memref<145x32xf32, #tpu.memory_space<vmem>>, vector<1x32xf32>
    %c101 = arith.constant 101 : index
    %c0_7 = arith.constant 0 : index
    %14 = vector.load %arg3[%c101, %c0_7] : memref<145x32xf32, #tpu.memory_space<vmem>>, vector<1x32xf32>
    %15 = vector.shape_cast %12 : vector<8x1xi1> to vector<8x1xi1>
    %16 = vector.broadcast %15 : vector<8x1xi1> to vector<8x32xi1>
    %17 = vector.shape_cast %13 : vector<1x32xf32> to vector<1x32xf32>
    %18 = vector.broadcast %17 : vector<1x32xf32> to vector<8x32xf32>
    %19 = vector.shape_cast %14 : vector<1x32xf32> to vector<1x32xf32>
    %20 = vector.broadcast %19 : vector<1x32xf32> to vector<8x32xf32>
    %21 = arith.select %16, %18, %20 : vector<8x32xi1>, vector<8x32xf32>
    %c102 = arith.constant 102 : index
    %c0_8 = arith.constant 0 : index
    %22 = vector.load %arg3[%c102, %c0_8] : memref<145x32xf32, #tpu.memory_space<vmem>>, vector<8x32xf32>
    %23 = arith.addf %10, %21 : vector<8x32xf32>
    %24 = arith.addf %23, %22 : vector<8x32xf32>
    %c110 = arith.constant 110 : index
    %c0_9 = arith.constant 0 : index
    %25 = vector.load %arg3[%c110, %c0_9] : memref<145x32xf32, #tpu.memory_space<vmem>>, vector<1x32xf32>
    %c111 = arith.constant 111 : index
    %c0_10 = arith.constant 0 : index
    %26 = vector.load %arg3[%c111, %c0_10] : memref<145x32xf32, #tpu.memory_space<vmem>>, vector<1x32xf32>
    %cst_11 = arith.constant dense<0.000000e+00> : vector<8xf32>
    %27 = vector.multi_reduction <add>, %24, %cst_11 [1] : vector<8x32xf32> to vector<8xf32>
    %28 = vector.shape_cast %27 : vector<8xf32> to vector<8x1xf32>
    %cst_12 = arith.constant 3.200000e+01 : f32
    %29 = vector.broadcast %cst_12 : f32 to vector<8x1xf32>
    %30 = arith.divf %28, %29 : vector<8x1xf32>
    %31 = vector.broadcast %30 : vector<8x1xf32> to vector<8x32xf32>
    %32 = arith.subf %24, %31 : vector<8x32xf32>
    %33 = arith.mulf %32, %32 : vector<8x32xf32>
    %cst_13 = arith.constant dense<0.000000e+00> : vector<8xf32>
    %34 = vector.multi_reduction <add>, %33, %cst_13 [1] : vector<8x32xf32> to vector<8xf32>
    %35 = vector.shape_cast %34 : vector<8xf32> to vector<8x1xf32>
    %cst_14 = arith.constant 3.200000e+01 : f32
    %36 = vector.broadcast %cst_14 : f32 to vector<8x1xf32>
    %37 = arith.divf %35, %36 : vector<8x1xf32>
    %cst_15 = arith.constant 9.99999996E-13 : f32
    %38 = vector.broadcast %cst_15 : f32 to vector<8x1xf32>
    %39 = arith.addf %37, %38 : vector<8x1xf32>
    %40 = math.rsqrt %39 : vector<8x1xf32>
    %41 = vector.broadcast %40 : vector<8x1xf32> to vector<8x32xf32>
    %42 = arith.mulf %32, %41 : vector<8x32xf32>
    %43 = vector.broadcast %25 : vector<1x32xf32> to vector<8x32xf32>
    %44 = arith.mulf %42, %43 : vector<8x32xf32>
    %45 = vector.broadcast %26 : vector<1x32xf32> to vector<8x32xf32>
    %46 = arith.addf %44, %45 : vector<8x32xf32>
    %c0_16 = arith.constant 0 : index
    %c0_17 = arith.constant 0 : index
    %c0_18 = arith.constant 0 : index
    %47 = vector.load %arg2[%c0_16, %c0_17, %c0_18] : memref<1x1x8xf32, #tpu.memory_space<vmem>>, vector<1x1x8xf32>
    %48 = vector.shape_cast %47 : vector<1x1x8xf32> to vector<1x8xf32>
    %49 = arith.truncf %46 : vector<8x32xf32> to vector<8x32xbf16>
    %cst_19 = arith.constant 0.000000e+00 : f32
    %50 = vector.broadcast %cst_19 : f32 to vector<8x32xf32>
    %c0_20 = arith.constant 0 : index
    %c0_21 = arith.constant 0 : index
    %c0_22 = arith.constant 0 : index
    %51 = vector.load %arg4[%c0_20, %c0_21, %c0_22] : memref<24x32x8xbf16, #tpu.memory_space<vmem>>, vector<1x32x8xbf16>
    %52 = vector.shape_cast %51 : vector<1x32x8xbf16> to vector<32x8xbf16>
    %c4 = arith.constant 4 : index
    %c0_23 = arith.constant 0 : index
    %c0_24 = arith.constant 0 : index
    %53 = vector.load %arg4[%c4, %c0_23, %c0_24] : memref<24x32x8xbf16, #tpu.memory_space<vmem>>, vector<1x32x8xbf16>
    %54 = vector.shape_cast %53 : vector<1x32x8xbf16> to vector<32x8xbf16>
    %c8 = arith.constant 8 : index
    %c0_25 = arith.constant 0 : index
    %c0_26 = arith.constant 0 : index
    %55 = vector.load %arg4[%c8, %c0_25, %c0_26] : memref<24x32x8xbf16, #tpu.memory_space<vmem>>, vector<1x32x8xbf16>
    %56 = vector.shape_cast %55 : vector<1x32x8xbf16> to vector<32x8xbf16>
    %cst_27 = arith.constant dense<0.000000e+00> : vector<8x8xf32>
    %57 = tpu.matmul %49, %52, %cst_27 {dimension_numbers = #tpu.dot_dimension_numbers<[1], [0], [0], [1], [0, 0, 1, 1], [], []>} : vector<8x32xbf16>, vector<32x8xbf16>, vector<8x8xf32> -> vector<8x8xf32>
    %c0_28 = arith.constant 0 : index
    %c0_29 = arith.constant 0 : index
    %58 = vector.load %arg6[%c0_28, %c0_29] : memref<38x64xf32, #tpu.memory_space<vmem>>, vector<1x8xf32>
    %59 = vector.broadcast %58 : vector<1x8xf32> to vector<8x8xf32>
    %60 = arith.addf %57, %59 : vector<8x8xf32>
    %cst_30 = arith.constant dense<0.000000e+00> : vector<8x8xf32>
    %61 = tpu.matmul %49, %54, %cst_30 {dimension_numbers = #tpu.dot_dimension_numbers<[1], [0], [0], [1], [0, 0, 1, 1], [], []>} : vector<8x32xbf16>, vector<32x8xbf16>, vector<8x8xf32> -> vector<8x8xf32>
    %c4_31 = arith.constant 4 : index
    %c0_32 = arith.constant 0 : index
    %62 = vector.load %arg6[%c4_31, %c0_32] : memref<38x64xf32, #tpu.memory_space<vmem>>, vector<1x8xf32>
    %63 = vector.broadcast %62 : vector<1x8xf32> to vector<8x8xf32>
    %64 = arith.addf %61, %63 : vector<8x8xf32>
    %cst_33 = arith.constant dense<0.000000e+00> : vector<8x8xf32>
    %65 = tpu.matmul %49, %56, %cst_33 {dimension_numbers = #tpu.dot_dimension_numbers<[1], [0], [0], [1], [0, 0, 1, 1], [], []>} : vector<8x32xbf16>, vector<32x8xbf16>, vector<8x8xf32> -> vector<8x8xf32>
    %c8_34 = arith.constant 8 : index
    %c0_35 = arith.constant 0 : index
    %66 = vector.load %arg6[%c8_34, %c0_35] : memref<38x64xf32, #tpu.memory_space<vmem>>, vector<1x8xf32>
    %67 = vector.broadcast %66 : vector<1x8xf32> to vector<8x8xf32>
    %68 = arith.addf %65, %67 : vector<8x8xf32>
    %69 = arith.truncf %60 : vector<8x8xf32> to vector<8x8xbf16>
    %70 = arith.truncf %64 : vector<8x8xf32> to vector<8x8xbf16>
    %cst_36 = arith.constant dense<0.000000e+00> : vector<8x8xf32>
    %71 = tpu.matmul %69, %70, %cst_36 {dimension_numbers = #tpu.dot_dimension_numbers<[1], [1], [0], [0], [0, 0, 1, 0], [], []>} : vector<8x8xbf16>, vector<8x8xbf16>, vector<8x8xf32> -> vector<8x8xf32>
    %72 = vector.broadcast %48 : vector<1x8xf32> to vector<8x8xf32>
    %73 = arith.addf %71, %72 : vector<8x8xf32>
    %cst_37 = arith.constant dense<0xFF800000> : vector<8xf32>
    %74 = vector.multi_reduction <maximumf>, %73, %cst_37 [1] : vector<8x8xf32> to vector<8xf32>
    %75 = vector.shape_cast %74 : vector<8xf32> to vector<8x1xf32>
    %76 = vector.broadcast %75 : vector<8x1xf32> to vector<8x8xf32>
    %77 = arith.subf %73, %76 : vector<8x8xf32>
    %78 = math.exp %77 : vector<8x8xf32>
    %cst_38 = arith.constant dense<0.000000e+00> : vector<8xf32>
    %79 = vector.multi_reduction <add>, %78, %cst_38 [1] : vector<8x8xf32> to vector<8xf32>
    %80 = vector.shape_cast %79 : vector<8xf32> to vector<8x1xf32>
    %81 = tpu.reciprocal %80 {approx = true} : vector<8x1xf32> -> vector<8x1xf32>
    %82 = vector.broadcast %81 : vector<8x1xf32> to vector<8x8xf32>
    %83 = arith.mulf %78, %82 : vector<8x8xf32>
    %84 = arith.truncf %83 : vector<8x8xf32> to vector<8x8xbf16>
    %85 = arith.truncf %68 : vector<8x8xf32> to vector<8x8xbf16>
    %cst_39 = arith.constant dense<0.000000e+00> : vector<8x8xf32>
    %86 = tpu.matmul %84, %85, %cst_39 {dimension_numbers = #tpu.dot_dimension_numbers<[1], [0], [0], [1], [0, 0, 1, 1], [], []>} : vector<8x8xbf16>, vector<8x8xbf16>, vector<8x8xf32> -> vector<8x8xf32>
    %c0_40 = arith.constant 0 : index
    %c0_41 = arith.constant 0 : index
    %87 = vector.load %arg5[%c0_40, %c0_41] : memref<256x64xbf16, #tpu.memory_space<vmem>>, vector<8x32xbf16>
    %88 = arith.truncf %86 : vector<8x8xf32> to vector<8x8xbf16>
    %cst_42 = arith.constant dense<0.000000e+00> : vector<8x32xf32>
    %89 = tpu.matmul %88, %87, %cst_42 {dimension_numbers = #tpu.dot_dimension_numbers<[1], [0], [0], [1], [0, 0, 1, 1], [], []>} : vector<8x8xbf16>, vector<8x32xbf16>, vector<8x32xf32> -> vector<8x32xf32>
    %90 = arith.addf %50, %89 : vector<8x32xf32>
    %c1_43 = arith.constant 1 : index
    %c0_44 = arith.constant 0 : index
    %c0_45 = arith.constant 0 : index
    %91 = vector.load %arg4[%c1_43, %c0_44, %c0_45] : memref<24x32x8xbf16, #tpu.memory_space<vmem>>, vector<1x32x8xbf16>
    %92 = vector.shape_cast %91 : vector<1x32x8xbf16> to vector<32x8xbf16>
    %c5 = arith.constant 5 : index
    %c0_46 = arith.constant 0 : index
    %c0_47 = arith.constant 0 : index
    %93 = vector.load %arg4[%c5, %c0_46, %c0_47] : memref<24x32x8xbf16, #tpu.memory_space<vmem>>, vector<1x32x8xbf16>
    %94 = vector.shape_cast %93 : vector<1x32x8xbf16> to vector<32x8xbf16>
    %c9 = arith.constant 9 : index
    %c0_48 = arith.constant 0 : index
    %c0_49 = arith.constant 0 : index
    %95 = vector.load %arg4[%c9, %c0_48, %c0_49] : memref<24x32x8xbf16, #tpu.memory_space<vmem>>, vector<1x32x8xbf16>
    %96 = vector.shape_cast %95 : vector<1x32x8xbf16> to vector<32x8xbf16>
    %cst_50 = arith.constant dense<0.000000e+00> : vector<8x8xf32>
    %97 = tpu.matmul %49, %92, %cst_50 {dimension_numbers = #tpu.dot_dimension_numbers<[1], [0], [0], [1], [0, 0, 1, 1], [], []>} : vector<8x32xbf16>, vector<32x8xbf16>, vector<8x8xf32> -> vector<8x8xf32>
    %c1_51 = arith.constant 1 : index
    %c0_52 = arith.constant 0 : index
    %98 = vector.load %arg6[%c1_51, %c0_52] : memref<38x64xf32, #tpu.memory_space<vmem>>, vector<1x8xf32>
    %99 = vector.broadcast %98 : vector<1x8xf32> to vector<8x8xf32>
    %100 = arith.addf %97, %99 : vector<8x8xf32>
    %cst_53 = arith.constant dense<0.000000e+00> : vector<8x8xf32>
    %101 = tpu.matmul %49, %94, %cst_53 {dimension_numbers = #tpu.dot_dimension_numbers<[1], [0], [0], [1], [0, 0, 1, 1], [], []>} : vector<8x32xbf16>, vector<32x8xbf16>, vector<8x8xf32> -> vector<8x8xf32>
    %c5_54 = arith.constant 5 : index
    %c0_55 = arith.constant 0 : index
    %102 = vector.load %arg6[%c5_54, %c0_55] : memref<38x64xf32, #tpu.memory_space<vmem>>, vector<1x8xf32>
    %103 = vector.broadcast %102 : vector<1x8xf32> to vector<8x8xf32>
    %104 = arith.addf %101, %103 : vector<8x8xf32>
    %cst_56 = arith.constant dense<0.000000e+00> : vector<8x8xf32>
    %105 = tpu.matmul %49, %96, %cst_56 {dimension_numbers = #tpu.dot_dimension_numbers<[1], [0], [0], [1], [0, 0, 1, 1], [], []>} : vector<8x32xbf16>, vector<32x8xbf16>, vector<8x8xf32> -> vector<8x8xf32>
    %c9_57 = arith.constant 9 : index
    %c0_58 = arith.constant 0 : index
    %106 = vector.load %arg6[%c9_57, %c0_58] : memref<38x64xf32, #tpu.memory_space<vmem>>, vector<1x8xf32>
    %107 = vector.broadcast %106 : vector<1x8xf32> to vector<8x8xf32>
    %108 = arith.addf %105, %107 : vector<8x8xf32>
    %109 = arith.truncf %100 : vector<8x8xf32> to vector<8x8xbf16>
    %110 = arith.truncf %104 : vector<8x8xf32> to vector<8x8xbf16>
    %cst_59 = arith.constant dense<0.000000e+00> : vector<8x8xf32>
    %111 = tpu.matmul %109, %110, %cst_59 {dimension_numbers = #tpu.dot_dimension_numbers<[1], [1], [0], [0], [0, 0, 1, 0], [], []>} : vector<8x8xbf16>, vector<8x8xbf16>, vector<8x8xf32> -> vector<8x8xf32>
    %112 = vector.broadcast %48 : vector<1x8xf32> to vector<8x8xf32>
    %113 = arith.addf %111, %112 : vector<8x8xf32>
    %cst_60 = arith.constant dense<0xFF800000> : vector<8xf32>
    %114 = vector.multi_reduction <maximumf>, %113, %cst_60 [1] : vector<8x8xf32> to vector<8xf32>
    %115 = vector.shape_cast %114 : vector<8xf32> to vector<8x1xf32>
    %116 = vector.broadcast %115 : vector<8x1xf32> to vector<8x8xf32>
    %117 = arith.subf %113, %116 : vector<8x8xf32>
    %118 = math.exp %117 : vector<8x8xf32>
    %cst_61 = arith.constant dense<0.000000e+00> : vector<8xf32>
    %119 = vector.multi_reduction <add>, %118, %cst_61 [1] : vector<8x8xf32> to vector<8xf32>
    %120 = vector.shape_cast %119 : vector<8xf32> to vector<8x1xf32>
    %121 = tpu.reciprocal %120 {approx = true} : vector<8x1xf32> -> vector<8x1xf32>
    %122 = vector.broadcast %121 : vector<8x1xf32> to vector<8x8xf32>
    %123 = arith.mulf %118, %122 : vector<8x8xf32>
    %124 = arith.truncf %123 : vector<8x8xf32> to vector<8x8xbf16>
    %125 = arith.truncf %108 : vector<8x8xf32> to vector<8x8xbf16>
    %cst_62 = arith.constant dense<0.000000e+00> : vector<8x8xf32>
    %126 = tpu.matmul %124, %125, %cst_62 {dimension_numbers = #tpu.dot_dimension_numbers<[1], [0], [0], [1], [0, 0, 1, 1], [], []>} : vector<8x8xbf16>, vector<8x8xbf16>, vector<8x8xf32> -> vector<8x8xf32>
    %c8_63 = arith.constant 8 : index
    %c0_64 = arith.constant 0 : index
    %127 = vector.load %arg5[%c8_63, %c0_64] : memref<256x64xbf16, #tpu.memory_space<vmem>>, vector<8x32xbf16>
    %128 = arith.truncf %126 : vector<8x8xf32> to vector<8x8xbf16>
    %cst_65 = arith.constant dense<0.000000e+00> : vector<8x32xf32>
    %129 = tpu.matmul %128, %127, %cst_65 {dimension_numbers = #tpu.dot_dimension_numbers<[1], [0], [0], [1], [0, 0, 1, 1], [], []>} : vector<8x8xbf16>, vector<8x32xbf16>, vector<8x32xf32> -> vector<8x32xf32>
    %130 = arith.addf %90, %129 : vector<8x32xf32>
    %c2 = arith.constant 2 : index
    %c0_66 = arith.constant 0 : index
    %c0_67 = arith.constant 0 : index
    %131 = vector.load %arg4[%c2, %c0_66, %c0_67] : memref<24x32x8xbf16, #tpu.memory_space<vmem>>, vector<1x32x8xbf16>
    %132 = vector.shape_cast %131 : vector<1x32x8xbf16> to vector<32x8xbf16>
    %c6 = arith.constant 6 : index
    %c0_68 = arith.constant 0 : index
    %c0_69 = arith.constant 0 : index
    %133 = vector.load %arg4[%c6, %c0_68, %c0_69] : memref<24x32x8xbf16, #tpu.memory_space<vmem>>, vector<1x32x8xbf16>
    %134 = vector.shape_cast %133 : vector<1x32x8xbf16> to vector<32x8xbf16>
    %c10 = arith.constant 10 : index
    %c0_70 = arith.constant 0 : index
    %c0_71 = arith.constant 0 : index
    %135 = vector.load %arg4[%c10, %c0_70, %c0_71] : memref<24x32x8xbf16, #tpu.memory_space<vmem>>, vector<1x32x8xbf16>
    %136 = vector.shape_cast %135 : vector<1x32x8xbf16> to vector<32x8xbf16>
    %cst_72 = arith.constant dense<0.000000e+00> : vector<8x8xf32>
    %137 = tpu.matmul %49, %132, %cst_72 {dimension_numbers = #tpu.dot_dimension_numbers<[1], [0], [0], [1], [0, 0, 1, 1], [], []>} : vector<8x32xbf16>, vector<32x8xbf16>, vector<8x8xf32> -> vector<8x8xf32>
    %c2_73 = arith.constant 2 : index
    %c0_74 = arith.constant 0 : index
    %138 = vector.load %arg6[%c2_73, %c0_74] : memref<38x64xf32, #tpu.memory_space<vmem>>, vector<1x8xf32>
    %139 = vector.broadcast %138 : vector<1x8xf32> to vector<8x8xf32>
    %140 = arith.addf %137, %139 : vector<8x8xf32>
    %cst_75 = arith.constant dense<0.000000e+00> : vector<8x8xf32>
    %141 = tpu.matmul %49, %134, %cst_75 {dimension_numbers = #tpu.dot_dimension_numbers<[1], [0], [0], [1], [0, 0, 1, 1], [], []>} : vector<8x32xbf16>, vector<32x8xbf16>, vector<8x8xf32> -> vector<8x8xf32>
    %c6_76 = arith.constant 6 : index
    %c0_77 = arith.constant 0 : index
    %142 = vector.load %arg6[%c6_76, %c0_77] : memref<38x64xf32, #tpu.memory_space<vmem>>, vector<1x8xf32>
    %143 = vector.broadcast %142 : vector<1x8xf32> to vector<8x8xf32>
    %144 = arith.addf %141, %143 : vector<8x8xf32>
    %cst_78 = arith.constant dense<0.000000e+00> : vector<8x8xf32>
    %145 = tpu.matmul %49, %136, %cst_78 {dimension_numbers = #tpu.dot_dimension_numbers<[1], [0], [0], [1], [0, 0, 1, 1], [], []>} : vector<8x32xbf16>, vector<32x8xbf16>, vector<8x8xf32> -> vector<8x8xf32>
    %c10_79 = arith.constant 10 : index
    %c0_80 = arith.constant 0 : index
    %146 = vector.load %arg6[%c10_79, %c0_80] : memref<38x64xf32, #tpu.memory_space<vmem>>, vector<1x8xf32>
    %147 = vector.broadcast %146 : vector<1x8xf32> to vector<8x8xf32>
    %148 = arith.addf %145, %147 : vector<8x8xf32>
    %149 = arith.truncf %140 : vector<8x8xf32> to vector<8x8xbf16>
    %150 = arith.truncf %144 : vector<8x8xf32> to vector<8x8xbf16>
    %cst_81 = arith.constant dense<0.000000e+00> : vector<8x8xf32>
    %151 = tpu.matmul %149, %150, %cst_81 {dimension_numbers = #tpu.dot_dimension_numbers<[1], [1], [0], [0], [0, 0, 1, 0], [], []>} : vector<8x8xbf16>, vector<8x8xbf16>, vector<8x8xf32> -> vector<8x8xf32>
    %152 = vector.broadcast %48 : vector<1x8xf32> to vector<8x8xf32>
    %153 = arith.addf %151, %152 : vector<8x8xf32>
    %cst_82 = arith.constant dense<0xFF800000> : vector<8xf32>
    %154 = vector.multi_reduction <maximumf>, %153, %cst_82 [1] : vector<8x8xf32> to vector<8xf32>
    %155 = vector.shape_cast %154 : vector<8xf32> to vector<8x1xf32>
    %156 = vector.broadcast %155 : vector<8x1xf32> to vector<8x8xf32>
    %157 = arith.subf %153, %156 : vector<8x8xf32>
    %158 = math.exp %157 : vector<8x8xf32>
    %cst_83 = arith.constant dense<0.000000e+00> : vector<8xf32>
    %159 = vector.multi_reduction <add>, %158, %cst_83 [1] : vector<8x8xf32> to vector<8xf32>
    %160 = vector.shape_cast %159 : vector<8xf32> to vector<8x1xf32>
    %161 = tpu.reciprocal %160 {approx = true} : vector<8x1xf32> -> vector<8x1xf32>
    %162 = vector.broadcast %161 : vector<8x1xf32> to vector<8x8xf32>
    %163 = arith.mulf %158, %162 : vector<8x8xf32>
    %164 = arith.truncf %163 : vector<8x8xf32> to vector<8x8xbf16>
    %165 = arith.truncf %148 : vector<8x8xf32> to vector<8x8xbf16>
    %cst_84 = arith.constant dense<0.000000e+00> : vector<8x8xf32>
    %166 = tpu.matmul %164, %165, %cst_84 {dimension_numbers = #tpu.dot_dimension_numbers<[1], [0], [0], [1], [0, 0, 1, 1], [], []>} : vector<8x8xbf16>, vector<8x8xbf16>, vector<8x8xf32> -> vector<8x8xf32>
    %c16 = arith.constant 16 : index
    %c0_85 = arith.constant 0 : index
    %167 = vector.load %arg5[%c16, %c0_85] : memref<256x64xbf16, #tpu.memory_space<vmem>>, vector<8x32xbf16>
    %168 = arith.truncf %166 : vector<8x8xf32> to vector<8x8xbf16>
    %cst_86 = arith.constant dense<0.000000e+00> : vector<8x32xf32>
    %169 = tpu.matmul %168, %167, %cst_86 {dimension_numbers = #tpu.dot_dimension_numbers<[1], [0], [0], [1], [0, 0, 1, 1], [], []>} : vector<8x8xbf16>, vector<8x32xbf16>, vector<8x32xf32> -> vector<8x32xf32>
    %170 = arith.addf %130, %169 : vector<8x32xf32>
    %c3 = arith.constant 3 : index
    %c0_87 = arith.constant 0 : index
    %c0_88 = arith.constant 0 : index
    %171 = vector.load %arg4[%c3, %c0_87, %c0_88] : memref<24x32x8xbf16, #tpu.memory_space<vmem>>, vector<1x32x8xbf16>
    %172 = vector.shape_cast %171 : vector<1x32x8xbf16> to vector<32x8xbf16>
    %c7 = arith.constant 7 : index
    %c0_89 = arith.constant 0 : index
    %c0_90 = arith.constant 0 : index
    %173 = vector.load %arg4[%c7, %c0_89, %c0_90] : memref<24x32x8xbf16, #tpu.memory_space<vmem>>, vector<1x32x8xbf16>
    %174 = vector.shape_cast %173 : vector<1x32x8xbf16> to vector<32x8xbf16>
    %c11 = arith.constant 11 : index
    %c0_91 = arith.constant 0 : index
    %c0_92 = arith.constant 0 : index
    %175 = vector.load %arg4[%c11, %c0_91, %c0_92] : memref<24x32x8xbf16, #tpu.memory_space<vmem>>, vector<1x32x8xbf16>
    %176 = vector.shape_cast %175 : vector<1x32x8xbf16> to vector<32x8xbf16>
    %cst_93 = arith.constant dense<0.000000e+00> : vector<8x8xf32>
    %177 = tpu.matmul %49, %172, %cst_93 {dimension_numbers = #tpu.dot_dimension_numbers<[1], [0], [0], [1], [0, 0, 1, 1], [], []>} : vector<8x32xbf16>, vector<32x8xbf16>, vector<8x8xf32> -> vector<8x8xf32>
    %c3_94 = arith.constant 3 : index
    %c0_95 = arith.constant 0 : index
    %178 = vector.load %arg6[%c3_94, %c0_95] : memref<38x64xf32, #tpu.memory_space<vmem>>, vector<1x8xf32>
    %179 = vector.broadcast %178 : vector<1x8xf32> to vector<8x8xf32>
    %180 = arith.addf %177, %179 : vector<8x8xf32>
    %cst_96 = arith.constant dense<0.000000e+00> : vector<8x8xf32>
    %181 = tpu.matmul %49, %174, %cst_96 {dimension_numbers = #tpu.dot_dimension_numbers<[1], [0], [0], [1], [0, 0, 1, 1], [], []>} : vector<8x32xbf16>, vector<32x8xbf16>, vector<8x8xf32> -> vector<8x8xf32>
    %c7_97 = arith.constant 7 : index
    %c0_98 = arith.constant 0 : index
    %182 = vector.load %arg6[%c7_97, %c0_98] : memref<38x64xf32, #tpu.memory_space<vmem>>, vector<1x8xf32>
    %183 = vector.broadcast %182 : vector<1x8xf32> to vector<8x8xf32>
    %184 = arith.addf %181, %183 : vector<8x8xf32>
    %cst_99 = arith.constant dense<0.000000e+00> : vector<8x8xf32>
    %185 = tpu.matmul %49, %176, %cst_99 {dimension_numbers = #tpu.dot_dimension_numbers<[1], [0], [0], [1], [0, 0, 1, 1], [], []>} : vector<8x32xbf16>, vector<32x8xbf16>, vector<8x8xf32> -> vector<8x8xf32>
    %c11_100 = arith.constant 11 : index
    %c0_101 = arith.constant 0 : index
    %186 = vector.load %arg6[%c11_100, %c0_101] : memref<38x64xf32, #tpu.memory_space<vmem>>, vector<1x8xf32>
    %187 = vector.broadcast %186 : vector<1x8xf32> to vector<8x8xf32>
    %188 = arith.addf %185, %187 : vector<8x8xf32>
    %189 = arith.truncf %180 : vector<8x8xf32> to vector<8x8xbf16>
    %190 = arith.truncf %184 : vector<8x8xf32> to vector<8x8xbf16>
    %cst_102 = arith.constant dense<0.000000e+00> : vector<8x8xf32>
    %191 = tpu.matmul %189, %190, %cst_102 {dimension_numbers = #tpu.dot_dimension_numbers<[1], [1], [0], [0], [0, 0, 1, 0], [], []>} : vector<8x8xbf16>, vector<8x8xbf16>, vector<8x8xf32> -> vector<8x8xf32>
    %192 = vector.broadcast %48 : vector<1x8xf32> to vector<8x8xf32>
    %193 = arith.addf %191, %192 : vector<8x8xf32>
    %cst_103 = arith.constant dense<0xFF800000> : vector<8xf32>
    %194 = vector.multi_reduction <maximumf>, %193, %cst_103 [1] : vector<8x8xf32> to vector<8xf32>
    %195 = vector.shape_cast %194 : vector<8xf32> to vector<8x1xf32>
    %196 = vector.broadcast %195 : vector<8x1xf32> to vector<8x8xf32>
    %197 = arith.subf %193, %196 : vector<8x8xf32>
    %198 = math.exp %197 : vector<8x8xf32>
    %cst_104 = arith.constant dense<0.000000e+00> : vector<8xf32>
    %199 = vector.multi_reduction <add>, %198, %cst_104 [1] : vector<8x8xf32> to vector<8xf32>
    %200 = vector.shape_cast %199 : vector<8xf32> to vector<8x1xf32>
    %201 = tpu.reciprocal %200 {approx = true} : vector<8x1xf32> -> vector<8x1xf32>
    %202 = vector.broadcast %201 : vector<8x1xf32> to vector<8x8xf32>
    %203 = arith.mulf %198, %202 : vector<8x8xf32>
    %204 = arith.truncf %203 : vector<8x8xf32> to vector<8x8xbf16>
    %205 = arith.truncf %188 : vector<8x8xf32> to vector<8x8xbf16>
    %cst_105 = arith.constant dense<0.000000e+00> : vector<8x8xf32>
    %206 = tpu.matmul %204, %205, %cst_105 {dimension_numbers = #tpu.dot_dimension_numbers<[1], [0], [0], [1], [0, 0, 1, 1], [], []>} : vector<8x8xbf16>, vector<8x8xbf16>, vector<8x8xf32> -> vector<8x8xf32>
    %c24 = arith.constant 24 : index
    %c0_106 = arith.constant 0 : index
    %207 = vector.load %arg5[%c24, %c0_106] : memref<256x64xbf16, #tpu.memory_space<vmem>>, vector<8x32xbf16>
    %208 = arith.truncf %206 : vector<8x8xf32> to vector<8x8xbf16>
    %cst_107 = arith.constant dense<0.000000e+00> : vector<8x32xf32>
    %209 = tpu.matmul %208, %207, %cst_107 {dimension_numbers = #tpu.dot_dimension_numbers<[1], [0], [0], [1], [0, 0, 1, 1], [], []>} : vector<8x8xbf16>, vector<8x32xbf16>, vector<8x32xf32> -> vector<8x32xf32>
    %210 = arith.addf %170, %209 : vector<8x32xf32>
    %c12 = arith.constant 12 : index
    %c0_108 = arith.constant 0 : index
    %211 = vector.load %arg6[%c12, %c0_108] : memref<38x64xf32, #tpu.memory_space<vmem>>, vector<1x32xf32>
    %212 = vector.broadcast %211 : vector<1x32xf32> to vector<8x32xf32>
    %213 = arith.addf %210, %212 : vector<8x32xf32>
    %214 = arith.addf %46, %213 : vector<8x32xf32>
    %c13 = arith.constant 13 : index
    %c0_109 = arith.constant 0 : index
    %215 = vector.load %arg6[%c13, %c0_109] : memref<38x64xf32, #tpu.memory_space<vmem>>, vector<1x32xf32>
    %c14 = arith.constant 14 : index
    %c0_110 = arith.constant 0 : index
    %216 = vector.load %arg6[%c14, %c0_110] : memref<38x64xf32, #tpu.memory_space<vmem>>, vector<1x32xf32>
    %cst_111 = arith.constant dense<0.000000e+00> : vector<8xf32>
    %217 = vector.multi_reduction <add>, %214, %cst_111 [1] : vector<8x32xf32> to vector<8xf32>
    %218 = vector.shape_cast %217 : vector<8xf32> to vector<8x1xf32>
    %cst_112 = arith.constant 3.200000e+01 : f32
    %219 = vector.broadcast %cst_112 : f32 to vector<8x1xf32>
    %220 = arith.divf %218, %219 : vector<8x1xf32>
    %221 = vector.broadcast %220 : vector<8x1xf32> to vector<8x32xf32>
    %222 = arith.subf %214, %221 : vector<8x32xf32>
    %223 = arith.mulf %222, %222 : vector<8x32xf32>
    %cst_113 = arith.constant dense<0.000000e+00> : vector<8xf32>
    %224 = vector.multi_reduction <add>, %223, %cst_113 [1] : vector<8x32xf32> to vector<8xf32>
    %225 = vector.shape_cast %224 : vector<8xf32> to vector<8x1xf32>
    %cst_114 = arith.constant 3.200000e+01 : f32
    %226 = vector.broadcast %cst_114 : f32 to vector<8x1xf32>
    %227 = arith.divf %225, %226 : vector<8x1xf32>
    %cst_115 = arith.constant 9.99999996E-13 : f32
    %228 = vector.broadcast %cst_115 : f32 to vector<8x1xf32>
    %229 = arith.addf %227, %228 : vector<8x1xf32>
    %230 = math.rsqrt %229 : vector<8x1xf32>
    %231 = vector.broadcast %230 : vector<8x1xf32> to vector<8x32xf32>
    %232 = arith.mulf %222, %231 : vector<8x32xf32>
    %233 = vector.broadcast %215 : vector<1x32xf32> to vector<8x32xf32>
    %234 = arith.mulf %232, %233 : vector<8x32xf32>
    %235 = vector.broadcast %216 : vector<1x32xf32> to vector<8x32xf32>
    %236 = arith.addf %234, %235 : vector<8x32xf32>
    %c32 = arith.constant 32 : index
    %c0_116 = arith.constant 0 : index
    %237 = vector.load %arg5[%c32, %c0_116] : memref<256x64xbf16, #tpu.memory_space<vmem>>, vector<32x64xbf16>
    %c64 = arith.constant 64 : index
    %c0_117 = arith.constant 0 : index
    %238 = vector.load %arg5[%c64, %c0_117] : memref<256x64xbf16, #tpu.memory_space<vmem>>, vector<64x32xbf16>
    %239 = arith.truncf %236 : vector<8x32xf32> to vector<8x32xbf16>
    %cst_118 = arith.constant dense<0.000000e+00> : vector<8x64xf32>
    %240 = tpu.matmul %239, %237, %cst_118 {dimension_numbers = #tpu.dot_dimension_numbers<[1], [0], [0], [1], [0, 0, 1, 1], [], []>} : vector<8x32xbf16>, vector<32x64xbf16>, vector<8x64xf32> -> vector<8x64xf32>
    %c15 = arith.constant 15 : index
    %c0_119 = arith.constant 0 : index
    %241 = vector.load %arg6[%c15, %c0_119] : memref<38x64xf32, #tpu.memory_space<vmem>>, vector<1x64xf32>
    %242 = vector.broadcast %241 : vector<1x64xf32> to vector<8x64xf32>
    %243 = arith.addf %240, %242 : vector<8x64xf32>
    %cst_120 = arith.constant 5.000000e-01 : f32
    %244 = vector.broadcast %cst_120 : f32 to vector<8x64xf32>
    %245 = arith.mulf %244, %243 : vector<8x64xf32>
    %cst_121 = arith.constant 4.471500e-02 : f32
    %246 = vector.broadcast %cst_121 : f32 to vector<8x64xf32>
    %247 = arith.mulf %246, %243 : vector<8x64xf32>
    %248 = arith.mulf %247, %243 : vector<8x64xf32>
    %249 = arith.mulf %248, %243 : vector<8x64xf32>
    %250 = arith.addf %243, %249 : vector<8x64xf32>
    %cst_122 = arith.constant 0.797884583 : f32
    %251 = vector.broadcast %cst_122 : f32 to vector<8x64xf32>
    %252 = arith.mulf %251, %250 : vector<8x64xf32>
    %253 = math.tanh %252 : vector<8x64xf32>
    %cst_123 = arith.constant 1.000000e+00 : f32
    %254 = vector.broadcast %cst_123 : f32 to vector<8x64xf32>
    %255 = arith.addf %254, %253 : vector<8x64xf32>
    %256 = arith.mulf %245, %255 : vector<8x64xf32>
    %257 = arith.truncf %256 : vector<8x64xf32> to vector<8x64xbf16>
    %cst_124 = arith.constant dense<0.000000e+00> : vector<8x32xf32>
    %258 = tpu.matmul %257, %238, %cst_124 {dimension_numbers = #tpu.dot_dimension_numbers<[1], [0], [0], [1], [0, 0, 1, 1], [], []>} : vector<8x64xbf16>, vector<64x32xbf16>, vector<8x32xf32> -> vector<8x32xf32>
    %c16_125 = arith.constant 16 : index
    %c0_126 = arith.constant 0 : index
    %259 = vector.load %arg6[%c16_125, %c0_126] : memref<38x64xf32, #tpu.memory_space<vmem>>, vector<1x32xf32>
    %260 = vector.broadcast %259 : vector<1x32xf32> to vector<8x32xf32>
    %261 = arith.addf %258, %260 : vector<8x32xf32>
    %262 = arith.addf %236, %261 : vector<8x32xf32>
    %c17 = arith.constant 17 : index
    %c0_127 = arith.constant 0 : index
    %263 = vector.load %arg6[%c17, %c0_127] : memref<38x64xf32, #tpu.memory_space<vmem>>, vector<1x32xf32>
    %c18 = arith.constant 18 : index
    %c0_128 = arith.constant 0 : index
    %264 = vector.load %arg6[%c18, %c0_128] : memref<38x64xf32, #tpu.memory_space<vmem>>, vector<1x32xf32>
    %cst_129 = arith.constant dense<0.000000e+00> : vector<8xf32>
    %265 = vector.multi_reduction <add>, %262, %cst_129 [1] : vector<8x32xf32> to vector<8xf32>
    %266 = vector.shape_cast %265 : vector<8xf32> to vector<8x1xf32>
    %cst_130 = arith.constant 3.200000e+01 : f32
    %267 = vector.broadcast %cst_130 : f32 to vector<8x1xf32>
    %268 = arith.divf %266, %267 : vector<8x1xf32>
    %269 = vector.broadcast %268 : vector<8x1xf32> to vector<8x32xf32>
    %270 = arith.subf %262, %269 : vector<8x32xf32>
    %271 = arith.mulf %270, %270 : vector<8x32xf32>
    %cst_131 = arith.constant dense<0.000000e+00> : vector<8xf32>
    %272 = vector.multi_reduction <add>, %271, %cst_131 [1] : vector<8x32xf32> to vector<8xf32>
    %273 = vector.shape_cast %272 : vector<8xf32> to vector<8x1xf32>
    %cst_132 = arith.constant 3.200000e+01 : f32
    %274 = vector.broadcast %cst_132 : f32 to vector<8x1xf32>
    %275 = arith.divf %273, %274 : vector<8x1xf32>
    %cst_133 = arith.constant 9.99999996E-13 : f32
    %276 = vector.broadcast %cst_133 : f32 to vector<8x1xf32>
    %277 = arith.addf %275, %276 : vector<8x1xf32>
    %278 = math.rsqrt %277 : vector<8x1xf32>
    %279 = vector.broadcast %278 : vector<8x1xf32> to vector<8x32xf32>
    %280 = arith.mulf %270, %279 : vector<8x32xf32>
    %281 = vector.broadcast %263 : vector<1x32xf32> to vector<8x32xf32>
    %282 = arith.mulf %280, %281 : vector<8x32xf32>
    %283 = vector.broadcast %264 : vector<1x32xf32> to vector<8x32xf32>
    %284 = arith.addf %282, %283 : vector<8x32xf32>
    %285 = arith.truncf %284 : vector<8x32xf32> to vector<8x32xbf16>
    %cst_134 = arith.constant 0.000000e+00 : f32
    %286 = vector.broadcast %cst_134 : f32 to vector<8x32xf32>
    %c12_135 = arith.constant 12 : index
    %c0_136 = arith.constant 0 : index
    %c0_137 = arith.constant 0 : index
    %287 = vector.load %arg4[%c12_135, %c0_136, %c0_137] : memref<24x32x8xbf16, #tpu.memory_space<vmem>>, vector<1x32x8xbf16>
    %288 = vector.shape_cast %287 : vector<1x32x8xbf16> to vector<32x8xbf16>
    %c16_138 = arith.constant 16 : index
    %c0_139 = arith.constant 0 : index
    %c0_140 = arith.constant 0 : index
    %289 = vector.load %arg4[%c16_138, %c0_139, %c0_140] : memref<24x32x8xbf16, #tpu.memory_space<vmem>>, vector<1x32x8xbf16>
    %290 = vector.shape_cast %289 : vector<1x32x8xbf16> to vector<32x8xbf16>
    %c20 = arith.constant 20 : index
    %c0_141 = arith.constant 0 : index
    %c0_142 = arith.constant 0 : index
    %291 = vector.load %arg4[%c20, %c0_141, %c0_142] : memref<24x32x8xbf16, #tpu.memory_space<vmem>>, vector<1x32x8xbf16>
    %292 = vector.shape_cast %291 : vector<1x32x8xbf16> to vector<32x8xbf16>
    %cst_143 = arith.constant dense<0.000000e+00> : vector<8x8xf32>
    %293 = tpu.matmul %285, %288, %cst_143 {dimension_numbers = #tpu.dot_dimension_numbers<[1], [0], [0], [1], [0, 0, 1, 1], [], []>} : vector<8x32xbf16>, vector<32x8xbf16>, vector<8x8xf32> -> vector<8x8xf32>
    %c19 = arith.constant 19 : index
    %c0_144 = arith.constant 0 : index
    %294 = vector.load %arg6[%c19, %c0_144] : memref<38x64xf32, #tpu.memory_space<vmem>>, vector<1x8xf32>
    %295 = vector.broadcast %294 : vector<1x8xf32> to vector<8x8xf32>
    %296 = arith.addf %293, %295 : vector<8x8xf32>
    %cst_145 = arith.constant dense<0.000000e+00> : vector<8x8xf32>
    %297 = tpu.matmul %285, %290, %cst_145 {dimension_numbers = #tpu.dot_dimension_numbers<[1], [0], [0], [1], [0, 0, 1, 1], [], []>} : vector<8x32xbf16>, vector<32x8xbf16>, vector<8x8xf32> -> vector<8x8xf32>
    %c23 = arith.constant 23 : index
    %c0_146 = arith.constant 0 : index
    %298 = vector.load %arg6[%c23, %c0_146] : memref<38x64xf32, #tpu.memory_space<vmem>>, vector<1x8xf32>
    %299 = vector.broadcast %298 : vector<1x8xf32> to vector<8x8xf32>
    %300 = arith.addf %297, %299 : vector<8x8xf32>
    %cst_147 = arith.constant dense<0.000000e+00> : vector<8x8xf32>
    %301 = tpu.matmul %285, %292, %cst_147 {dimension_numbers = #tpu.dot_dimension_numbers<[1], [0], [0], [1], [0, 0, 1, 1], [], []>} : vector<8x32xbf16>, vector<32x8xbf16>, vector<8x8xf32> -> vector<8x8xf32>
    %c27 = arith.constant 27 : index
    %c0_148 = arith.constant 0 : index
    %302 = vector.load %arg6[%c27, %c0_148] : memref<38x64xf32, #tpu.memory_space<vmem>>, vector<1x8xf32>
    %303 = vector.broadcast %302 : vector<1x8xf32> to vector<8x8xf32>
    %304 = arith.addf %301, %303 : vector<8x8xf32>
    %305 = arith.truncf %296 : vector<8x8xf32> to vector<8x8xbf16>
    %306 = arith.truncf %300 : vector<8x8xf32> to vector<8x8xbf16>
    %cst_149 = arith.constant dense<0.000000e+00> : vector<8x8xf32>
    %307 = tpu.matmul %305, %306, %cst_149 {dimension_numbers = #tpu.dot_dimension_numbers<[1], [1], [0], [0], [0, 0, 1, 0], [], []>} : vector<8x8xbf16>, vector<8x8xbf16>, vector<8x8xf32> -> vector<8x8xf32>
    %308 = vector.broadcast %48 : vector<1x8xf32> to vector<8x8xf32>
    %309 = arith.addf %307, %308 : vector<8x8xf32>
    %cst_150 = arith.constant dense<0xFF800000> : vector<8xf32>
    %310 = vector.multi_reduction <maximumf>, %309, %cst_150 [1] : vector<8x8xf32> to vector<8xf32>
    %311 = vector.shape_cast %310 : vector<8xf32> to vector<8x1xf32>
    %312 = vector.broadcast %311 : vector<8x1xf32> to vector<8x8xf32>
    %313 = arith.subf %309, %312 : vector<8x8xf32>
    %314 = math.exp %313 : vector<8x8xf32>
    %cst_151 = arith.constant dense<0.000000e+00> : vector<8xf32>
    %315 = vector.multi_reduction <add>, %314, %cst_151 [1] : vector<8x8xf32> to vector<8xf32>
    %316 = vector.shape_cast %315 : vector<8xf32> to vector<8x1xf32>
    %317 = tpu.reciprocal %316 {approx = true} : vector<8x1xf32> -> vector<8x1xf32>
    %318 = vector.broadcast %317 : vector<8x1xf32> to vector<8x8xf32>
    %319 = arith.mulf %314, %318 : vector<8x8xf32>
    %320 = arith.truncf %319 : vector<8x8xf32> to vector<8x8xbf16>
    %321 = arith.truncf %304 : vector<8x8xf32> to vector<8x8xbf16>
    %cst_152 = arith.constant dense<0.000000e+00> : vector<8x8xf32>
    %322 = tpu.matmul %320, %321, %cst_152 {dimension_numbers = #tpu.dot_dimension_numbers<[1], [0], [0], [1], [0, 0, 1, 1], [], []>} : vector<8x8xbf16>, vector<8x8xbf16>, vector<8x8xf32> -> vector<8x8xf32>
    %c128 = arith.constant 128 : index
    %c0_153 = arith.constant 0 : index
    %323 = vector.load %arg5[%c128, %c0_153] : memref<256x64xbf16, #tpu.memory_space<vmem>>, vector<8x32xbf16>
    %324 = arith.truncf %322 : vector<8x8xf32> to vector<8x8xbf16>
    %cst_154 = arith.constant dense<0.000000e+00> : vector<8x32xf32>
    %325 = tpu.matmul %324, %323, %cst_154 {dimension_numbers = #tpu.dot_dimension_numbers<[1], [0], [0], [1], [0, 0, 1, 1], [], []>} : vector<8x8xbf16>, vector<8x32xbf16>, vector<8x32xf32> -> vector<8x32xf32>
    %326 = arith.addf %286, %325 : vector<8x32xf32>
    %c13_155 = arith.constant 13 : index
    %c0_156 = arith.constant 0 : index
    %c0_157 = arith.constant 0 : index
    %327 = vector.load %arg4[%c13_155, %c0_156, %c0_157] : memref<24x32x8xbf16, #tpu.memory_space<vmem>>, vector<1x32x8xbf16>
    %328 = vector.shape_cast %327 : vector<1x32x8xbf16> to vector<32x8xbf16>
    %c17_158 = arith.constant 17 : index
    %c0_159 = arith.constant 0 : index
    %c0_160 = arith.constant 0 : index
    %329 = vector.load %arg4[%c17_158, %c0_159, %c0_160] : memref<24x32x8xbf16, #tpu.memory_space<vmem>>, vector<1x32x8xbf16>
    %330 = vector.shape_cast %329 : vector<1x32x8xbf16> to vector<32x8xbf16>
    %c21 = arith.constant 21 : index
    %c0_161 = arith.constant 0 : index
    %c0_162 = arith.constant 0 : index
    %331 = vector.load %arg4[%c21, %c0_161, %c0_162] : memref<24x32x8xbf16, #tpu.memory_space<vmem>>, vector<1x32x8xbf16>
    %332 = vector.shape_cast %331 : vector<1x32x8xbf16> to vector<32x8xbf16>
    %cst_163 = arith.constant dense<0.000000e+00> : vector<8x8xf32>
    %333 = tpu.matmul %285, %328, %cst_163 {dimension_numbers = #tpu.dot_dimension_numbers<[1], [0], [0], [1], [0, 0, 1, 1], [], []>} : vector<8x32xbf16>, vector<32x8xbf16>, vector<8x8xf32> -> vector<8x8xf32>
    %c20_164 = arith.constant 20 : index
    %c0_165 = arith.constant 0 : index
    %334 = vector.load %arg6[%c20_164, %c0_165] : memref<38x64xf32, #tpu.memory_space<vmem>>, vector<1x8xf32>
    %335 = vector.broadcast %334 : vector<1x8xf32> to vector<8x8xf32>
    %336 = arith.addf %333, %335 : vector<8x8xf32>
    %cst_166 = arith.constant dense<0.000000e+00> : vector<8x8xf32>
    %337 = tpu.matmul %285, %330, %cst_166 {dimension_numbers = #tpu.dot_dimension_numbers<[1], [0], [0], [1], [0, 0, 1, 1], [], []>} : vector<8x32xbf16>, vector<32x8xbf16>, vector<8x8xf32> -> vector<8x8xf32>
    %c24_167 = arith.constant 24 : index
    %c0_168 = arith.constant 0 : index
    %338 = vector.load %arg6[%c24_167, %c0_168] : memref<38x64xf32, #tpu.memory_space<vmem>>, vector<1x8xf32>
    %339 = vector.broadcast %338 : vector<1x8xf32> to vector<8x8xf32>
    %340 = arith.addf %337, %339 : vector<8x8xf32>
    %cst_169 = arith.constant dense<0.000000e+00> : vector<8x8xf32>
    %341 = tpu.matmul %285, %332, %cst_169 {dimension_numbers = #tpu.dot_dimension_numbers<[1], [0], [0], [1], [0, 0, 1, 1], [], []>} : vector<8x32xbf16>, vector<32x8xbf16>, vector<8x8xf32> -> vector<8x8xf32>
    %c28 = arith.constant 28 : index
    %c0_170 = arith.constant 0 : index
    %342 = vector.load %arg6[%c28, %c0_170] : memref<38x64xf32, #tpu.memory_space<vmem>>, vector<1x8xf32>
    %343 = vector.broadcast %342 : vector<1x8xf32> to vector<8x8xf32>
    %344 = arith.addf %341, %343 : vector<8x8xf32>
    %345 = arith.truncf %336 : vector<8x8xf32> to vector<8x8xbf16>
    %346 = arith.truncf %340 : vector<8x8xf32> to vector<8x8xbf16>
    %cst_171 = arith.constant dense<0.000000e+00> : vector<8x8xf32>
    %347 = tpu.matmul %345, %346, %cst_171 {dimension_numbers = #tpu.dot_dimension_numbers<[1], [1], [0], [0], [0, 0, 1, 0], [], []>} : vector<8x8xbf16>, vector<8x8xbf16>, vector<8x8xf32> -> vector<8x8xf32>
    %348 = vector.broadcast %48 : vector<1x8xf32> to vector<8x8xf32>
    %349 = arith.addf %347, %348 : vector<8x8xf32>
    %cst_172 = arith.constant dense<0xFF800000> : vector<8xf32>
    %350 = vector.multi_reduction <maximumf>, %349, %cst_172 [1] : vector<8x8xf32> to vector<8xf32>
    %351 = vector.shape_cast %350 : vector<8xf32> to vector<8x1xf32>
    %352 = vector.broadcast %351 : vector<8x1xf32> to vector<8x8xf32>
    %353 = arith.subf %349, %352 : vector<8x8xf32>
    %354 = math.exp %353 : vector<8x8xf32>
    %cst_173 = arith.constant dense<0.000000e+00> : vector<8xf32>
    %355 = vector.multi_reduction <add>, %354, %cst_173 [1] : vector<8x8xf32> to vector<8xf32>
    %356 = vector.shape_cast %355 : vector<8xf32> to vector<8x1xf32>
    %357 = tpu.reciprocal %356 {approx = true} : vector<8x1xf32> -> vector<8x1xf32>
    %358 = vector.broadcast %357 : vector<8x1xf32> to vector<8x8xf32>
    %359 = arith.mulf %354, %358 : vector<8x8xf32>
    %360 = arith.truncf %359 : vector<8x8xf32> to vector<8x8xbf16>
    %361 = arith.truncf %344 : vector<8x8xf32> to vector<8x8xbf16>
    %cst_174 = arith.constant dense<0.000000e+00> : vector<8x8xf32>
    %362 = tpu.matmul %360, %361, %cst_174 {dimension_numbers = #tpu.dot_dimension_numbers<[1], [0], [0], [1], [0, 0, 1, 1], [], []>} : vector<8x8xbf16>, vector<8x8xbf16>, vector<8x8xf32> -> vector<8x8xf32>
    %c136 = arith.constant 136 : index
    %c0_175 = arith.constant 0 : index
    %363 = vector.load %arg5[%c136, %c0_175] : memref<256x64xbf16, #tpu.memory_space<vmem>>, vector<8x32xbf16>
    %364 = arith.truncf %362 : vector<8x8xf32> to vector<8x8xbf16>
    %cst_176 = arith.constant dense<0.000000e+00> : vector<8x32xf32>
    %365 = tpu.matmul %364, %363, %cst_176 {dimension_numbers = #tpu.dot_dimension_numbers<[1], [0], [0], [1], [0, 0, 1, 1], [], []>} : vector<8x8xbf16>, vector<8x32xbf16>, vector<8x32xf32> -> vector<8x32xf32>
    %366 = arith.addf %326, %365 : vector<8x32xf32>
    %c14_177 = arith.constant 14 : index
    %c0_178 = arith.constant 0 : index
    %c0_179 = arith.constant 0 : index
    %367 = vector.load %arg4[%c14_177, %c0_178, %c0_179] : memref<24x32x8xbf16, #tpu.memory_space<vmem>>, vector<1x32x8xbf16>
    %368 = vector.shape_cast %367 : vector<1x32x8xbf16> to vector<32x8xbf16>
    %c18_180 = arith.constant 18 : index
    %c0_181 = arith.constant 0 : index
    %c0_182 = arith.constant 0 : index
    %369 = vector.load %arg4[%c18_180, %c0_181, %c0_182] : memref<24x32x8xbf16, #tpu.memory_space<vmem>>, vector<1x32x8xbf16>
    %370 = vector.shape_cast %369 : vector<1x32x8xbf16> to vector<32x8xbf16>
    %c22 = arith.constant 22 : index
    %c0_183 = arith.constant 0 : index
    %c0_184 = arith.constant 0 : index
    %371 = vector.load %arg4[%c22, %c0_183, %c0_184] : memref<24x32x8xbf16, #tpu.memory_space<vmem>>, vector<1x32x8xbf16>
    %372 = vector.shape_cast %371 : vector<1x32x8xbf16> to vector<32x8xbf16>
    %cst_185 = arith.constant dense<0.000000e+00> : vector<8x8xf32>
    %373 = tpu.matmul %285, %368, %cst_185 {dimension_numbers = #tpu.dot_dimension_numbers<[1], [0], [0], [1], [0, 0, 1, 1], [], []>} : vector<8x32xbf16>, vector<32x8xbf16>, vector<8x8xf32> -> vector<8x8xf32>
    %c21_186 = arith.constant 21 : index
    %c0_187 = arith.constant 0 : index
    %374 = vector.load %arg6[%c21_186, %c0_187] : memref<38x64xf32, #tpu.memory_space<vmem>>, vector<1x8xf32>
    %375 = vector.broadcast %374 : vector<1x8xf32> to vector<8x8xf32>
    %376 = arith.addf %373, %375 : vector<8x8xf32>
    %cst_188 = arith.constant dense<0.000000e+00> : vector<8x8xf32>
    %377 = tpu.matmul %285, %370, %cst_188 {dimension_numbers = #tpu.dot_dimension_numbers<[1], [0], [0], [1], [0, 0, 1, 1], [], []>} : vector<8x32xbf16>, vector<32x8xbf16>, vector<8x8xf32> -> vector<8x8xf32>
    %c25 = arith.constant 25 : index
    %c0_189 = arith.constant 0 : index
    %378 = vector.load %arg6[%c25, %c0_189] : memref<38x64xf32, #tpu.memory_space<vmem>>, vector<1x8xf32>
    %379 = vector.broadcast %378 : vector<1x8xf32> to vector<8x8xf32>
    %380 = arith.addf %377, %379 : vector<8x8xf32>
    %cst_190 = arith.constant dense<0.000000e+00> : vector<8x8xf32>
    %381 = tpu.matmul %285, %372, %cst_190 {dimension_numbers = #tpu.dot_dimension_numbers<[1], [0], [0], [1], [0, 0, 1, 1], [], []>} : vector<8x32xbf16>, vector<32x8xbf16>, vector<8x8xf32> -> vector<8x8xf32>
    %c29 = arith.constant 29 : index
    %c0_191 = arith.constant 0 : index
    %382 = vector.load %arg6[%c29, %c0_191] : memref<38x64xf32, #tpu.memory_space<vmem>>, vector<1x8xf32>
    %383 = vector.broadcast %382 : vector<1x8xf32> to vector<8x8xf32>
    %384 = arith.addf %381, %383 : vector<8x8xf32>
    %385 = arith.truncf %376 : vector<8x8xf32> to vector<8x8xbf16>
    %386 = arith.truncf %380 : vector<8x8xf32> to vector<8x8xbf16>
    %cst_192 = arith.constant dense<0.000000e+00> : vector<8x8xf32>
    %387 = tpu.matmul %385, %386, %cst_192 {dimension_numbers = #tpu.dot_dimension_numbers<[1], [1], [0], [0], [0, 0, 1, 0], [], []>} : vector<8x8xbf16>, vector<8x8xbf16>, vector<8x8xf32> -> vector<8x8xf32>
    %388 = vector.broadcast %48 : vector<1x8xf32> to vector<8x8xf32>
    %389 = arith.addf %387, %388 : vector<8x8xf32>
    %cst_193 = arith.constant dense<0xFF800000> : vector<8xf32>
    %390 = vector.multi_reduction <maximumf>, %389, %cst_193 [1] : vector<8x8xf32> to vector<8xf32>
    %391 = vector.shape_cast %390 : vector<8xf32> to vector<8x1xf32>
    %392 = vector.broadcast %391 : vector<8x1xf32> to vector<8x8xf32>
    %393 = arith.subf %389, %392 : vector<8x8xf32>
    %394 = math.exp %393 : vector<8x8xf32>
    %cst_194 = arith.constant dense<0.000000e+00> : vector<8xf32>
    %395 = vector.multi_reduction <add>, %394, %cst_194 [1] : vector<8x8xf32> to vector<8xf32>
    %396 = vector.shape_cast %395 : vector<8xf32> to vector<8x1xf32>
    %397 = tpu.reciprocal %396 {approx = true} : vector<8x1xf32> -> vector<8x1xf32>
    %398 = vector.broadcast %397 : vector<8x1xf32> to vector<8x8xf32>
    %399 = arith.mulf %394, %398 : vector<8x8xf32>
    %400 = arith.truncf %399 : vector<8x8xf32> to vector<8x8xbf16>
    %401 = arith.truncf %384 : vector<8x8xf32> to vector<8x8xbf16>
    %cst_195 = arith.constant dense<0.000000e+00> : vector<8x8xf32>
    %402 = tpu.matmul %400, %401, %cst_195 {dimension_numbers = #tpu.dot_dimension_numbers<[1], [0], [0], [1], [0, 0, 1, 1], [], []>} : vector<8x8xbf16>, vector<8x8xbf16>, vector<8x8xf32> -> vector<8x8xf32>
    %c144 = arith.constant 144 : index
    %c0_196 = arith.constant 0 : index
    %403 = vector.load %arg5[%c144, %c0_196] : memref<256x64xbf16, #tpu.memory_space<vmem>>, vector<8x32xbf16>
    %404 = arith.truncf %402 : vector<8x8xf32> to vector<8x8xbf16>
    %cst_197 = arith.constant dense<0.000000e+00> : vector<8x32xf32>
    %405 = tpu.matmul %404, %403, %cst_197 {dimension_numbers = #tpu.dot_dimension_numbers<[1], [0], [0], [1], [0, 0, 1, 1], [], []>} : vector<8x8xbf16>, vector<8x32xbf16>, vector<8x32xf32> -> vector<8x32xf32>
    %406 = arith.addf %366, %405 : vector<8x32xf32>
    %c15_198 = arith.constant 15 : index
    %c0_199 = arith.constant 0 : index
    %c0_200 = arith.constant 0 : index
    %407 = vector.load %arg4[%c15_198, %c0_199, %c0_200] : memref<24x32x8xbf16, #tpu.memory_space<vmem>>, vector<1x32x8xbf16>
    %408 = vector.shape_cast %407 : vector<1x32x8xbf16> to vector<32x8xbf16>
    %c19_201 = arith.constant 19 : index
    %c0_202 = arith.constant 0 : index
    %c0_203 = arith.constant 0 : index
    %409 = vector.load %arg4[%c19_201, %c0_202, %c0_203] : memref<24x32x8xbf16, #tpu.memory_space<vmem>>, vector<1x32x8xbf16>
    %410 = vector.shape_cast %409 : vector<1x32x8xbf16> to vector<32x8xbf16>
    %c23_204 = arith.constant 23 : index
    %c0_205 = arith.constant 0 : index
    %c0_206 = arith.constant 0 : index
    %411 = vector.load %arg4[%c23_204, %c0_205, %c0_206] : memref<24x32x8xbf16, #tpu.memory_space<vmem>>, vector<1x32x8xbf16>
    %412 = vector.shape_cast %411 : vector<1x32x8xbf16> to vector<32x8xbf16>
    %cst_207 = arith.constant dense<0.000000e+00> : vector<8x8xf32>
    %413 = tpu.matmul %285, %408, %cst_207 {dimension_numbers = #tpu.dot_dimension_numbers<[1], [0], [0], [1], [0, 0, 1, 1], [], []>} : vector<8x32xbf16>, vector<32x8xbf16>, vector<8x8xf32> -> vector<8x8xf32>
    %c22_208 = arith.constant 22 : index
    %c0_209 = arith.constant 0 : index
    %414 = vector.load %arg6[%c22_208, %c0_209] : memref<38x64xf32, #tpu.memory_space<vmem>>, vector<1x8xf32>
    %415 = vector.broadcast %414 : vector<1x8xf32> to vector<8x8xf32>
    %416 = arith.addf %413, %415 : vector<8x8xf32>
    %cst_210 = arith.constant dense<0.000000e+00> : vector<8x8xf32>
    %417 = tpu.matmul %285, %410, %cst_210 {dimension_numbers = #tpu.dot_dimension_numbers<[1], [0], [0], [1], [0, 0, 1, 1], [], []>} : vector<8x32xbf16>, vector<32x8xbf16>, vector<8x8xf32> -> vector<8x8xf32>
    %c26 = arith.constant 26 : index
    %c0_211 = arith.constant 0 : index
    %418 = vector.load %arg6[%c26, %c0_211] : memref<38x64xf32, #tpu.memory_space<vmem>>, vector<1x8xf32>
    %419 = vector.broadcast %418 : vector<1x8xf32> to vector<8x8xf32>
    %420 = arith.addf %417, %419 : vector<8x8xf32>
    %cst_212 = arith.constant dense<0.000000e+00> : vector<8x8xf32>
    %421 = tpu.matmul %285, %412, %cst_212 {dimension_numbers = #tpu.dot_dimension_numbers<[1], [0], [0], [1], [0, 0, 1, 1], [], []>} : vector<8x32xbf16>, vector<32x8xbf16>, vector<8x8xf32> -> vector<8x8xf32>
    %c30 = arith.constant 30 : index
    %c0_213 = arith.constant 0 : index
    %422 = vector.load %arg6[%c30, %c0_213] : memref<38x64xf32, #tpu.memory_space<vmem>>, vector<1x8xf32>
    %423 = vector.broadcast %422 : vector<1x8xf32> to vector<8x8xf32>
    %424 = arith.addf %421, %423 : vector<8x8xf32>
    %425 = arith.truncf %416 : vector<8x8xf32> to vector<8x8xbf16>
    %426 = arith.truncf %420 : vector<8x8xf32> to vector<8x8xbf16>
    %cst_214 = arith.constant dense<0.000000e+00> : vector<8x8xf32>
    %427 = tpu.matmul %425, %426, %cst_214 {dimension_numbers = #tpu.dot_dimension_numbers<[1], [1], [0], [0], [0, 0, 1, 0], [], []>} : vector<8x8xbf16>, vector<8x8xbf16>, vector<8x8xf32> -> vector<8x8xf32>
    %428 = vector.broadcast %48 : vector<1x8xf32> to vector<8x8xf32>
    %429 = arith.addf %427, %428 : vector<8x8xf32>
    %cst_215 = arith.constant dense<0xFF800000> : vector<8xf32>
    %430 = vector.multi_reduction <maximumf>, %429, %cst_215 [1] : vector<8x8xf32> to vector<8xf32>
    %431 = vector.shape_cast %430 : vector<8xf32> to vector<8x1xf32>
    %432 = vector.broadcast %431 : vector<8x1xf32> to vector<8x8xf32>
    %433 = arith.subf %429, %432 : vector<8x8xf32>
    %434 = math.exp %433 : vector<8x8xf32>
    %cst_216 = arith.constant dense<0.000000e+00> : vector<8xf32>
    %435 = vector.multi_reduction <add>, %434, %cst_216 [1] : vector<8x8xf32> to vector<8xf32>
    %436 = vector.shape_cast %435 : vector<8xf32> to vector<8x1xf32>
    %437 = tpu.reciprocal %436 {approx = true} : vector<8x1xf32> -> vector<8x1xf32>
    %438 = vector.broadcast %437 : vector<8x1xf32> to vector<8x8xf32>
    %439 = arith.mulf %434, %438 : vector<8x8xf32>
    %440 = arith.truncf %439 : vector<8x8xf32> to vector<8x8xbf16>
    %441 = arith.truncf %424 : vector<8x8xf32> to vector<8x8xbf16>
    %cst_217 = arith.constant dense<0.000000e+00> : vector<8x8xf32>
    %442 = tpu.matmul %440, %441, %cst_217 {dimension_numbers = #tpu.dot_dimension_numbers<[1], [0], [0], [1], [0, 0, 1, 1], [], []>} : vector<8x8xbf16>, vector<8x8xbf16>, vector<8x8xf32> -> vector<8x8xf32>
    %c152 = arith.constant 152 : index
    %c0_218 = arith.constant 0 : index
    %443 = vector.load %arg5[%c152, %c0_218] : memref<256x64xbf16, #tpu.memory_space<vmem>>, vector<8x32xbf16>
    %444 = arith.truncf %442 : vector<8x8xf32> to vector<8x8xbf16>
    %cst_219 = arith.constant dense<0.000000e+00> : vector<8x32xf32>
    %445 = tpu.matmul %444, %443, %cst_219 {dimension_numbers = #tpu.dot_dimension_numbers<[1], [0], [0], [1], [0, 0, 1, 1], [], []>} : vector<8x8xbf16>, vector<8x32xbf16>, vector<8x32xf32> -> vector<8x32xf32>
    %446 = arith.addf %406, %445 : vector<8x32xf32>
    %c31 = arith.constant 31 : index
    %c0_220 = arith.constant 0 : index
    %447 = vector.load %arg6[%c31, %c0_220] : memref<38x64xf32, #tpu.memory_space<vmem>>, vector<1x32xf32>
    %448 = vector.broadcast %447 : vector<1x32xf32> to vector<8x32xf32>
    %449 = arith.addf %446, %448 : vector<8x32xf32>
    %450 = arith.addf %284, %449 : vector<8x32xf32>
    %c32_221 = arith.constant 32 : index
    %c0_222 = arith.constant 0 : index
    %451 = vector.load %arg6[%c32_221, %c0_222] : memref<38x64xf32, #tpu.memory_space<vmem>>, vector<1x32xf32>
    %c33 = arith.constant 33 : index
    %c0_223 = arith.constant 0 : index
    %452 = vector.load %arg6[%c33, %c0_223] : memref<38x64xf32, #tpu.memory_space<vmem>>, vector<1x32xf32>
    %cst_224 = arith.constant dense<0.000000e+00> : vector<8xf32>
    %453 = vector.multi_reduction <add>, %450, %cst_224 [1] : vector<8x32xf32> to vector<8xf32>
    %454 = vector.shape_cast %453 : vector<8xf32> to vector<8x1xf32>
    %cst_225 = arith.constant 3.200000e+01 : f32
    %455 = vector.broadcast %cst_225 : f32 to vector<8x1xf32>
    %456 = arith.divf %454, %455 : vector<8x1xf32>
    %457 = vector.broadcast %456 : vector<8x1xf32> to vector<8x32xf32>
    %458 = arith.subf %450, %457 : vector<8x32xf32>
    %459 = arith.mulf %458, %458 : vector<8x32xf32>
    %cst_226 = arith.constant dense<0.000000e+00> : vector<8xf32>
    %460 = vector.multi_reduction <add>, %459, %cst_226 [1] : vector<8x32xf32> to vector<8xf32>
    %461 = vector.shape_cast %460 : vector<8xf32> to vector<8x1xf32>
    %cst_227 = arith.constant 3.200000e+01 : f32
    %462 = vector.broadcast %cst_227 : f32 to vector<8x1xf32>
    %463 = arith.divf %461, %462 : vector<8x1xf32>
    %cst_228 = arith.constant 9.99999996E-13 : f32
    %464 = vector.broadcast %cst_228 : f32 to vector<8x1xf32>
    %465 = arith.addf %463, %464 : vector<8x1xf32>
    %466 = math.rsqrt %465 : vector<8x1xf32>
    %467 = vector.broadcast %466 : vector<8x1xf32> to vector<8x32xf32>
    %468 = arith.mulf %458, %467 : vector<8x32xf32>
    %469 = vector.broadcast %451 : vector<1x32xf32> to vector<8x32xf32>
    %470 = arith.mulf %468, %469 : vector<8x32xf32>
    %471 = vector.broadcast %452 : vector<1x32xf32> to vector<8x32xf32>
    %472 = arith.addf %470, %471 : vector<8x32xf32>
    %c160 = arith.constant 160 : index
    %c0_229 = arith.constant 0 : index
    %473 = vector.load %arg5[%c160, %c0_229] : memref<256x64xbf16, #tpu.memory_space<vmem>>, vector<32x64xbf16>
    %c192 = arith.constant 192 : index
    %c0_230 = arith.constant 0 : index
    %474 = vector.load %arg5[%c192, %c0_230] : memref<256x64xbf16, #tpu.memory_space<vmem>>, vector<64x32xbf16>
    %475 = arith.truncf %472 : vector<8x32xf32> to vector<8x32xbf16>
    %cst_231 = arith.constant dense<0.000000e+00> : vector<8x64xf32>
    %476 = tpu.matmul %475, %473, %cst_231 {dimension_numbers = #tpu.dot_dimension_numbers<[1], [0], [0], [1], [0, 0, 1, 1], [], []>} : vector<8x32xbf16>, vector<32x64xbf16>, vector<8x64xf32> -> vector<8x64xf32>
    %c34 = arith.constant 34 : index
    %c0_232 = arith.constant 0 : index
    %477 = vector.load %arg6[%c34, %c0_232] : memref<38x64xf32, #tpu.memory_space<vmem>>, vector<1x64xf32>
    %478 = vector.broadcast %477 : vector<1x64xf32> to vector<8x64xf32>
    %479 = arith.addf %476, %478 : vector<8x64xf32>
    %cst_233 = arith.constant 5.000000e-01 : f32
    %480 = vector.broadcast %cst_233 : f32 to vector<8x64xf32>
    %481 = arith.mulf %480, %479 : vector<8x64xf32>
    %cst_234 = arith.constant 4.471500e-02 : f32
    %482 = vector.broadcast %cst_234 : f32 to vector<8x64xf32>
    %483 = arith.mulf %482, %479 : vector<8x64xf32>
    %484 = arith.mulf %483, %479 : vector<8x64xf32>
    %485 = arith.mulf %484, %479 : vector<8x64xf32>
    %486 = arith.addf %479, %485 : vector<8x64xf32>
    %cst_235 = arith.constant 0.797884583 : f32
    %487 = vector.broadcast %cst_235 : f32 to vector<8x64xf32>
    %488 = arith.mulf %487, %486 : vector<8x64xf32>
    %489 = math.tanh %488 : vector<8x64xf32>
    %cst_236 = arith.constant 1.000000e+00 : f32
    %490 = vector.broadcast %cst_236 : f32 to vector<8x64xf32>
    %491 = arith.addf %490, %489 : vector<8x64xf32>
    %492 = arith.mulf %481, %491 : vector<8x64xf32>
    %493 = arith.truncf %492 : vector<8x64xf32> to vector<8x64xbf16>
    %cst_237 = arith.constant dense<0.000000e+00> : vector<8x32xf32>
    %494 = tpu.matmul %493, %474, %cst_237 {dimension_numbers = #tpu.dot_dimension_numbers<[1], [0], [0], [1], [0, 0, 1, 1], [], []>} : vector<8x64xbf16>, vector<64x32xbf16>, vector<8x32xf32> -> vector<8x32xf32>
    %c35 = arith.constant 35 : index
    %c0_238 = arith.constant 0 : index
    %495 = vector.load %arg6[%c35, %c0_238] : memref<38x64xf32, #tpu.memory_space<vmem>>, vector<1x32xf32>
    %496 = vector.broadcast %495 : vector<1x32xf32> to vector<8x32xf32>
    %497 = arith.addf %494, %496 : vector<8x32xf32>
    %498 = arith.addf %472, %497 : vector<8x32xf32>
    %c36 = arith.constant 36 : index
    %c0_239 = arith.constant 0 : index
    %499 = vector.load %arg6[%c36, %c0_239] : memref<38x64xf32, #tpu.memory_space<vmem>>, vector<1x32xf32>
    %c37 = arith.constant 37 : index
    %c0_240 = arith.constant 0 : index
    %500 = vector.load %arg6[%c37, %c0_240] : memref<38x64xf32, #tpu.memory_space<vmem>>, vector<1x32xf32>
    %cst_241 = arith.constant dense<0.000000e+00> : vector<8xf32>
    %501 = vector.multi_reduction <add>, %498, %cst_241 [1] : vector<8x32xf32> to vector<8xf32>
    %502 = vector.shape_cast %501 : vector<8xf32> to vector<8x1xf32>
    %cst_242 = arith.constant 3.200000e+01 : f32
    %503 = vector.broadcast %cst_242 : f32 to vector<8x1xf32>
    %504 = arith.divf %502, %503 : vector<8x1xf32>
    %505 = vector.broadcast %504 : vector<8x1xf32> to vector<8x32xf32>
    %506 = arith.subf %498, %505 : vector<8x32xf32>
    %507 = arith.mulf %506, %506 : vector<8x32xf32>
    %cst_243 = arith.constant dense<0.000000e+00> : vector<8xf32>
    %508 = vector.multi_reduction <add>, %507, %cst_243 [1] : vector<8x32xf32> to vector<8xf32>
    %509 = vector.shape_cast %508 : vector<8xf32> to vector<8x1xf32>
    %cst_244 = arith.constant 3.200000e+01 : f32
    %510 = vector.broadcast %cst_244 : f32 to vector<8x1xf32>
    %511 = arith.divf %509, %510 : vector<8x1xf32>
    %cst_245 = arith.constant 9.99999996E-13 : f32
    %512 = vector.broadcast %cst_245 : f32 to vector<8x1xf32>
    %513 = arith.addf %511, %512 : vector<8x1xf32>
    %514 = math.rsqrt %513 : vector<8x1xf32>
    %515 = vector.broadcast %514 : vector<8x1xf32> to vector<8x32xf32>
    %516 = arith.mulf %506, %515 : vector<8x32xf32>
    %517 = vector.broadcast %499 : vector<1x32xf32> to vector<8x32xf32>
    %518 = arith.mulf %516, %517 : vector<8x32xf32>
    %519 = vector.broadcast %500 : vector<1x32xf32> to vector<8x32xf32>
    %520 = arith.addf %518, %519 : vector<8x32xf32>
    %c113 = arith.constant 113 : index
    %c0_246 = arith.constant 0 : index
    %521 = vector.load %arg3[%c113, %c0_246] : memref<145x32xf32, #tpu.memory_space<vmem>>, vector<32x3xf32>
    %c112 = arith.constant 112 : index
    %c0_247 = arith.constant 0 : index
    %522 = vector.load %arg3[%c112, %c0_247] : memref<145x32xf32, #tpu.memory_space<vmem>>, vector<1x3xf32>
    %523 = vector.extract_strided_slice %520 {offsets = [0, 0], sizes = [1, 32], strides = [1, 1]} : vector<8x32xf32> to vector<1x32xf32>
    %cst_248 = arith.constant dense<0.000000e+00> : vector<1x3xf32>
    %524 = tpu.matmul %523, %521, %cst_248 {dimension_numbers = #tpu.dot_dimension_numbers<[1], [0], [0], [1], [0, 0, 1, 1], [], []>} : vector<1x32xf32>, vector<32x3xf32>, vector<1x3xf32> -> vector<1x3xf32>
    %525 = arith.addf %524, %522 : vector<1x3xf32>
    %c0_249 = arith.constant 0 : index
    %c0_250 = arith.constant 0 : index
    %c0_251 = arith.constant 0 : index
    %526 = vector.load %arg7[%c0_249, %c0_250, %c0_251] : memref<1x1x3xf32, #tpu.memory_space<vmem>>, vector<1x1x3xf32>
    %527 = vector.shape_cast %526 : vector<1x1x3xf32> to vector<1x3xf32>
    %528 = vector.shape_cast %525 : vector<1x3xf32> to vector<1x1x3xf32>
    tpu.vector_store %arg7[%c0_249, %c0_250, %c0_251], %528 {strides = array<i32>} : memref<1x1x3xf32, #tpu.memory_space<vmem>>, vector<1x1x3xf32>,
    return
  }
  func.func @transform_0(%arg0: i32) -> (i32, i32, i32) {
    %c0_i32 = arith.constant 0 : i32
    %c0_i32_0 = arith.constant 0 : i32
    %c0_i32_1 = arith.constant 0 : i32
    return %arg0, %c0_i32, %c0_i32_0 : i32, i32, i32
  }
  func.func @transform_1(%arg0: i32) -> (i32, i32, i32) {
    %c0_i32 = arith.constant 0 : i32
    %c0_i32_0 = arith.constant 0 : i32
    %c0_i32_1 = arith.constant 0 : i32
    return %arg0, %c0_i32, %c0_i32_0 : i32, i32, i32
  }
  func.func @transform_2(%arg0: i32) -> (i32, i32) {
    %c0_i32 = arith.constant 0 : i32
    %c0_i32_0 = arith.constant 0 : i32
    %c0_i32_1 = arith.constant 0 : i32
    return %c0_i32, %c0_i32_0 : i32, i32
  }
  func.func @transform_3(%arg0: i32) -> (i32, i32, i32) {
    %c0_i32 = arith.constant 0 : i32
    %c0_i32_0 = arith.constant 0 : i32
    %c0_i32_1 = arith.constant 0 : i32
    %c0_i32_2 = arith.constant 0 : i32
    return %c0_i32, %c0_i32_0, %c0_i32_1 : i32, i32, i32
  }
  func.func @transform_4(%arg0: i32) -> (i32, i32) {
    %c0_i32 = arith.constant 0 : i32
    %c0_i32_0 = arith.constant 0 : i32
    %c0_i32_1 = arith.constant 0 : i32
    return %c0_i32, %c0_i32_0 : i32, i32
  }
  func.func @transform_5(%arg0: i32) -> (i32, i32) {
    %c0_i32 = arith.constant 0 : i32
    %c0_i32_0 = arith.constant 0 : i32
    %c0_i32_1 = arith.constant 0 : i32
    return %c0_i32, %c0_i32_0 : i32, i32
  }
  func.func @transform_6(%arg0: i32) -> (i32, i32, i32) {
    %c0_i32 = arith.constant 0 : i32
    %c0_i32_0 = arith.constant 0 : i32
    %c0_i32_1 = arith.constant 0 : i32
    return %arg0, %c0_i32, %c0_i32_0 : i32, i32, i32
  }
}

</mosaic_0001>

<bundles_post_ra>
// kernel: knowledge_selector_forward.1
= control target key start
LH: loop header
LB: loop body
LE: loop exit
PB: predicated region body
PF: predicated region fallthrough
CT: control target
= control target key end

     0   :  { %11 = vsyncpa [#allocation3], 0  ;;  %s5710_s0 = inlined_call_operand.vmem [shape: s32[2,8,2], index: 0, kind: input, shape index: {}]   ;;  %s5711_s1 = inlined_call_operand.vmem [shape: f32[2,1,8], index: 1, kind: input, shape index: {}]   ;;  %s5712_s2 = inlined_call_operand.vmem [shape: f32[145,32], index: 2, kind: input, shape index: {}]   ;;  %s5713_s3 = inlined_call_operand.vmem [shape: bf16[24,32,8], index: 3, kind: input, shape index: {}]   ;;  %s5714_s4 = inlined_call_operand.vmem [shape: bf16[256,64], index: 4, kind: input, shape index: {}]   ;;  %s5715_s5 = inlined_call_operand.vmem [shape: f32[38,64], index: 5, kind: input, shape index: {}]   ;;  %s5716_s6 = inlined_call_operand.hbm [shape: f32[2,1,3], index: 6, kind: output, shape index: {}]  }
   0x1   :  { %13 = vsyncpa [#allocation3 + $0x1], 0  ;;  %s4850_s21 = smov 0   ;;  %s4852_s22 = smov 0  }
   0x2   :  { %s4854_s23 = smov 0   ;;  %s4856_s24 = smov 0  }
   0x3 LB: > { %s4871_s25 = sadd.s32 4294967295, %s4807_s24   ;;  %s3738_s26 = sadd.s32 4294967294, %s4807_s24   ;;  %s4807_s24 = sphi %s4856_s24, %s5722_s24   ;;  %s4803_s23 = sphi %s4854_s23, %s5721_s23   ;;  %s4799_s22 = sphi %s4852_s22, %s5720_s22   ;;  %s4795_s21 = sphi %s4850_s21, %s5719_s21  }
   0x4   : > { %s4875_s27 = sadd.s32 1, %s4807_s24   ;;  %s162_s28 = sadd.s32 1, %s4803_s23 }
   0x5   : > { %s159_s29 = ssub.s32 %s4807_s24, %s4875_s27  ;;  %p172_p0 = scmp.ne.s32.totalorder %s4803_s23, %s4799_s22 }
   0x6   : > { %p160_p1 = scmp.eq.s32.totalorder %s159_s29, 0  ;;  %p173_p2 = scmp.eq.s32.totalorder %s4871_s25, 1 }
   0x7   : > { %p178_p3 = scmp.ne.s32.totalorder %s4799_s22, %s4795_s21  ;;  %p179_p4 = scmp.eq.s32.totalorder %s3738_s26, 1 }
   0x8   : > { %s4886_s30 = scalar_select %p160_p1, %s4803_s23, %s162_s28  }
   0x9   : > { %p4888_p5 = por %p173_p2, %p172_p0  ;;  %p4892_p6 = por %p179_p4, %p178_p3 }
   0xa   : > { %p3741_p7 = scmp.ge.s32.totalorder %s4807_s24, 1  ;;  %p222_p8 = scmp.lt.s32.totalorder %s4807_s24, 3 }
   0xc   : > { %p223_p9 = pnand %p3741_p7, %p222_p8 }
   0xd   : > { %p253_p10 = scmp.lt.s32.totalorder (!%p223_p9), %s4871_s25, 1  ;;  %v270_v0 = vld [vmem:[%s5712_s2] sm:$0xff] (!%p223_p9)  ;;  %v271_v1 = vld [vmem:[%s5712_s2 + $0x8] sm:$0xff] (!%p223_p9)  ;;  %v272_v2 = vld [vmem:[%s5712_s2 + $0x10] sm:$0xff] (!%p223_p9)  ;;  %v4809_v3 = vmov (!%p223_p9), 0   ;;  %v4810_v4 = vmov (!%p223_p9), 0.0|0.0   ;;  %v262_v25 = vlaneseq (!%p223_p9) }
   0xe   : > { %226 = sbr.rel (%p223_p9) target bundleno = 10879 (0x2a7f), region = 44  ;;  %4636 = vset.pattern.permute.xlu0 (!%p223_p9), %v4809_v3  ;;  %4568 = vmatprep.subr.bf16.mxu0 (!%p223_p9), %v4810_v4  ;;  %v4569_v5 = vpack.c.bf16 (!%p223_p9), %v271_v1, %v270_v0  ;;  %v273_v6 = vld [vmem:[%s5712_s2 + $0x18] sm:$0xff] (!%p223_p9)  ;;  %v4811_v7 = vmov (!%p223_p9), 0.0   ;;  %v274_v9 = vld [vmem:[%s5712_s2 + $0x20] sm:$0xff] (!%p223_p9)  ;;  %v275_v10 = vld [vmem:[%s5712_s2 + $0x28] sm:$0xff] (!%p223_p9)  ;;  %vm4812_vm1 = vmmov (!%p223_p9), 0  }
   0xf   : > { %4181 = vmatprep.subr.bf16.mxu1 (!%p223_p9), %v4811_v7  ;;  %v4572_v8 = vpack.c.bf16 (!%p223_p9), %v273_v6, %v272_v2  ;;  %v4575_v12 = vpack.c.bf16 (!%p223_p9), %v275_v10, %v274_v9  ;;  %v276_v13 = vld [vmem:[%s5712_s2 + $0x30] sm:$0xff] (!%p223_p9)  ;;  %v277_v14 = vld [vmem:[%s5712_s2 + $0x38] sm:$0xff] (!%p223_p9)  ;;  %4178 = vmatprep.mubr.msk.f32.mxu0 (!%p223_p9), %vm4812_vm1, %v4811_v7  ;;  %v4813_v17 = vmov (!%p223_p9), 1   ;;  %v278_v18 = vld [vmem:[%s5712_s2 + $0x40] sm:$0xff] (!%p223_p9)  ;;  %vm305_vm2 = vcmask (!%p223_p9), 1043456   ;;  %s251_s13 = sand.u32 (!%p223_p9), 1, %s4799_s22  }
  0x10   : > { %4570 = vmatpush3.bf16.msra.mxu0 (!%p223_p9), %v4569_v5  ;;  %4185 = vmatprep.mubr.msk.bf16.mxu1 (!%p223_p9), %vm4812_vm1, %v4811_v7  ;;  %v4578_v16 = vpack.c.bf16 (!%p223_p9), %v277_v14, %v276_v13  ;;  %v279_v19 = vld [vmem:[%s5712_s2 + $0x48] sm:$0xff] (!%p223_p9)  ;;  %v280_v20 = vld [vmem:[%s5712_s2 + $0x50] sm:$0xff] (!%p223_p9)  ;;  %v281_v21 = vld [vmem:[%s5712_s2 + $0x58] sm:$0xff] (!%p223_p9)  ;;  %v263_v26 = vand.u32 (!%p223_p9), 127, %v262_v25  ;;  %vm301_vm3 = vcmask (!%p223_p9), 818176   ;;  %vm382_vm6 = vcmask (!%p223_p9), 261120  }
  0x11   : > { %4571 = vmatprep.subr.bf16.mxu0 (!%p223_p9), %v4810_v4  ;;  %v4581_v22 = vpack.c.bf16 (!%p223_p9), %v279_v19, %v278_v18  ;;  %v4584_v23 = vpack.c.bf16 (!%p223_p9), %v281_v21, %v280_v20  ;;  %v282_v24 = vld [vmem:[%s5712_s2 + $0x60] sm:$0xf] (!%p223_p9)  ;;  %v3744_v30 = vld [vmem:[%s5712_s2 + $0x64] ss:$0 sm:$0xff] (!%p223_p9)  ;;  %v3745_v31 = vld [vmem:[%s5712_s2 + $0x65] ss:$0 sm:$0xff] (!%p223_p9) }
  0x12   : > { %v300_v34 = vld [vmem:[%s5712_s2 + $0x66] sm:$0xff] (!%p223_p9)  ;;  %v3748_v50 = vld [vmem:[%s5712_s2 + $0x6e] ss:$0 sm:$0xff] (!%p223_p9)  ;;  %v3749_v52 = vld [vmem:[%s5712_s2 + $0x6f] ss:$0 sm:$0xff] (!%p223_p9)  ;;  %vm605_vm7 = vcmask (!%p223_p9), 64512  }
  0x13   : > { %v4638_v44 = vld [vmem:[%s5713_s3] sm:$0xff] (!%p223_p9)   ;;  %v4639_v45 = vld [vmem:[%s5713_s3 + $0x8] sm:$0xff] (!%p223_p9)   ;;  %vm1928_vm8 = vcmask (!%p223_p9), 523264   ;;  %s3994_s16 = sshll.u32 (!%p223_p9), %s4871_s25, 4  ;;  %s252_s19 = scalar_lea.vmem (!%p223_p9), [#allocation2], %s251_s13  ;;  %vm3659_vm9 = vcmask (!%p223_p9), 16384  }
  0x14   : > { %4573 = vmatpush3.bf16.msra.mxu0 (!%p223_p9), %v4572_v8  ;;  %4182 = vmatpush3.bf16.msra.mxu1 (!%p223_p9), %v4638_v44  ;;  %v4640_v55 = vld [vmem:[%s5713_s3 + $0x40] sm:$0xff] (!%p223_p9)   ;;  %v4641_v57 = vld [vmem:[%s5713_s3 + $0x48] sm:$0xff] (!%p223_p9)   ;;  %s5668_s28 = scalar_lea.hbm (!%p223_p9), %s5716_s6, %s3994_s16  ;;  %s3662_s29 = scalar_lea.sflag (!%p223_p9), [#allocation3], %s251_s13 }
  0x15   : > { %s4913_s17 = scalar_select %p253_p10, %s4871_s25, 1  ;;  %4574 = vmatprep.subr.bf16.mxu0 %v4810_v4  ;;  %4183 = vmatprep.subr.bf16.mxu1 %v4811_v7  ;;  %v4642_v58 = vld [vmem:[%s5713_s3 + $0x80] sm:$0xff]   ;;  %v4643_v59 = vld [vmem:[%s5713_s3 + $0x88] sm:$0xff]  }
  0x16   : > { %v3762_v0 = vld [vmem:[%s5715_s5 + $0x4] ss:$0 sm:$0xff]  ;;  %v3758_v9 = vld [vmem:[%s5715_s5] ss:$0 sm:$0xff]  ;;  %s4814_s25 = smov [#allocation2]  }
  0x17   : > { %s3742_s20 = sshll.u32 %s4913_s17, 3  ;;  %s5053_s18 = scalar_lea.vmem %s5711_s1, %s4913_s17 }
  0x18   : > { %s256_s10 = scalar_lea.vmem %s5710_s0, %s3742_s20  ;;  %4576 = vmatpush3.bf16.msra.mxu0 %v4575_v12  ;;  %4184 = vmatpush3.bf16.msra.mxu1 %v4639_v45  ;;  %s3674_s20 = sshll.u32 %s252_s19, 4  ;;  %s5670_s20 = int_to_ptr.vmem [resolvable:$true] %s3674_s20 }
  0x19   : > { %v261_v11 = vld [vmem:[%s256_s10] sm:$0xff]  ;;  %4577 = vmatprep.subr.bf16.mxu0 %v4810_v4  ;;  %4189 = vmatprep.subr.bf16.mxu1 %v4811_v7  ;;  %s4745_s9 = scalar_lea.vmem %s5670_s20, 16  ;;  %s4749_s10 = sshll.u32 %s4814_s25, 4  ;;  %s4750_s10 = int_to_ptr.vmem [resolvable:$false] %s4749_s10 }
  0x1a   : > { %265 = vperm.xlu0 %4636, %v261_v11   ;;  %vm283_vm0 = vcmp.eq.s32.totalorder %v261_v11, 0  ;;  %v3766_v11 = vld [vmem:[%s5715_s5 + $0x8] ss:$0 sm:$0xff]  ;;  %p4746_p11 = scmp.ne.s32.totalorder %s5670_s20, %s4745_s9  ;;  %s4751_s11 = scalar_lea.vmem %s4750_s10, 32 }
  0x1b   : > { %v286_v15 = vsel %vm283_vm0, 1, %v4809_v3  ;;  %p4752_p0 = scmp.lt.s32.totalorder %s5670_s20, %s4750_s10  ;;  %p4753_p1 = scmp.lt.s32.totalorder %s4751_s11, %s4745_s9 }
  0x1c   : > { %4579 = vmatpush3.bf16.msra.mxu0 %v4578_v16  ;;  %p4747_p12 = pnand %p4746_p11, %p4888_p5 }
  0x1d   : > { %4580 = vmatprep.subr.bf16.mxu0 %v4810_v4  ;;  %p4754_p2 = por %p4753_p1, %p4752_p0 }
  0x1e   : > { %4637 = vset.pattern.permute.xlu0 %v4813_v17  ;;  %v4644_v17 = vld [vmem:[%s5713_s3 + $0x50] sm:$0xff]   ;;  %p4748_p13 = pneg %p4747_p12 }
  0x1f   : > { %288 = vperm.xlu0 %4637, %v286_v15  }
  0x20   : > { %4582 = vmatpush3.bf16.msra.mxu0 %v4581_v22  ;;  %v4645_v22 = vld [vmem:[%s5713_s3 + $0x58] sm:$0xff]   ;;  %p4755_p3 = pnand %p4754_p2, %p4748_p13 }
  0x21   : > { %4583 = vmatprep.subr.bf16.mxu0 %v4810_v4 }
  0x24   : > { %4585 = vmatpush3.bf16.msra.mxu0 %v4584_v23  ;;  %v5056_v23 = vld [vmem:[%s5053_s18] ss:$0 sm:$0xff] }
  0x25   : > { %4176 = vmatprep.subr.mxu0 %v4811_v7 }
  0x28   : > { %4177 = vmatpush3.msk.msra.mxu0 %vm305_vm2, %v282_v24 }
  0x29   : > { %4211 = vmatprep.subr.bf16.mxu0 %v4811_v7 }
  0x99   : > { %v266_v27 = vpop.permute.xlu0 %265 }
  0x9a   : > { %vm267_vm4 = vcmp.eq.s32.totalorder %v266_v27, %v263_v26 }
  0x9b   : > { %v3743_v28 = vsel %vm267_vm4, 1.0, %v4811_v7 }
  0x9c   : > { %4179 = vmatmul.mubr.msk.f32.vlgmr.msra.gmra.mrb[0].mxu0 %vm301_vm3, %v3743_v28 }
  0x9d   : > { %4213 = vmatprep.mubr.msk.bf16.mxu0 %vm4812_vm1, %v4811_v7 }
  0x9e   : > { %v289_v29 = vpop.permute.xlu0 %288 }
  0x9f   : > { %vm290_vm5 = vcmp.eq.s32.totalorder %v289_v29, 1 }
  0xa0   : > { %v299_v32 = vsel %vm290_vm5, %v3744_v30, %v3745_v31  ;;  %v3789_v30 = vld [vmem:[%s5715_s5 + $0x5] ss:$0 sm:$0xff] }
 0x16f   : > { %v375_v33 = vpop.f32.mrb[0].mxu0 }
 0x170   : > { %v376_v35 = vadd.f32 %v375_v33, %v299_v32  ;;  %v4180_v36 = vpop.f32.mrb[1].mxu0 }
 0x172   : > { %v379_v37 = vadd.f32 %v376_v35, %v300_v34 }
 0x174   : > { %v383_v38 = vsel %vm382_vm6, %v379_v37, 0.0 }
 0x175   : > { %384 = vadd.xlane.f32.xlu1 %v383_v38 }
 0x202   : > { %v385_v39 = vpop.xlane.xlu1 %384 }
 0x203   : > { %v387_v40 = vmul.f32 0.03125, %v385_v39 }
 0x205   : > { %v388_v41 = vsub.f32 %v379_v37, %v387_v40 }
 0x207   : > { %v389_v42 = vmul.f32 %v388_v41, %v388_v41 }
 0x209   : > { %v390_v43 = vsel %vm382_vm6, %v389_v42, 0.0 }
 0x20a   : > { %391 = vadd.xlane.f32.xlu1 %v390_v43 }
 0x297   : > { %v392_v46 = vpop.xlane.xlu1 %391 }
 0x298   : > { %v393_v47 = vmul.f32 0.03125, %v392_v46  ;;  %v4646_v46 = vld [vmem:[%s5713_s3 + $0x10] sm:$0xff]  }
 0x29a   : > { %v394_v48 = vadd.f32 1e-12, %v393_v47 }
 0x29c   : > { %4698 = vrsqrt.f32 %v394_v48  ;;  %v4647_v48 = vld [vmem:[%s5713_s3 + $0x18] sm:$0xff]  }
 0x2a6   : > { %v4699_v49 = vpop.eup %4698 }
 0x2a7   : > { %v396_v51 = vmul.f32 %v4699_v49, %v388_v41  ;;  %v4648_v49 = vld [vmem:[%s5713_s3 + $0x90] sm:$0xff]  }
 0x2a9   : > { %v401_v53 = vmul.f32 %v3748_v50, %v396_v51  ;;  %v4649_v50 = vld [vmem:[%s5713_s3 + $0x98] sm:$0xff]  }
 0x2ab   : > { %v4987_v54 = vadd.f32 %v3749_v52, %v401_v53 }
 0x2ad   : > { %v4994_v56 = vpack.c.bf16 %v4987_v54, %v4987_v54 }
 0x2af   : > { %4186 = vmatmul.mubr.msk.bf16.vlgmr.msra.gmra.mrb[0].mxu1 %vm382_vm6, %v4994_v56 }
 0x2b0   : > { %4190 = vmatpush3.bf16.msra.mxu1 %v4640_v55  ;;  %4193 = vmatprep.mubr.msk.bf16.mxu1 %vm4812_vm1, %v4811_v7 }
 0x2b1   : > { %4191 = vmatprep.subr.bf16.mxu1 %v4811_v7 }
 0x2b4   : > { %4192 = vmatpush3.bf16.msra.mxu1 %v4641_v57  ;;  %v3785_v57 = vld [vmem:[%s5715_s5 + $0x1] ss:$0 sm:$0xff] }
 0x2b5   : > { %4197 = vmatprep.subr.bf16.mxu1 %v4811_v7 }
 0x2b7   : > { %4194 = vmatmul.mubr.msk.bf16.vlgmr.msra.gmra.mrb[4].mxu1 %vm382_vm6, %v4994_v56 }
 0x2b8   : > { %4198 = vmatpush3.bf16.msra.mxu1 %v4642_v58  ;;  %4201 = vmatprep.mubr.msk.bf16.mxu1 %vm4812_vm1, %v4811_v7 }
 0x2b9   : > { %4199 = vmatprep.subr.bf16.mxu1 %v4811_v7 }
 0x2bc   : > { %4200 = vmatpush3.bf16.msra.mxu1 %v4643_v59 }
 0x2bd   : > { %4205 = vmatprep.subr.bf16.mxu1 %v4811_v7 }
 0x2bf   : > { %4202 = vmatmul.mubr.msk.bf16.vlgmr.msra.gmra.mrb[8].mxu1 %vm382_vm6, %v4994_v56 }
 0x2c0   : > { %4207 = vmatprep.mubr.msk.bf16.mxu1 %vm4812_vm1, %v4811_v7 }
 0x382   : > { %v477_v60 = vpop.f32.mrb[0].mxu1 }
 0x383   : > { %v4187_v61 = vpop.f32.mrb[1].mxu1  ;;  %v478_v12 = vadd.f32 %v3758_v9, %v477_v60 }
 0x384   : > { %v480_v62 = vpop.f32.mrb[2].mxu1 }
 0x385   : > { %v4188_v63 = vpop.f32.mrb[3].mxu1  ;;  %v597_v18 = vpack.c.bf16 %v478_v12, %v478_v12 }
 0x38a   : > { %v534_v1 = vpop.f32.mrb[4].mxu1 }
 0x38b   : > { %v535_v2 = vadd.f32 %v3762_v0, %v534_v1  ;;  %v4195_v3 = vpop.f32.mrb[5].mxu1  ;;  %v3793_v0 = vld [vmem:[%s5715_s5 + $0x9] ss:$0 sm:$0xff] }
 0x38c   : > { %v537_v5 = vpop.f32.mrb[6].mxu1 }
 0x38d   : > { %v598_v6 = vpack.c.bf16 %v535_v2, %v535_v2  ;;  %v4196_v8 = vpop.f32.mrb[7].mxu1 }
 0x38f   : > { %v610_v10 = vsel %vm605_vm7, %v598_v6, 0 }
 0x390   : > { %4206 = vmatpush3.bf16.xpose.msra.mxu1 %v610_v10 }
 0x391   : > { %4225 = vmatprep.subr.bf16.mxu1 %v4811_v7 }
 0x392   : > { %v591_v13 = vpop.f32.mrb[8].mxu1 }
 0x393   : > { %v592_v14 = vadd.f32 %v3766_v11, %v591_v13  ;;  %v4203_v15 = vpop.f32.mrb[9].mxu1 }
 0x394   : > { %v594_v16 = vpop.f32.mrb[10].mxu1 }
 0x395   : > { %v664_v19 = vpack.c.bf16 %v592_v14, %v592_v14  ;;  %v4204_v20 = vpop.f32.mrb[11].mxu1 }
 0x397   : > { %v669_v21 = vsel %vm305_vm2, %v664_v19, 0  ;;  %4208 = vmatmul.mubr.msk.bf16.vlgmr.msra.gmra.mrb[12].mxu1 %vm605_vm7, %v597_v18 }
 0x398   : > { %4212 = vmatpush3.bf16.msra.mxu0 %v669_v21  ;;  %4226 = vmatpush3.bf16.msra.mxu1 %v4644_v17  ;;  %v1006_v21 = vld [vmem:[%s5714_s4 + $0x4] sm:$0xf] }
 0x399   : > { %4227 = vmatprep.subr.bf16.mxu1 %v4811_v7  ;;  %4229 = vmatprep.mubr.msk.bf16.mxu1 %vm4812_vm1, %v4811_v7 }
 0x39a   : > { %4217 = vmatprep.subr.bf16.mxu0 %v4811_v7 }
 0x39c   : > { %4228 = vmatpush3.bf16.msra.mxu1 %v4645_v22  ;;  %v1012_v22 = vsel %vm305_vm2, %v1006_v21, 0 }
 0x39d   : > { %4241 = vmatprep.subr.bf16.mxu1 %v4811_v7 }
 0x39f   : > { %4230 = vmatmul.mubr.msk.bf16.vlgmr.msra.gmra.mrb[16].mxu1 %vm382_vm6, %v4994_v56 }
 0x3a0   : > { %4243 = vmatprep.mubr.msk.bf16.mxu1 %vm4812_vm1, %v4811_v7 }
 0x46a   : > { %v646_v24 = vpop.f32.mrb[12].mxu1 }
 0x46b   : > { %v647_v25 = vadd.f32 %v5056_v23, %v646_v24  ;;  %v4209_v26 = vpop.f32.mrb[13].mxu1 }
 0x46c   : > { %v649_v27 = vpop.f32.mrb[14].mxu1  ;;  %v711_v26 = vld [vmem:[%s5714_s4] sm:$0xf] }
 0x46d   : > { %v4210_v28 = vpop.f32.mrb[15].mxu1  ;;  %v652_v29 = vsel %vm605_vm7, %v647_v25, -inf }
 0x46e   : > { %653 = vmax.xlane.f32.xlu1 %v652_v29  ;;  %v1058_v29 = vsel %vm305_vm2, %v711_v26, 0  ;;  %v1393_v26 = vld [vmem:[%s5714_s4 + $0x8] sm:$0xf] }
 0x472   : > { %v836_v31 = vpop.f32.mrb[16].mxu1 }
 0x473   : > { %v837_v32 = vadd.f32 %v3789_v30, %v836_v31  ;;  %v4231_v33 = vpop.f32.mrb[17].mxu1  ;;  %v4650_v30 = vld [vmem:[%s5713_s3 + $0x60] sm:$0xff]  }
 0x474   : > { %v839_v34 = vpop.f32.mrb[18].mxu1 }
 0x475   : > { %v900_v35 = vpack.c.bf16 %v837_v32, %v837_v32  ;;  %v4232_v36 = vpop.f32.mrb[19].mxu1  ;;  %v4651_v32 = vld [vmem:[%s5713_s3 + $0x68] sm:$0xff]   ;;  %v4652_v34 = vld [vmem:[%s5713_s3 + $0x20] sm:$0xff]  }
 0x477   : > { %v905_v37 = vsel %vm605_vm7, %v900_v35, 0 }
 0x478   : > { %4242 = vmatpush3.bf16.xpose.msra.mxu1 %v905_v37 }
 0x479   : > { %4253 = vmatprep.subr.bf16.mxu1 %v4811_v7 }
 0x4fb   : > { %v654_v38 = vpop.xlane.xlu1 %653 }
 0x4fc   : > { %v655_v39 = vsub.f32 %v647_v25, %v654_v38 }
 0x4fe   : > { %v656_v40 = vmul.f32 1.442695, %v655_v39  ;;  %v4653_v39 = vld [vmem:[%s5713_s3 + $0x28] sm:$0xff]  }
 0x500   : > { %4700 = vpow2.f32 %v656_v40 }
 0x50a   : > { %v4701_v41 = vpop.eup %4700 }
 0x50b   : > { %v658_v42 = vsel %vm605_vm7, %v4701_v41, 0.0 }
 0x50c   : > { %659 = vadd.xlane.f32.xlu0 %v658_v42 }
 0x599   : > { %v660_v43 = vpop.xlane.xlu0 %659 }
 0x59a   : > { %4702 = vrcp.f32 %v660_v43 }
 0x5a4   : > { %v4703_v44 = vpop.eup %4702 }
 0x5a5   : > { %v662_v45 = vmul.f32 %v4703_v44, %v4701_v41  ;;  %v4654_v41 = vld [vmem:[%s5713_s3 + $0xa0] sm:$0xff]  }
 0x5a7   : > { %v663_v47 = vpack.c.bf16 %v662_v45, %v662_v45  ;;  %v4655_v45 = vld [vmem:[%s5713_s3 + $0xa8] sm:$0xff]  }
 0x5a9   : > { %4214 = vmatmul.mubr.msk.bf16.vlgmr.msra.gmra.mrb[4].mxu0 %vm605_vm7, %v663_v47 }
 0x5aa   : > { %4218 = vmatpush3.bf16.msra.mxu0 %v4646_v46  ;;  %4221 = vmatprep.mubr.msk.bf16.mxu0 %vm4812_vm1, %v4811_v7  ;;  %v3817_v46 = vld [vmem:[%s5715_s5 + $0x6] ss:$0 sm:$0xff] }
 0x5ab   : > { %4219 = vmatprep.subr.bf16.mxu0 %v4811_v7 }
 0x5ae   : > { %4220 = vmatpush3.bf16.msra.mxu0 %v4647_v48 }
 0x5af   : > { %4233 = vmatprep.subr.bf16.mxu0 %v4811_v7 }
 0x5b1   : > { %4222 = vmatmul.mubr.msk.bf16.vlgmr.msra.gmra.mrb[8].mxu0 %vm382_vm6, %v4994_v56 }
 0x5b2   : > { %4234 = vmatpush3.bf16.msra.mxu0 %v4648_v49  ;;  %4237 = vmatprep.mubr.msk.bf16.mxu0 %vm4812_vm1, %v4811_v7 }
 0x5b3   : > { %4235 = vmatprep.subr.bf16.mxu0 %v4811_v7 }
 0x5b6   : > { %4236 = vmatpush3.bf16.msra.mxu0 %v4649_v50 }
 0x5b7   : > { %4247 = vmatprep.subr.bf16.mxu0 %v4811_v7 }
 0x5b9   : > { %4238 = vmatmul.mubr.msk.bf16.vlgmr.msra.gmra.mrb[12].mxu0 %vm382_vm6, %v4994_v56 }
 0x5ba   : > { %4249 = vmatprep.mubr.msk.bf16.mxu0 %vm4812_vm1, %v4811_v7 }
 0x67c   : > { %v705_v51 = vpop.f32.mrb[4].mxu0 }
 0x67d   : > { %v4215_v52 = vpop.f32.mrb[5].mxu0  ;;  %v712_v31 = vpack.c.bf16 %v705_v51, %v705_v51 }
 0x67e   : > { %v708_v53 = vpop.f32.mrb[6].mxu0 }
 0x67f   : > { %v4216_v55 = vpop.f32.mrb[7].mxu0 }
 0x684   : > { %v779_v58 = vpop.f32.mrb[8].mxu0 }
 0x685   : > { %v780_v59 = vadd.f32 %v3785_v57, %v779_v58  ;;  %v4223_v60 = vpop.f32.mrb[9].mxu0 }
 0x686   : > { %v782_v61 = vpop.f32.mrb[10].mxu0 }
 0x687   : > { %v899_v62 = vpack.c.bf16 %v780_v59, %v780_v59  ;;  %v4224_v63 = vpop.f32.mrb[11].mxu0  ;;  %v3813_v61 = vld [vmem:[%s5715_s5 + $0x2] ss:$0 sm:$0xff] }
 0x689   : > { %4244 = vmatmul.mubr.msk.bf16.vlgmr.msra.gmra.mrb[20].mxu1 %vm605_vm7, %v899_v62 }
 0x68a   : > { %4255 = vmatprep.mubr.msk.bf16.mxu1 %vm4812_vm1, %v4811_v7  ;;  %4254 = vmatpush3.bf16.msra.mxu1 %v1012_v22 }
 0x68b   : > { %4265 = vmatprep.subr.bf16.mxu1 %v4811_v7 }
 0x68c   : > { %v893_v1 = vpop.f32.mrb[12].mxu0 }
 0x68d   : > { %v894_v2 = vadd.f32 %v3793_v0, %v893_v1  ;;  %v4239_v3 = vpop.f32.mrb[13].mxu0 }
 0x68e   : > { %v896_v5 = vpop.f32.mrb[14].mxu0 }
 0x68f   : > { %v959_v6 = vpack.c.bf16 %v894_v2, %v894_v2  ;;  %v4240_v8 = vpop.f32.mrb[15].mxu0  ;;  %v3821_v5 = vld [vmem:[%s5715_s5 + $0xa] ss:$0 sm:$0xff] }
 0x691   : > { %v964_v9 = vsel %vm305_vm2, %v959_v6, 0 }
 0x692   : > { %4248 = vmatpush3.bf16.msra.mxu0 %v964_v9 }
 0x693   : > { %4259 = vmatprep.subr.bf16.mxu0 %v4811_v7 }
 0x75c   : > { %v941_v10 = vpop.f32.mrb[20].mxu1 }
 0x75d   : > { %v942_v11 = vadd.f32 %v5056_v23, %v941_v10  ;;  %v4245_v12 = vpop.f32.mrb[21].mxu1 }
 0x75e   : > { %v944_v13 = vpop.f32.mrb[22].mxu1 }
 0x75f   : > { %v4246_v14 = vpop.f32.mrb[23].mxu1  ;;  %v947_v15 = vsel %vm605_vm7, %v942_v11, -inf }
 0x760   : > { %948 = vmax.xlane.f32.xlu1 %v947_v15 }
 0x7ed   : > { %v949_v16 = vpop.xlane.xlu1 %948 }
 0x7ee   : > { %v950_v17 = vsub.f32 %v942_v11, %v949_v16 }
 0x7f0   : > { %v951_v18 = vmul.f32 1.442695, %v950_v17 }
 0x7f2   : > { %4704 = vpow2.f32 %v951_v18 }
 0x7fc   : > { %v4705_v19 = vpop.eup %4704 }
 0x7fd   : > { %v953_v20 = vsel %vm605_vm7, %v4705_v19, 0.0 }
 0x7fe   : > { %954 = vadd.xlane.f32.xlu1 %v953_v20 }
 0x88b   : > { %v955_v24 = vpop.xlane.xlu1 %954 }
 0x88c   : > { %4706 = vrcp.f32 %v955_v24 }
 0x896   : > { %v4707_v25 = vpop.eup %4706 }
 0x897   : > { %v957_v27 = vmul.f32 %v4707_v25, %v4705_v19 }
 0x899   : > { %v958_v28 = vpack.c.bf16 %v957_v27, %v957_v27  ;;  %v1399_v27 = vsel %vm305_vm2, %v1393_v26, 0 }
 0x89b   : > { %4250 = vmatmul.mubr.msk.bf16.vlgmr.msra.gmra.mrb[16].mxu0 %vm605_vm7, %v958_v28 }
 0x89c   : > { %4260 = vmatpush3.bf16.msra.mxu0 %v1058_v29  ;;  %4261 = vmatprep.mubr.msk.bf16.mxu0 %vm4812_vm1, %v4811_v7 }
 0x89d   : > { %4273 = vmatprep.subr.bf16.mxu0 %v4811_v7 }
 0x8a3   : > { %4262 = vmatmul.mubr.msk.bf16.vlgmr.msra.gmra.mrb[20].mxu0 %vm605_vm7, %v712_v31  ;;  %v4656_v31 = vld [vmem:[%s5713_s3 + $0x30] sm:$0xff]  }
 0x8a4   : > { %4274 = vmatpush3.bf16.msra.mxu0 %v4650_v30  ;;  %4277 = vmatprep.mubr.msk.bf16.mxu0 %vm4812_vm1, %v4811_v7 }
 0x8a5   : > { %4275 = vmatprep.subr.bf16.mxu0 %v4811_v7 }
 0x8a8   : > { %4276 = vmatpush3.bf16.msra.mxu0 %v4651_v32 }
 0x8a9   : > { %4289 = vmatprep.subr.bf16.mxu0 %v4811_v7 }
 0x8ab   : > { %4278 = vmatmul.mubr.msk.bf16.vlgmr.msra.gmra.mrb[24].mxu0 %vm382_vm6, %v4994_v56 }
 0x8ac   : > { %4291 = vmatprep.mubr.msk.bf16.mxu0 %vm4812_vm1, %v4811_v7 }
 0x96e   : > { %v1000_v33 = vpop.f32.mrb[16].mxu0 }
 0x96f   : > { %v1007_v35 = vpack.c.bf16 %v1000_v33, %v1000_v33  ;;  %v4251_v36 = vpop.f32.mrb[17].mxu0  ;;  %v4657_v33 = vld [vmem:[%s5713_s3 + $0x38] sm:$0xff]  }
 0x970   : > { %v1003_v37 = vpop.f32.mrb[18].mxu0 }
 0x971   : > { %v4252_v38 = vpop.f32.mrb[19].mxu0  ;;  %4256 = vmatmul.mubr.msk.bf16.vlgmr.msra.gmra.mrb[24].mxu1 %vm605_vm7, %v1007_v35  ;;  %v4659_v35 = vld [vmem:[%s5713_s3 + $0xb8] sm:$0xff]   ;;  %v4660_v37 = vld [vmem:[%s5713_s3 + $0x70] sm:$0xff]  }
 0x972   : > { %4266 = vmatpush3.bf16.msra.mxu1 %v4652_v34  ;;  %4269 = vmatprep.mubr.msk.bf16.mxu1 %vm4812_vm1, %v4811_v7  ;;  %v4658_v34 = vld [vmem:[%s5713_s3 + $0xb0] sm:$0xff]  }
 0x973   : > { %4267 = vmatprep.subr.bf16.mxu1 %v4811_v7 }
 0x976   : > { %v1094_v40 = vpop.f32.mrb[20].mxu0  ;;  %4268 = vmatpush3.bf16.msra.mxu1 %v4653_v39 }
 0x977   : > { %v4263_v42 = vpop.f32.mrb[21].mxu0  ;;  %4281 = vmatprep.subr.bf16.mxu1 %v4811_v7 }
 0x978   : > { %v1097_v43 = vpop.f32.mrb[22].mxu0  ;;  %v4661_v42 = vld [vmem:[%s5713_s3 + $0x78] sm:$0xff]  }
 0x979   : > { %v4264_v44 = vpop.f32.mrb[23].mxu0  ;;  %4270 = vmatmul.mubr.msk.bf16.vlgmr.msra.gmra.mrb[28].mxu1 %vm382_vm6, %v4994_v56 }
 0x97a   : > { %4282 = vmatpush3.bf16.msra.mxu1 %v4654_v41  ;;  %4285 = vmatprep.mubr.msk.bf16.mxu1 %vm4812_vm1, %v4811_v7 }
 0x97b   : > { %4283 = vmatprep.subr.bf16.mxu1 %v4811_v7 }
 0x97e   : > { %v1223_v47 = vpop.f32.mrb[24].mxu0  ;;  %4284 = vmatpush3.bf16.msra.mxu1 %v4655_v45 }
 0x97f   : > { %v1224_v48 = vadd.f32 %v3817_v46, %v1223_v47  ;;  %v4279_v49 = vpop.f32.mrb[25].mxu0  ;;  %4295 = vmatprep.subr.bf16.mxu1 %v4811_v7  ;;  %v3848_v47 = vld [vmem:[%s5715_s5 + $0xb] ss:$0 sm:$0xff] }
 0x980   : > { %v1226_v50 = vpop.f32.mrb[26].mxu0 }
 0x981   : > { %v1287_v51 = vpack.c.bf16 %v1224_v48, %v1224_v48  ;;  %v4280_v52 = vpop.f32.mrb[27].mxu0  ;;  %4286 = vmatmul.mubr.msk.bf16.vlgmr.msra.gmra.mrb[32].mxu1 %vm382_vm6, %v4994_v56 }
 0x982   : > { %4297 = vmatprep.mubr.msk.bf16.mxu1 %vm4812_vm1, %v4811_v7 }
 0x983   : > { %v1292_v53 = vsel %vm605_vm7, %v1287_v51, 0 }
 0x984   : > { %4290 = vmatpush3.bf16.xpose.msra.mxu0 %v1292_v53 }
 0x985   : > { %4301 = vmatprep.subr.bf16.mxu0 %v4811_v7 }
 0xa44   : > { %v1048_v55 = vpop.f32.mrb[24].mxu1 }
 0xa45   : > { %v5167_v57 = vadd.f32 %v1094_v40, %v1048_v55  ;;  %v4257_v58 = vpop.f32.mrb[25].mxu1 }
 0xa46   : > { %v1051_v59 = vpop.f32.mrb[26].mxu1 }
 0xa47   : > { %v4258_v60 = vpop.f32.mrb[27].mxu1 }
 0xa4c   : > { %v1166_v62 = vpop.f32.mrb[28].mxu1 }
 0xa4d   : > { %v1167_v63 = vadd.f32 %v3813_v61, %v1166_v62  ;;  %v4271_v0 = vpop.f32.mrb[29].mxu1  ;;  %v3844_v62 = vld [vmem:[%s5715_s5 + $0x7] ss:$0 sm:$0xff] }
 0xa4e   : > { %v1169_v1 = vpop.f32.mrb[30].mxu1 }
 0xa4f   : > { %v1286_v2 = vpack.c.bf16 %v1167_v63, %v1167_v63  ;;  %v4272_v3 = vpop.f32.mrb[31].mxu1 }
 0xa51   : > { %4292 = vmatmul.mubr.msk.bf16.vlgmr.msra.gmra.mrb[28].mxu0 %vm605_vm7, %v1286_v2 }
 0xa52   : > { %4303 = vmatprep.mubr.msk.bf16.mxu0 %vm4812_vm1, %v4811_v7  ;;  %4302 = vmatpush3.bf16.msra.mxu0 %v1399_v27 }
 0xa53   : > { %4315 = vmatprep.subr.bf16.mxu0 %v4811_v7 }
 0xa54   : > { %v1280_v6 = vpop.f32.mrb[32].mxu1 }
 0xa55   : > { %v1281_v8 = vadd.f32 %v3821_v5, %v1280_v6  ;;  %v4287_v9 = vpop.f32.mrb[33].mxu1  ;;  %v3840_v6 = vld [vmem:[%s5715_s5 + $0x3] ss:$0 sm:$0xff] }
 0xa56   : > { %v1283_v10 = vpop.f32.mrb[34].mxu1 }
 0xa57   : > { %v1346_v11 = vpack.c.bf16 %v1281_v8, %v1281_v8  ;;  %v4288_v12 = vpop.f32.mrb[35].mxu1 }
 0xa59   : > { %v1351_v13 = vsel %vm305_vm2, %v1346_v11, 0 }
 0xa5a   : > { %4296 = vmatpush3.bf16.msra.mxu1 %v1351_v13 }
 0xa5b   : > { %4307 = vmatprep.subr.bf16.mxu1 %v4811_v7 }
 0xb24   : > { %v1328_v14 = vpop.f32.mrb[28].mxu0 }
 0xb25   : > { %v1329_v15 = vadd.f32 %v5056_v23, %v1328_v14  ;;  %v4293_v16 = vpop.f32.mrb[29].mxu0 }
 0xb26   : > { %v1331_v17 = vpop.f32.mrb[30].mxu0 }
 0xb27   : > { %v4294_v18 = vpop.f32.mrb[31].mxu0  ;;  %v1334_v19 = vsel %vm605_vm7, %v1329_v15, -inf }
 0xb28   : > { %1335 = vmax.xlane.f32.xlu1 %v1334_v19 }
 0xbb5   : > { %v1336_v20 = vpop.xlane.xlu1 %1335 }
 0xbb6   : > { %v1337_v21 = vsub.f32 %v1329_v15, %v1336_v20 }
 0xbb8   : > { %v1338_v22 = vmul.f32 1.442695, %v1337_v21  ;;  %v1735_v21 = vld [vmem:[%s5714_s4 + $0xc] sm:$0xf] }
 0xbba   : > { %4708 = vpow2.f32 %v1338_v22  ;;  %v1741_v22 = vsel %vm305_vm2, %v1735_v21, 0 }
 0xbc4   : > { %v4709_v24 = vpop.eup %4708 }
 0xbc5   : > { %v1340_v25 = vsel %vm605_vm7, %v4709_v24, 0.0 }
 0xbc6   : > { %1341 = vadd.xlane.f32.xlu1 %v1340_v25 }
 0xc53   : > { %v1342_v28 = vpop.xlane.xlu1 %1341 }
 0xc54   : > { %4710 = vrcp.f32 %v1342_v28 }
 0xc5e   : > { %v4711_v29 = vpop.eup %4710 }
 0xc5f   : > { %v1344_v30 = vmul.f32 %v4711_v29, %v4709_v24 }
 0xc61   : > { %v1345_v32 = vpack.c.bf16 %v1344_v30, %v1344_v30 }
 0xc63   : > { %4298 = vmatmul.mubr.msk.bf16.vlgmr.msra.gmra.mrb[36].mxu1 %vm605_vm7, %v1345_v32 }
 0xc64   : > { %4308 = vmatpush3.bf16.msra.mxu1 %v4656_v31  ;;  %4311 = vmatprep.mubr.msk.bf16.mxu1 %vm4812_vm1, %v4811_v7 }
 0xc65   : > { %4309 = vmatprep.subr.bf16.mxu1 %v4811_v7 }
 0xc68   : > { %4310 = vmatpush3.bf16.msra.mxu1 %v4657_v33 }
 0xc69   : > { %4323 = vmatprep.subr.bf16.mxu1 %v4811_v7 }
 0xc6b   : > { %4312 = vmatmul.mubr.msk.bf16.vlgmr.msra.gmra.mrb[40].mxu1 %vm382_vm6, %v4994_v56 }
 0xc6c   : > { %4324 = vmatpush3.bf16.msra.mxu1 %v4658_v34  ;;  %4327 = vmatprep.mubr.msk.bf16.mxu1 %vm4812_vm1, %v4811_v7  ;;  %v3855_v34 = vld [vmem:[%s5715_s5 + $0xc] ss:$0 sm:$0xff] }
 0xc6d   : > { %4325 = vmatprep.subr.bf16.mxu1 %v4811_v7 }
 0xc70   : > { %4326 = vmatpush3.bf16.msra.mxu1 %v4659_v35 }
 0xc71   : > { %4337 = vmatprep.subr.bf16.mxu1 %v4811_v7 }
 0xc73   : > { %4328 = vmatmul.mubr.msk.bf16.vlgmr.msra.gmra.mrb[44].mxu1 %vm382_vm6, %v4994_v56 }
 0xc74   : > { %4339 = vmatprep.mubr.msk.bf16.mxu1 %vm4812_vm1, %v4811_v7 }
 0xd36   : > { %v1387_v36 = vpop.f32.mrb[36].mxu1 }
 0xd37   : > { %v1394_v38 = vpack.c.bf16 %v1387_v36, %v1387_v36  ;;  %v4299_v39 = vpop.f32.mrb[37].mxu1 }
 0xd38   : > { %v1390_v40 = vpop.f32.mrb[38].mxu1 }
 0xd39   : > { %v4300_v41 = vpop.f32.mrb[39].mxu1  ;;  %4304 = vmatmul.mubr.msk.bf16.vlgmr.msra.gmra.mrb[32].mxu0 %vm605_vm7, %v1394_v38 }
 0xd3a   : > { %4316 = vmatpush3.bf16.msra.mxu0 %v4660_v37  ;;  %4319 = vmatprep.mubr.msk.bf16.mxu0 %vm4812_vm1, %v4811_v7 }
 0xd3b   : > { %4317 = vmatprep.subr.bf16.mxu0 %v4811_v7 }
 0xd3e   : > { %v1508_v43 = vpop.f32.mrb[40].mxu1  ;;  %4318 = vmatpush3.bf16.msra.mxu0 %v4661_v42 }
 0xd3f   : > { %v4313_v44 = vpop.f32.mrb[41].mxu1  ;;  %4331 = vmatprep.subr.bf16.mxu0 %v4811_v7 }
 0xd40   : > { %v1511_v45 = vpop.f32.mrb[42].mxu1 }
 0xd41   : > { %v4314_v46 = vpop.f32.mrb[43].mxu1  ;;  %4320 = vmatmul.mubr.msk.bf16.vlgmr.msra.gmra.mrb[36].mxu0 %vm382_vm6, %v4994_v56 }
 0xd42   : > { %4333 = vmatprep.mubr.msk.bf16.mxu0 %vm4812_vm1, %v4811_v7 }
 0xd46   : > { %v1622_v48 = vpop.f32.mrb[44].mxu1 }
 0xd47   : > { %v1623_v49 = vadd.f32 %v3848_v47, %v1622_v48  ;;  %v4329_v50 = vpop.f32.mrb[45].mxu1  ;;  %v4662_v47 = vld [vmem:[%s5714_s4 + $0x10] sm:$0xff]  }
 0xd48   : > { %v1625_v51 = vpop.f32.mrb[46].mxu1 }
 0xd49   : > { %v1688_v52 = vpack.c.bf16 %v1623_v49, %v1623_v49  ;;  %v4330_v53 = vpop.f32.mrb[47].mxu1 }
 0xd4b   : > { %v1693_v55 = vsel %vm305_vm2, %v1688_v52, 0  ;;  %v3856_v52 = vld [vmem:[%s5715_s5 + $0xd] ss:$0 sm:$0xff] }
 0xd4c   : > { %4338 = vmatpush3.bf16.msra.mxu1 %v1693_v55  ;;  %v3857_v55 = vld [vmem:[%s5715_s5 + $0xe] ss:$0 sm:$0xff] }
 0xd4d   : > { %4349 = vmatprep.subr.bf16.mxu1 %v4811_v7 }
 0xe0c   : > { %v1435_v58 = vpop.f32.mrb[32].mxu0 }
 0xe0d   : > { %v1441_v56 = vadd.f32 %v1435_v58, %v5167_v57  ;;  %v4305_v59 = vpop.f32.mrb[33].mxu0  ;;  %v1509_v57 = vadd.f32 %v3840_v6, %v1508_v43 }
 0xe0e   : > { %v1438_v60 = vpop.f32.mrb[34].mxu0 }
 0xe0f   : > { %v4306_v61 = vpop.f32.mrb[35].mxu0  ;;  %v1628_v9 = vpack.c.bf16 %v1509_v57, %v1509_v57  ;;  %v4664_v60 = vld [vmem:[%s5714_s4 + $0x20] sm:$0xff]  }
 0xe10   : > { %v4665_v61 = vld [vmem:[%s5714_s4 + $0x28] sm:$0xff]  }
 0xe14   : > { %v1565_v63 = vpop.f32.mrb[36].mxu0 }
 0xe15   : > { %v1566_v0 = vadd.f32 %v3844_v62, %v1565_v63  ;;  %v4321_v1 = vpop.f32.mrb[37].mxu0  ;;  %v4666_v62 = vld [vmem:[%s5714_s4 + $0x30] sm:$0xff]   ;;  %v4667_v63 = vld [vmem:[%s5714_s4 + $0x38] sm:$0xff]  }
 0xe16   : > { %v1568_v2 = vpop.f32.mrb[38].mxu0 }
 0xe17   : > { %v1629_v3 = vpack.c.bf16 %v1566_v0, %v1566_v0  ;;  %v4322_v5 = vpop.f32.mrb[39].mxu0  ;;  %v3858_v0 = vld [vmem:[%s5715_s5 + $0xf] ss:$0 sm:$0xff] }
 0xe19   : > { %v1634_v8 = vsel %vm605_vm7, %v1629_v3, 0 }
 0xe1a   : > { %4332 = vmatpush3.bf16.xpose.msra.mxu0 %v1634_v8 }
 0xe1b   : > { %4343 = vmatprep.subr.bf16.mxu0 %v4811_v7 }
 0xe21   : > { %4334 = vmatmul.mubr.msk.bf16.vlgmr.msra.gmra.mrb[40].mxu0 %vm605_vm7, %v1628_v9 }
 0xe22   : > { %4345 = vmatprep.mubr.msk.bf16.mxu0 %vm4812_vm1, %v4811_v7  ;;  %4344 = vmatpush3.bf16.msra.mxu0 %v1741_v22 }
 0xe23   : > { %4357 = vmatprep.subr.bf16.mxu0 %v4811_v7 }
 0xef4   : > { %v1670_v10 = vpop.f32.mrb[40].mxu0 }
 0xef5   : > { %v1671_v11 = vadd.f32 %v5056_v23, %v1670_v10  ;;  %v4335_v12 = vpop.f32.mrb[41].mxu0 }
 0xef6   : > { %v1673_v13 = vpop.f32.mrb[42].mxu0 }
 0xef7   : > { %v4336_v14 = vpop.f32.mrb[43].mxu0  ;;  %v1676_v15 = vsel %vm605_vm7, %v1671_v11, -inf }
 0xef8   : > { %1677 = vmax.xlane.f32.xlu1 %v1676_v15 }
 0xf85   : > { %v1678_v16 = vpop.xlane.xlu1 %1677 }
 0xf86   : > { %v1679_v17 = vsub.f32 %v1671_v11, %v1678_v16 }
 0xf88   : > { %v1680_v18 = vmul.f32 1.442695, %v1679_v17  ;;  %v3862_v17 = vld [vmem:[%s5715_s5 + $0x10] ss:$0 sm:$0xff] }
 0xf8a   : > { %4712 = vpow2.f32 %v1680_v18 }
 0xf94   : > { %v4713_v19 = vpop.eup %4712 }
 0xf95   : > { %v1682_v20 = vsel %vm605_vm7, %v4713_v19, 0.0 }
 0xf96   : > { %1683 = vadd.xlane.f32.xlu1 %v1682_v20 }
0x1023   : > { %v1684_v24 = vpop.xlane.xlu1 %1683 }
0x1024   : > { %4714 = vrcp.f32 %v1684_v24 }
0x102e   : > { %v4715_v25 = vpop.eup %4714 }
0x102f   : > { %v1686_v26 = vmul.f32 %v4715_v25, %v4713_v19 }
0x1031   : > { %v1687_v27 = vpack.c.bf16 %v1686_v26, %v1686_v26 }
0x1033   : > { %4340 = vmatmul.mubr.msk.bf16.vlgmr.msra.gmra.mrb[48].mxu1 %vm605_vm7, %v1687_v27 }
0x1034   : > { %4353 = vmatprep.mubr.msk.bf16.mxu1 %vm4812_vm1, %v4811_v7  ;;  %4350 = vmatpush3.bf16.msra.mxu1 %v4662_v47  ;;  %v3890_v47 = vld [vmem:[%s5715_s5 + $0x1b] ss:$0 sm:$0xff] }
0x1035   : > { %4351 = vmatprep.subr.bf16.mxu1 %v4811_v7 }
0x1106   : > { %v1729_v28 = vpop.f32.mrb[48].mxu1 }
0x1107   : > { %v1736_v29 = vpack.c.bf16 %v1729_v28, %v1729_v28  ;;  %v4341_v30 = vpop.f32.mrb[49].mxu1 }
0x1108   : > { %v1732_v31 = vpop.f32.mrb[50].mxu1 }
0x1109   : > { %v4342_v32 = vpop.f32.mrb[51].mxu1  ;;  %4346 = vmatmul.mubr.msk.bf16.vlgmr.msra.gmra.mrb[44].mxu0 %vm605_vm7, %v1736_v29  ;;  %v4668_v31 = vld [vmem:[%s5713_s3 + $0xc0] sm:$0xff]  }
0x110a   : > { %4365 = vmatprep.mubr.msk.bf16.mxu0 %vm4812_vm1, %v4811_v7  ;;  %4358 = vmatpush3.bf16.msra.mxu0 %v4664_v60  ;;  %v4669_v32 = vld [vmem:[%s5713_s3 + $0x140] sm:$0xff]   ;;  %v3886_v60 = vld [vmem:[%s5715_s5 + $0x17] ss:$0 sm:$0xff] }
0x110b   : > { %4359 = vmatprep.subr.bf16.mxu0 %v4811_v7 }
0x110e   : > { %4360 = vmatpush3.bf16.msra.mxu0 %v4665_v61 }
0x110f   : > { %4361 = vmatprep.subr.bf16.mxu0 %v4811_v7 }
0x1112   : > { %4362 = vmatpush3.bf16.msra.mxu0 %v4666_v62 }
0x1113   : > { %4363 = vmatprep.subr.bf16.mxu0 %v4811_v7 }
0x1116   : > { %4364 = vmatpush3.bf16.msra.mxu0 %v4667_v63 }
0x1117   : > { %4385 = vmatprep.subr.bf16.mxu0 %v4811_v7 }
0x11dc   : > { %v1777_v33 = vpop.f32.mrb[44].mxu0 }
0x11dd   : > { %v1783_v35 = vadd.f32 %v1777_v33, %v1441_v56  ;;  %v4347_v36 = vpop.f32.mrb[45].mxu0  ;;  %v4670_v33 = vld [vmem:[%s5713_s3 + $0xc8] sm:$0xff]  }
0x11de   : > { %v1780_v37 = vpop.f32.mrb[46].mxu0 }
0x11df   : > { %v1789_v38 = vadd.f32 %v3855_v34, %v1783_v35  ;;  %v4348_v39 = vpop.f32.mrb[47].mxu0  ;;  %v4671_v34 = vld [vmem:[%s5713_s3 + $0x148] sm:$0xff]  }
0x11e0   : > { %v3868_v39 = vld [vmem:[%s5715_s5 + $0x11] ss:$0 sm:$0xff] }
0x11e1   : > { %v1790_v40 = vadd.f32 %v1789_v38, %v4987_v54  ;;  %v4663_v54 = vld [vmem:[%s5714_s4 + $0x18] sm:$0xff]  }
0x11e2   : > { %4352 = vmatpush3.bf16.msra.mxu1 %v4663_v54 }
0x11e3   : > { %v1793_v41 = vsel %vm382_vm6, %v1790_v40, 0.0  ;;  %4369 = vmatprep.subr.bf16.mxu1 %v4811_v7 }
0x11e4   : > { %1794 = vadd.xlane.f32.xlu1 %v1793_v41  ;;  %v3869_v41 = vld [vmem:[%s5715_s5 + $0x12] ss:$0 sm:$0xff] }
0x1271   : > { %v1795_v42 = vpop.xlane.xlu1 %1794 }
0x1272   : > { %v1796_v43 = vmul.f32 0.03125, %v1795_v42 }
0x1274   : > { %v1797_v44 = vsub.f32 %v1790_v40, %v1796_v43 }
0x1276   : > { %v1798_v45 = vmul.f32 %v1797_v44, %v1797_v44 }
0x1278   : > { %v1799_v46 = vsel %vm382_vm6, %v1798_v45, 0.0 }
0x1279   : > { %1800 = vadd.xlane.f32.xlu1 %v1799_v46  ;;  %v4673_v46 = vld [vmem:[%s5713_s3 + $0x108] sm:$0xff]  }
0x1306   : > { %v1801_v48 = vpop.xlane.xlu1 %1800 }
0x1307   : > { %v1802_v49 = vmul.f32 0.03125, %v1801_v48 }
0x1309   : > { %v1803_v50 = vadd.f32 1e-12, %v1802_v49 }
0x130b   : > { %4716 = vrsqrt.f32 %v1803_v50 }
0x1315   : > { %v4717_v51 = vpop.eup %4716 }
0x1316   : > { %v1805_v53 = vmul.f32 %v4717_v51, %v1797_v44  ;;  %v4672_v44 = vld [vmem:[%s5713_s3 + $0x100] sm:$0xff]  }
0x1318   : > { %v1810_v58 = vmul.f32 %v3856_v52, %v1805_v53 }
0x131a   : > { %v1815_v56 = vadd.f32 %v3857_v55, %v1810_v58 }
0x131c   : > { %v1828_v59 = vpack.c.bf16 %v1815_v56, %v1815_v56 }
0x131e   : > { %4354 = vmatmul.mubr.msk.bf16.vlgmr.msra.gmra.mrb[52].mxu1 %vm382_vm6, %v1828_v59 }
0x131f   : > { %4373 = vmatprep.mubr.msk.bf16.mxu1 %vm4812_vm1, %v4811_v7  ;;  %4370 = vmatpush3.bf16.msra.mxu1 %v4668_v31 }
0x1320   : > { %4371 = vmatprep.subr.bf16.mxu1 %v4811_v7 }
0x1323   : > { %4372 = vmatpush3.bf16.msra.mxu1 %v4670_v33 }
0x1324   : > { %4377 = vmatprep.subr.bf16.mxu1 %v4811_v7 }
0x13f1   : > { %v1883_v1 = vpop.f32.mrb[52].mxu1 }
0x13f2   : > { %v1884_v2 = vadd.f32 %v3858_v0, %v1883_v1  ;;  %v4355_v3 = vpop.f32.mrb[53].mxu1 }
0x13f3   : > { %v1886_v5 = vpop.f32.mrb[54].mxu1  ;;  %v3882_v3 = vld [vmem:[%s5715_s5 + $0x13] ss:$0 sm:$0xff] }
0x13f4   : > { %v1890_v6 = vmul.f32 0.044715, %v1884_v2  ;;  %v4356_v8 = vpop.f32.mrb[55].mxu1  ;;  %v1889_v13 = vmul.f32 0.5, %v1884_v2 }
0x13f5   : > { %v4674_v8 = vld [vmem:[%s5713_s3 + $0xd0] sm:$0xff]  }
0x13f6   : > { %v1891_v57 = vmul.f32 %v1890_v6, %v1884_v2 }
0x13f8   : > { %v1892_v9 = vmul.f32 %v1891_v57, %v1884_v2 }
0x13fa   : > { %v1893_v10 = vadd.f32 %v1892_v9, %v1884_v2  ;;  %v4675_v9 = vld [vmem:[%s5713_s3 + $0xd8] sm:$0xff]  }
0x13fc   : > { %v1894_v11 = vmul.f32 0.7978846, %v1893_v10  ;;  %v4676_v10 = vld [vmem:[%s5713_s3 + $0x150] sm:$0xff]  }
0x13fe   : > { %4718 = vtanh.f32 %v1894_v11  ;;  %v4677_v11 = vld [vmem:[%s5713_s3 + $0x158] sm:$0xff]  }
0x1408   : > { %v4719_v12 = vpop.eup %4718 }
0x1409   : > { %v1896_v14 = vadd.f32 1.0, %v4719_v12 }
0x140b   : > { %v1897_v15 = vmul.f32 %v1896_v14, %v1889_v13 }
0x140d   : > { %v1898_v16 = vpack.c.bf16 %v1897_v15, %v1897_v15 }
0x140f   : > { %4366 = vmatmul.mubr.msk.bf16.vlgmr.msra.gmra.mrb[48].mxu0 %vm1928_vm8, %v1898_v16 }
0x1410   : > { %4389 = vmatprep.mubr.msk.bf16.mxu0 %vm4812_vm1, %v4811_v7  ;;  %4386 = vmatpush3.bf16.msra.mxu0 %v4669_v32 }
0x1411   : > { %4387 = vmatprep.subr.bf16.mxu0 %v4811_v7 }
0x1414   : > { %4388 = vmatpush3.bf16.msra.mxu0 %v4671_v34 }
0x1415   : > { %4399 = vmatprep.subr.bf16.mxu0 %v4811_v7 }
0x14e2   : > { %v1966_v18 = vpop.f32.mrb[48].mxu0 }
0x14e3   : > { %v1967_v19 = vadd.f32 %v3862_v17, %v1966_v18  ;;  %v4367_v20 = vpop.f32.mrb[49].mxu0 }
0x14e4   : > { %v1969_v21 = vpop.f32.mrb[50].mxu0 }
0x14e5   : > { %v4368_v22 = vpop.f32.mrb[51].mxu0  ;;  %v1972_v24 = vadd.f32 %v1967_v19, %v1815_v56 }
0x14e6   : > { %v3916_v22 = vld [vmem:[%s5715_s5 + $0x1c] ss:$0 sm:$0xff] }
0x14e7   : > { %v1975_v25 = vsel %vm382_vm6, %v1972_v24, 0.0 }
0x14e8   : > { %1976 = vadd.xlane.f32.xlu0 %v1975_v25 }
0x1575   : > { %v1977_v26 = vpop.xlane.xlu0 %1976 }
0x1576   : > { %v1978_v27 = vmul.f32 0.03125, %v1977_v26 }
0x1578   : > { %v1979_v28 = vsub.f32 %v1972_v24, %v1978_v27 }
0x157a   : > { %v1980_v29 = vmul.f32 %v1979_v28, %v1979_v28 }
0x157c   : > { %v1981_v30 = vsel %vm382_vm6, %v1980_v29, 0.0 }
0x157d   : > { %1982 = vadd.xlane.f32.xlu1 %v1981_v30 }
0x160a   : > { %v1983_v35 = vpop.xlane.xlu1 %1982 }
0x160b   : > { %v1984_v36 = vmul.f32 0.03125, %v1983_v35 }
0x160d   : > { %v1985_v37 = vadd.f32 1e-12, %v1984_v36 }
0x160f   : > { %4720 = vrsqrt.f32 %v1985_v37 }
0x1619   : > { %v4721_v38 = vpop.eup %4720 }
0x161a   : > { %v1987_v40 = vmul.f32 %v4721_v38, %v1979_v28  ;;  %v4678_v38 = vld [vmem:[%s5713_s3 + $0x110] sm:$0xff]  }
0x161c   : > { %v1992_v42 = vmul.f32 %v3868_v39, %v1987_v40  ;;  %v4679_v40 = vld [vmem:[%s5713_s3 + $0x118] sm:$0xff]  }
0x161e   : > { %v5333_v43 = vadd.f32 %v3869_v41, %v1992_v42 }
0x1620   : > { %v5340_v45 = vpack.c.bf16 %v5333_v43, %v5333_v43 }
0x1622   : > { %4374 = vmatmul.mubr.msk.bf16.vlgmr.msra.gmra.mrb[56].mxu1 %vm382_vm6, %v5340_v45  ;;  %4390 = vmatmul.mubr.msk.bf16.vlgmr.msra.gmra.mrb[52].mxu0 %vm382_vm6, %v5340_v45 }
0x1623   : > { %4378 = vmatpush3.bf16.msra.mxu1 %v4672_v44  ;;  %4381 = vmatprep.mubr.msk.bf16.mxu1 %vm4812_vm1, %v4811_v7 }
0x1624   : > { %4379 = vmatprep.subr.bf16.mxu1 %v4811_v7  ;;  %4401 = vmatprep.mubr.msk.bf16.mxu0 %vm4812_vm1, %v4811_v7 }
0x1627   : > { %4380 = vmatpush3.bf16.msra.mxu1 %v4673_v46 }
0x1628   : > { %4393 = vmatprep.subr.bf16.mxu1 %v4811_v7 }
0x162a   : > { %4382 = vmatmul.mubr.msk.bf16.vlgmr.msra.gmra.mrb[60].mxu1 %vm382_vm6, %v5340_v45 }
0x162b   : > { %4395 = vmatprep.mubr.msk.bf16.mxu1 %vm4812_vm1, %v4811_v7 }
0x16f5   : > { %v2068_v54 = vpop.f32.mrb[56].mxu1  ;;  %v2182_v48 = vpop.f32.mrb[52].mxu0 }
0x16f6   : > { %v2183_v49 = vadd.f32 %v3890_v47, %v2182_v48  ;;  %v4375_v50 = vpop.f32.mrb[57].mxu1  ;;  %v4391_v51 = vpop.f32.mrb[53].mxu0  ;;  %v2069_v6 = vadd.f32 %v3882_v3, %v2068_v54  ;;  %v3912_v47 = vld [vmem:[%s5715_s5 + $0x18] ss:$0 sm:$0xff] }
0x16f7   : > { %v2071_v52 = vpop.f32.mrb[58].mxu1  ;;  %v2185_v53 = vpop.f32.mrb[54].mxu0 }
0x16f8   : > { %v2248_v55 = vpack.c.bf16 %v2183_v49, %v2183_v49  ;;  %v4376_v58 = vpop.f32.mrb[59].mxu1  ;;  %v4392_v56 = vpop.f32.mrb[55].mxu0  ;;  %v2188_v57 = vpack.c.bf16 %v2069_v6, %v2069_v6  ;;  %v3908_v53 = vld [vmem:[%s5715_s5 + $0x14] ss:$0 sm:$0xff] }
0x16fa   : > { %v2253_v59 = vsel %vm305_vm2, %v2248_v55, 0 }
0x16fb   : > { %4400 = vmatpush3.bf16.msra.mxu0 %v2253_v59 }
0x16fc   : > { %4413 = vmatprep.subr.bf16.mxu0 %v4811_v7 }
0x16fd   : > { %v2125_v61 = vpop.f32.mrb[60].mxu1 }
0x16fe   : > { %v2126_v62 = vadd.f32 %v3886_v60, %v2125_v61  ;;  %v4383_v63 = vpop.f32.mrb[61].mxu1  ;;  %v5434_v60 = vld [vmem:[%s5053_s18] ss:$0 sm:$0xff] }
0x16ff   : > { %v2128_v0 = vpop.f32.mrb[62].mxu1 }
0x1700   : > { %v2189_v1 = vpack.c.bf16 %v2126_v62, %v2126_v62  ;;  %v4384_v2 = vpop.f32.mrb[63].mxu1 }
0x1702   : > { %v2194_v5 = vsel %vm605_vm7, %v2189_v1, 0 }
0x1703   : > { %4394 = vmatpush3.bf16.xpose.msra.mxu1 %v2194_v5 }
0x1704   : > { %4405 = vmatprep.subr.bf16.mxu1 %v4811_v7 }
0x170a   : > { %4396 = vmatmul.mubr.msk.bf16.vlgmr.msra.gmra.mrb[64].mxu1 %vm605_vm7, %v2188_v57  ;;  %v2590_v57 = vld [vmem:[%s5714_s4 + $0x44] sm:$0xf] }
0x170b   : > { %4406 = vmatpush3.bf16.msra.mxu1 %v4674_v8  ;;  %4409 = vmatprep.mubr.msk.bf16.mxu1 %vm4812_vm1, %v4811_v7 }
0x170c   : > { %4407 = vmatprep.subr.bf16.mxu1 %v4811_v7 }
0x170f   : > { %4408 = vmatpush3.bf16.msra.mxu1 %v4675_v9  ;;  %v2596_v9 = vsel %vm305_vm2, %v2590_v57, 0 }
0x1710   : > { %4421 = vmatprep.subr.bf16.mxu1 %v4811_v7 }
0x1712   : > { %4410 = vmatmul.mubr.msk.bf16.vlgmr.msra.gmra.mrb[68].mxu1 %vm382_vm6, %v5340_v45 }
0x1713   : > { %4422 = vmatpush3.bf16.msra.mxu1 %v4676_v10  ;;  %4425 = vmatprep.mubr.msk.bf16.mxu1 %vm4812_vm1, %v4811_v7 }
0x1714   : > { %4423 = vmatprep.subr.bf16.mxu1 %v4811_v7 }
0x1717   : > { %4424 = vmatpush3.bf16.msra.mxu1 %v4677_v11 }
0x1718   : > { %4435 = vmatprep.subr.bf16.mxu1 %v4811_v7 }
0x171a   : > { %4426 = vmatmul.mubr.msk.bf16.vlgmr.msra.gmra.mrb[72].mxu1 %vm382_vm6, %v5340_v45 }
0x171b   : > { %4437 = vmatprep.mubr.msk.bf16.mxu1 %vm4812_vm1, %v4811_v7 }
0x17dd   : > { %v2230_v12 = vpop.f32.mrb[64].mxu1 }
0x17de   : > { %v2231_v13 = vadd.f32 %v5056_v23, %v2230_v12  ;;  %v4397_v14 = vpop.f32.mrb[65].mxu1  ;;  %v2295_v12 = vld [vmem:[%s5714_s4 + $0x40] sm:$0xf] }
0x17df   : > { %v2233_v15 = vpop.f32.mrb[66].mxu1 }
0x17e0   : > { %v4398_v16 = vpop.f32.mrb[67].mxu1  ;;  %v2236_v17 = vsel %vm605_vm7, %v2231_v13, -inf  ;;  %v2642_v15 = vsel %vm305_vm2, %v2295_v12, 0  ;;  %v2977_v12 = vld [vmem:[%s5714_s4 + $0x48] sm:$0xf] }
0x17e1   : > { %2237 = vmax.xlane.f32.xlu0 %v2236_v17  ;;  %v4680_v16 = vld [vmem:[%s5713_s3 + $0x120] sm:$0xff]  }
0x17e5   : > { %v2363_v18 = vpop.f32.mrb[68].mxu1 }
0x17e6   : > { %v4411_v19 = vpop.f32.mrb[69].mxu1  ;;  %v2364_v58 = vadd.f32 %v3908_v53, %v2363_v18  ;;  %v4681_v18 = vld [vmem:[%s5713_s3 + $0x128] sm:$0xff]   ;;  %v3944_v53 = vld [vmem:[%s5715_s5 + $0x1d] ss:$0 sm:$0xff] }
0x17e7   : > { %v2366_v20 = vpop.f32.mrb[70].mxu1 }
0x17e8   : > { %v4412_v21 = vpop.f32.mrb[71].mxu1  ;;  %v2483_v56 = vpack.c.bf16 %v2364_v58, %v2364_v58  ;;  %v4682_v20 = vld [vmem:[%s5713_s3 + $0xe0] sm:$0xff]  }
0x17ed   : > { %v2477_v24 = vpop.f32.mrb[72].mxu1 }
0x17ee   : > { %v2478_v25 = vadd.f32 %v3916_v22, %v2477_v24  ;;  %v4427_v26 = vpop.f32.mrb[73].mxu1 }
0x17ef   : > { %v2480_v27 = vpop.f32.mrb[74].mxu1  ;;  %v4683_v26 = vld [vmem:[%s5713_s3 + $0xe8] sm:$0xff]  }
0x17f0   : > { %v2543_v28 = vpack.c.bf16 %v2478_v25, %v2478_v25  ;;  %v4428_v23 = vpop.f32.mrb[75].mxu1 }
0x17f2   : > { %v2548_v29 = vsel %vm305_vm2, %v2543_v28, 0  ;;  %v4684_v28 = vld [vmem:[%s5713_s3 + $0x160] sm:$0xff]  }
0x17f3   : > { %4436 = vmatpush3.bf16.msra.mxu1 %v2548_v29 }
0x17f4   : > { %4447 = vmatprep.subr.bf16.mxu1 %v4811_v7 }
0x186e   : > { %v2238_v30 = vpop.xlane.xlu0 %2237 }
0x186f   : > { %v2239_v31 = vsub.f32 %v2231_v13, %v2238_v30 }
0x1871   : > { %v2240_v32 = vmul.f32 1.442695, %v2239_v31  ;;  %v4685_v31 = vld [vmem:[%s5713_s3 + $0x168] sm:$0xff]  }
0x1873   : > { %4722 = vpow2.f32 %v2240_v32  ;;  %v3940_v32 = vld [vmem:[%s5715_s5 + $0x19] ss:$0 sm:$0xff] }
0x187d   : > { %v4723_v33 = vpop.eup %4722 }
0x187e   : > { %v2242_v34 = vsel %vm605_vm7, %v4723_v33, 0.0 }
0x187f   : > { %2243 = vadd.xlane.f32.xlu1 %v2242_v34 }
0x190c   : > { %v2244_v35 = vpop.xlane.xlu1 %2243 }
0x190d   : > { %4724 = vrcp.f32 %v2244_v35 }
0x1917   : > { %v4725_v36 = vpop.eup %4724 }
0x1918   : > { %v2246_v37 = vmul.f32 %v4725_v36, %v4723_v33 }
0x191a   : > { %v2247_v39 = vpack.c.bf16 %v2246_v37, %v2246_v37 }
0x191c   : > { %4402 = vmatmul.mubr.msk.bf16.vlgmr.msra.gmra.mrb[56].mxu0 %vm605_vm7, %v2247_v39 }
0x191d   : > { %4414 = vmatpush3.bf16.msra.mxu0 %v4678_v38  ;;  %4417 = vmatprep.mubr.msk.bf16.mxu0 %vm4812_vm1, %v4811_v7 }
0x191e   : > { %4415 = vmatprep.subr.bf16.mxu0 %v4811_v7 }
0x1921   : > { %4416 = vmatpush3.bf16.msra.mxu0 %v4679_v40 }
0x1922   : > { %4429 = vmatprep.subr.bf16.mxu0 %v4811_v7 }
0x1924   : > { %4418 = vmatmul.mubr.msk.bf16.vlgmr.msra.gmra.mrb[60].mxu0 %vm382_vm6, %v5340_v45 }
0x1925   : > { %4431 = vmatprep.mubr.msk.bf16.mxu0 %vm4812_vm1, %v4811_v7 }
0x19ef   : > { %v2289_v41 = vpop.f32.mrb[56].mxu0 }
0x19f0   : > { %v4403_v42 = vpop.f32.mrb[57].mxu0  ;;  %v2296_v17 = vpack.c.bf16 %v2289_v41, %v2289_v41 }
0x19f1   : > { %v2292_v44 = vpop.f32.mrb[58].mxu0 }
0x19f2   : > { %v4404_v46 = vpop.f32.mrb[59].mxu0 }
0x19f7   : > { %v2420_v54 = vpop.f32.mrb[60].mxu0 }
0x19f8   : > { %v2421_v48 = vadd.f32 %v3912_v47, %v2420_v54  ;;  %v4419_v49 = vpop.f32.mrb[61].mxu0  ;;  %v3936_v47 = vld [vmem:[%s5715_s5 + $0x15] ss:$0 sm:$0xff] }
0x19f9   : > { %v2423_v50 = vpop.f32.mrb[62].mxu0 }
0x19fa   : > { %v2484_v51 = vpack.c.bf16 %v2421_v48, %v2421_v48  ;;  %v4420_v52 = vpop.f32.mrb[63].mxu0 }
0x19fc   : > { %v2489_v55 = vsel %vm605_vm7, %v2484_v51, 0 }
0x19fd   : > { %4430 = vmatpush3.bf16.xpose.msra.mxu0 %v2489_v55 }
0x19fe   : > { %4441 = vmatprep.subr.bf16.mxu0 %v4811_v7 }
0x1a04   : > { %4432 = vmatmul.mubr.msk.bf16.vlgmr.msra.gmra.mrb[64].mxu0 %vm605_vm7, %v2483_v56 }
0x1a05   : > { %4443 = vmatprep.mubr.msk.bf16.mxu0 %vm4812_vm1, %v4811_v7  ;;  %4442 = vmatpush3.bf16.msra.mxu0 %v2596_v9 }
0x1a06   : > { %4453 = vmatprep.subr.bf16.mxu0 %v4811_v7 }
0x1ad7   : > { %v2525_v59 = vpop.f32.mrb[64].mxu0 }
0x1ad8   : > { %v2526_v61 = vadd.f32 %v5434_v60, %v2525_v59  ;;  %v4433_v62 = vpop.f32.mrb[65].mxu0 }
0x1ad9   : > { %v2528_v63 = vpop.f32.mrb[66].mxu0 }
0x1ada   : > { %v4434_v0 = vpop.f32.mrb[67].mxu0  ;;  %v2531_v1 = vsel %vm605_vm7, %v2526_v61, -inf }
0x1adb   : > { %2532 = vmax.xlane.f32.xlu0 %v2531_v1 }
0x1b68   : > { %v2533_v2 = vpop.xlane.xlu0 %2532 }
0x1b69   : > { %v2534_v3 = vsub.f32 %v2526_v61, %v2533_v2 }
0x1b6b   : > { %v2535_v5 = vmul.f32 1.442695, %v2534_v3 }
0x1b6d   : > { %4726 = vpow2.f32 %v2535_v5 }
0x1b77   : > { %v4727_v6 = vpop.eup %4726 }
0x1b78   : > { %v2537_v8 = vsel %vm605_vm7, %v4727_v6, 0.0 }
0x1b79   : > { %2538 = vadd.xlane.f32.xlu1 %v2537_v8 }
0x1c06   : > { %v2539_v10 = vpop.xlane.xlu1 %2538 }
0x1c07   : > { %4728 = vrcp.f32 %v2539_v10 }
0x1c11   : > { %v4729_v11 = vpop.eup %4728 }
0x1c12   : > { %v2541_v13 = vmul.f32 %v4729_v11, %v4727_v6 }
0x1c14   : > { %v2542_v14 = vpack.c.bf16 %v2541_v13, %v2541_v13  ;;  %v2983_v13 = vsel %vm305_vm2, %v2977_v12, 0 }
0x1c16   : > { %4438 = vmatmul.mubr.msk.bf16.vlgmr.msra.gmra.mrb[76].mxu1 %vm605_vm7, %v2542_v14 }
0x1c17   : > { %4448 = vmatpush3.bf16.msra.mxu1 %v2642_v15  ;;  %4449 = vmatprep.mubr.msk.bf16.mxu1 %vm4812_vm1, %v4811_v7 }
0x1c18   : > { %4461 = vmatprep.subr.bf16.mxu1 %v4811_v7 }
0x1c1e   : > { %4450 = vmatmul.mubr.msk.bf16.vlgmr.msra.gmra.mrb[80].mxu1 %vm605_vm7, %v2296_v17  ;;  %v4686_v17 = vld [vmem:[%s5713_s3 + $0xf0] sm:$0xff]  }
0x1c1f   : > { %4462 = vmatpush3.bf16.msra.mxu1 %v4680_v16  ;;  %4465 = vmatprep.mubr.msk.bf16.mxu1 %vm4812_vm1, %v4811_v7 }
0x1c20   : > { %4463 = vmatprep.subr.bf16.mxu1 %v4811_v7 }
0x1c23   : > { %4464 = vmatpush3.bf16.msra.mxu1 %v4681_v18 }
0x1c24   : > { %4477 = vmatprep.subr.bf16.mxu1 %v4811_v7 }
0x1c26   : > { %4466 = vmatmul.mubr.msk.bf16.vlgmr.msra.gmra.mrb[84].mxu1 %vm382_vm6, %v5340_v45 }
0x1c27   : > { %4479 = vmatprep.mubr.msk.bf16.mxu1 %vm4812_vm1, %v4811_v7 }
0x1ce9   : > { %v2584_v19 = vpop.f32.mrb[76].mxu1 }
0x1cea   : > { %v2591_v21 = vpack.c.bf16 %v2584_v19, %v2584_v19  ;;  %v4439_v22 = vpop.f32.mrb[77].mxu1  ;;  %v4687_v19 = vld [vmem:[%s5713_s3 + $0xf8] sm:$0xff]  }
0x1ceb   : > { %v2587_v24 = vpop.f32.mrb[78].mxu1 }
0x1cec   : > { %v4440_v25 = vpop.f32.mrb[79].mxu1  ;;  %4444 = vmatmul.mubr.msk.bf16.vlgmr.msra.gmra.mrb[68].mxu0 %vm605_vm7, %v2591_v21  ;;  %v4689_v21 = vld [vmem:[%s5713_s3 + $0x178] sm:$0xff]   ;;  %v4690_v24 = vld [vmem:[%s5713_s3 + $0x130] sm:$0xff]  }
0x1ced   : > { %4454 = vmatpush3.bf16.msra.mxu0 %v4682_v20  ;;  %4457 = vmatprep.mubr.msk.bf16.mxu0 %vm4812_vm1, %v4811_v7  ;;  %v4688_v20 = vld [vmem:[%s5713_s3 + $0x170] sm:$0xff]  }
0x1cee   : > { %4455 = vmatprep.subr.bf16.mxu0 %v4811_v7 }
0x1cf1   : > { %v2678_v27 = vpop.f32.mrb[80].mxu1  ;;  %4456 = vmatpush3.bf16.msra.mxu0 %v4683_v26 }
0x1cf2   : > { %v4451_v23 = vpop.f32.mrb[81].mxu1  ;;  %4469 = vmatprep.subr.bf16.mxu0 %v4811_v7 }
0x1cf3   : > { %v2681_v29 = vpop.f32.mrb[82].mxu1  ;;  %v4691_v23 = vld [vmem:[%s5713_s3 + $0x138] sm:$0xff]  }
0x1cf4   : > { %v4452_v30 = vpop.f32.mrb[83].mxu1  ;;  %4458 = vmatmul.mubr.msk.bf16.vlgmr.msra.gmra.mrb[72].mxu0 %vm382_vm6, %v5340_v45 }
0x1cf5   : > { %4470 = vmatpush3.bf16.msra.mxu0 %v4684_v28  ;;  %4473 = vmatprep.mubr.msk.bf16.mxu0 %vm4812_vm1, %v4811_v7 }
0x1cf6   : > { %4471 = vmatprep.subr.bf16.mxu0 %v4811_v7 }
0x1cf9   : > { %v2807_v33 = vpop.f32.mrb[84].mxu1  ;;  %4472 = vmatpush3.bf16.msra.mxu0 %v4685_v31 }
0x1cfa   : > { %v2808_v34 = vadd.f32 %v3940_v32, %v2807_v33  ;;  %v4467_v35 = vpop.f32.mrb[85].mxu1  ;;  %4483 = vmatprep.subr.bf16.mxu0 %v4811_v7  ;;  %v3971_v33 = vld [vmem:[%s5715_s5 + $0x1e] ss:$0 sm:$0xff] }
0x1cfb   : > { %v2810_v36 = vpop.f32.mrb[86].mxu1 }
0x1cfc   : > { %v2871_v37 = vpack.c.bf16 %v2808_v34, %v2808_v34  ;;  %v4468_v38 = vpop.f32.mrb[87].mxu1  ;;  %4474 = vmatmul.mubr.msk.bf16.vlgmr.msra.gmra.mrb[76].mxu0 %vm382_vm6, %v5340_v45 }
0x1cfd   : > { %4485 = vmatprep.mubr.msk.bf16.mxu0 %vm4812_vm1, %v4811_v7 }
0x1cfe   : > { %v2876_v39 = vsel %vm605_vm7, %v2871_v37, 0 }
0x1cff   : > { %4478 = vmatpush3.bf16.xpose.msra.mxu1 %v2876_v39 }
0x1d00   : > { %4489 = vmatprep.subr.bf16.mxu1 %v4811_v7 }
0x1dbf   : > { %v2632_v40 = vpop.f32.mrb[68].mxu0 }
0x1dc0   : > { %v5499_v41 = vadd.f32 %v2678_v27, %v2632_v40  ;;  %v4445_v42 = vpop.f32.mrb[69].mxu0 }
0x1dc1   : > { %v2635_v44 = vpop.f32.mrb[70].mxu0 }
0x1dc2   : > { %v4446_v46 = vpop.f32.mrb[71].mxu0 }
0x1dc7   : > { %v2750_v54 = vpop.f32.mrb[72].mxu0 }
0x1dc8   : > { %v2751_v48 = vadd.f32 %v3936_v47, %v2750_v54  ;;  %v4459_v49 = vpop.f32.mrb[73].mxu0  ;;  %v3967_v54 = vld [vmem:[%s5715_s5 + $0x1a] ss:$0 sm:$0xff] }
0x1dc9   : > { %v2753_v50 = vpop.f32.mrb[74].mxu0 }
0x1dca   : > { %v2870_v51 = vpack.c.bf16 %v2751_v48, %v2751_v48  ;;  %v4460_v52 = vpop.f32.mrb[75].mxu0 }
0x1dcc   : > { %4480 = vmatmul.mubr.msk.bf16.vlgmr.msra.gmra.mrb[88].mxu1 %vm605_vm7, %v2870_v51 }
0x1dcd   : > { %4491 = vmatprep.mubr.msk.bf16.mxu1 %vm4812_vm1, %v4811_v7  ;;  %4490 = vmatpush3.bf16.msra.mxu1 %v2983_v13 }
0x1dce   : > { %4503 = vmatprep.subr.bf16.mxu1 %v4811_v7 }
0x1dcf   : > { %v2864_v55 = vpop.f32.mrb[76].mxu0 }
0x1dd0   : > { %v2865_v58 = vadd.f32 %v3944_v53, %v2864_v55  ;;  %v4475_v56 = vpop.f32.mrb[77].mxu0  ;;  %v3963_v55 = vld [vmem:[%s5715_s5 + $0x16] ss:$0 sm:$0xff] }
0x1dd1   : > { %v2867_v59 = vpop.f32.mrb[78].mxu0 }
0x1dd2   : > { %v2930_v61 = vpack.c.bf16 %v2865_v58, %v2865_v58  ;;  %v4476_v62 = vpop.f32.mrb[79].mxu0 }
0x1dd4   : > { %v2935_v63 = vsel %vm305_vm2, %v2930_v61, 0 }
0x1dd5   : > { %4484 = vmatpush3.bf16.msra.mxu0 %v2935_v63 }
0x1dd6   : > { %4495 = vmatprep.subr.bf16.mxu0 %v4811_v7 }
0x1e9f   : > { %v2912_v0 = vpop.f32.mrb[88].mxu1 }
0x1ea0   : > { %v2913_v1 = vadd.f32 %v5434_v60, %v2912_v0  ;;  %v4481_v2 = vpop.f32.mrb[89].mxu1 }
0x1ea1   : > { %v2915_v3 = vpop.f32.mrb[90].mxu1 }
0x1ea2   : > { %v4482_v5 = vpop.f32.mrb[91].mxu1  ;;  %v2918_v6 = vsel %vm605_vm7, %v2913_v1, -inf }
0x1ea3   : > { %2919 = vmax.xlane.f32.xlu0 %v2918_v6 }
0x1f30   : > { %v2920_v8 = vpop.xlane.xlu0 %2919 }
0x1f31   : > { %v2921_v57 = vsub.f32 %v2913_v1, %v2920_v8 }
0x1f33   : > { %v2922_v9 = vmul.f32 1.442695, %v2921_v57  ;;  %v3319_v57 = vld [vmem:[%s5714_s4 + $0x4c] sm:$0xf] }
0x1f35   : > { %4730 = vpow2.f32 %v2922_v9 }
0x1f3f   : > { %v4731_v10 = vpop.eup %4730 }
0x1f40   : > { %v2924_v11 = vsel %vm605_vm7, %v4731_v10, 0.0 }
0x1f41   : > { %2925 = vadd.xlane.f32.xlu1 %v2924_v11 }
0x1fce   : > { %v2926_v14 = vpop.xlane.xlu1 %2925 }
0x1fcf   : > { %4732 = vrcp.f32 %v2926_v14 }
0x1fd9   : > { %v4733_v15 = vpop.eup %4732 }
0x1fda   : > { %v2928_v16 = vmul.f32 %v4733_v15, %v4731_v10 }
0x1fdc   : > { %v2929_v18 = vpack.c.bf16 %v2928_v16, %v2928_v16 }
0x1fde   : > { %4486 = vmatmul.mubr.msk.bf16.vlgmr.msra.gmra.mrb[80].mxu0 %vm605_vm7, %v2929_v18 }
0x1fdf   : > { %4496 = vmatpush3.bf16.msra.mxu0 %v4686_v17  ;;  %4499 = vmatprep.mubr.msk.bf16.mxu0 %vm4812_vm1, %v4811_v7 }
0x1fe0   : > { %4497 = vmatprep.subr.bf16.mxu0 %v4811_v7 }
0x1fe3   : > { %4498 = vmatpush3.bf16.msra.mxu0 %v4687_v19  ;;  %v3978_v19 = vld [vmem:[%s5715_s5 + $0x1f] ss:$0 sm:$0xff] }
0x1fe4   : > { %4511 = vmatprep.subr.bf16.mxu0 %v4811_v7 }
0x1fe6   : > { %4500 = vmatmul.mubr.msk.bf16.vlgmr.msra.gmra.mrb[84].mxu0 %vm382_vm6, %v5340_v45 }
0x1fe7   : > { %4512 = vmatpush3.bf16.msra.mxu0 %v4688_v20  ;;  %4515 = vmatprep.mubr.msk.bf16.mxu0 %vm4812_vm1, %v4811_v7 }
0x1fe8   : > { %4513 = vmatprep.subr.bf16.mxu0 %v4811_v7 }
0x1feb   : > { %4514 = vmatpush3.bf16.msra.mxu0 %v4689_v21 }
0x1fec   : > { %4525 = vmatprep.subr.bf16.mxu0 %v4811_v7 }
0x1fee   : > { %4516 = vmatmul.mubr.msk.bf16.vlgmr.msra.gmra.mrb[88].mxu0 %vm382_vm6, %v5340_v45 }
0x1fef   : > { %4527 = vmatprep.mubr.msk.bf16.mxu0 %vm4812_vm1, %v4811_v7 }
0x20b1   : > { %v2971_v22 = vpop.f32.mrb[80].mxu0 }
0x20b2   : > { %v2978_v25 = vpack.c.bf16 %v2971_v22, %v2971_v22  ;;  %v4487_v26 = vpop.f32.mrb[81].mxu0 }
0x20b3   : > { %v2974_v27 = vpop.f32.mrb[82].mxu0 }
0x20b4   : > { %v4488_v28 = vpop.f32.mrb[83].mxu0  ;;  %4492 = vmatmul.mubr.msk.bf16.vlgmr.msra.gmra.mrb[92].mxu1 %vm605_vm7, %v2978_v25 }
0x20b5   : > { %4504 = vmatpush3.bf16.msra.mxu1 %v4690_v24  ;;  %4507 = vmatprep.mubr.msk.bf16.mxu1 %vm4812_vm1, %v4811_v7 }
0x20b6   : > { %4505 = vmatprep.subr.bf16.mxu1 %v4811_v7 }
0x20b9   : > { %v3092_v29 = vpop.f32.mrb[84].mxu0  ;;  %4506 = vmatpush3.bf16.msra.mxu1 %v4691_v23 }
0x20ba   : > { %v4501_v30 = vpop.f32.mrb[85].mxu0  ;;  %4519 = vmatprep.subr.bf16.mxu1 %v4811_v7 }
0x20bb   : > { %v3095_v31 = vpop.f32.mrb[86].mxu0 }
0x20bc   : > { %v4502_v32 = vpop.f32.mrb[87].mxu0  ;;  %4508 = vmatmul.mubr.msk.bf16.vlgmr.msra.gmra.mrb[96].mxu1 %vm382_vm6, %v5340_v45 }
0x20bd   : > { %4521 = vmatprep.mubr.msk.bf16.mxu1 %vm4812_vm1, %v4811_v7  ;;  %v4692_v32 = vld [vmem:[%s5714_s4 + $0x50] sm:$0xff]  }
0x20c1   : > { %v3206_v34 = vpop.f32.mrb[88].mxu0 }
0x20c2   : > { %v3207_v35 = vadd.f32 %v3971_v33, %v3206_v34  ;;  %v4517_v36 = vpop.f32.mrb[89].mxu0 }
0x20c3   : > { %v3209_v37 = vpop.f32.mrb[90].mxu0 }
0x20c4   : > { %v3272_v38 = vpack.c.bf16 %v3207_v35, %v3207_v35  ;;  %v4518_v39 = vpop.f32.mrb[91].mxu0  ;;  %v3979_v37 = vld [vmem:[%s5715_s5 + $0x20] ss:$0 sm:$0xff] }
0x20c5   : > { %v3980_v39 = vld [vmem:[%s5715_s5 + $0x21] ss:$0 sm:$0xff] }
0x20c6   : > { %v3277_v40 = vsel %vm305_vm2, %v3272_v38, 0 }
0x20c7   : > { %4526 = vmatpush3.bf16.msra.mxu0 %v3277_v40 }
0x20c8   : > { %4537 = vmatprep.subr.bf16.mxu0 %v4811_v7 }
0x2187   : > { %v3019_v42 = vpop.f32.mrb[92].mxu1 }
0x2188   : > { %v3025_v45 = vadd.f32 %v3019_v42, %v5499_v41  ;;  %v4493_v44 = vpop.f32.mrb[93].mxu1  ;;  %v3093_v41 = vadd.f32 %v3963_v55, %v3092_v29 }
0x2189   : > { %v3022_v46 = vpop.f32.mrb[94].mxu1  ;;  %v4694_v44 = vld [vmem:[%s5714_s4 + $0x60] sm:$0xff]  }
0x218a   : > { %v4494_v47 = vpop.f32.mrb[95].mxu1  ;;  %v3212_v56 = vpack.c.bf16 %v3093_v41, %v3093_v41  ;;  %v4695_v46 = vld [vmem:[%s5714_s4 + $0x68] sm:$0xff]  }
0x218b   : > { %v4696_v47 = vld [vmem:[%s5714_s4 + $0x70] sm:$0xff]  }
0x218f   : > { %v3149_v48 = vpop.f32.mrb[96].mxu1 }
0x2190   : > { %v3150_v49 = vadd.f32 %v3967_v54, %v3149_v48  ;;  %v4509_v50 = vpop.f32.mrb[97].mxu1  ;;  %v4697_v54 = vld [vmem:[%s5714_s4 + $0x78] sm:$0xff]   ;;  %v3981_v48 = vld [vmem:[%s5715_s5 + $0x22] ss:$0 sm:$0xff] }
0x2191   : > { %v3152_v51 = vpop.f32.mrb[98].mxu1 }
0x2192   : > { %v3213_v52 = vpack.c.bf16 %v3150_v49, %v3150_v49  ;;  %v4510_v53 = vpop.f32.mrb[99].mxu1 }
0x2194   : > { %v3218_v58 = vsel %vm605_vm7, %v3213_v52, 0 }
0x2195   : > { %4520 = vmatpush3.bf16.xpose.msra.mxu1 %v3218_v58 }
0x2196   : > { %4531 = vmatprep.subr.bf16.mxu1 %v4811_v7 }
0x219c   : > { %4522 = vmatmul.mubr.msk.bf16.vlgmr.msra.gmra.mrb[100].mxu1 %vm605_vm7, %v3212_v56 }
0x219d   : > { %4533 = vmatprep.mubr.msk.bf16.mxu1 %vm4812_vm1, %v4811_v7 }
0x226f   : > { %v3254_v59 = vpop.f32.mrb[100].mxu1 }
0x2270   : > { %v3255_v61 = vadd.f32 %v5434_v60, %v3254_v59  ;;  %v4523_v62 = vpop.f32.mrb[101].mxu1  ;;  %v3325_v60 = vsel %vm305_vm2, %v3319_v57, 0 }
0x2271   : > { %v3257_v63 = vpop.f32.mrb[102].mxu1  ;;  %4532 = vmatpush3.bf16.msra.mxu1 %v3325_v60 }
0x2272   : > { %v4524_v0 = vpop.f32.mrb[103].mxu1  ;;  %v3260_v1 = vsel %vm605_vm7, %v3255_v61, -inf  ;;  %4545 = vmatprep.subr.bf16.mxu1 %v4811_v7 }
0x2273   : > { %3261 = vmax.xlane.f32.xlu0 %v3260_v1  ;;  %v3985_v1 = vld [vmem:[%s5715_s5 + $0x23] ss:$0 sm:$0xff] }
0x2300   : > { %v3262_v2 = vpop.xlane.xlu0 %3261 }
0x2301   : > { %v3263_v3 = vsub.f32 %v3255_v61, %v3262_v2 }
0x2303   : > { %v3264_v5 = vmul.f32 1.442695, %v3263_v3 }
0x2305   : > { %4734 = vpow2.f32 %v3264_v5 }
0x230f   : > { %v4735_v6 = vpop.eup %4734 }
0x2310   : > { %v3266_v8 = vsel %vm605_vm7, %v4735_v6, 0.0 }
0x2311   : > { %3267 = vadd.xlane.f32.xlu1 %v3266_v8 }
0x239e   : > { %v3268_v9 = vpop.xlane.xlu1 %3267 }
0x239f   : > { %4736 = vrcp.f32 %v3268_v9 }
0x23a9   : > { %v4737_v10 = vpop.eup %4736 }
0x23aa   : > { %v3270_v11 = vmul.f32 %v4737_v10, %v4735_v6 }
0x23ac   : > { %v3271_v12 = vpack.c.bf16 %v3270_v11, %v3270_v11 }
0x23ae   : > { %4528 = vmatmul.mubr.msk.bf16.vlgmr.msra.gmra.mrb[92].mxu0 %vm605_vm7, %v3271_v12 }
0x23af   : > { %4541 = vmatprep.mubr.msk.bf16.mxu0 %vm4812_vm1, %v4811_v7  ;;  %4538 = vmatpush3.bf16.msra.mxu0 %v4692_v32 }
0x23b0   : > { %4539 = vmatprep.subr.bf16.mxu0 %v4811_v7 }
0x2481   : > { %v3313_v13 = vpop.f32.mrb[92].mxu0 }
0x2482   : > { %v3320_v14 = vpack.c.bf16 %v3313_v13, %v3313_v13  ;;  %v4529_v15 = vpop.f32.mrb[93].mxu0 }
0x2483   : > { %v3316_v16 = vpop.f32.mrb[94].mxu0  ;;  %v3582_v15 = vld [vmem:[%s5712_s2 + $0x79] sm:$0xff] }
0x2484   : > { %v4530_v17 = vpop.f32.mrb[95].mxu0  ;;  %4534 = vmatmul.mubr.msk.bf16.vlgmr.msra.gmra.mrb[104].mxu1 %vm605_vm7, %v3320_v14  ;;  %v3581_v14 = vld [vmem:[%s5712_s2 + $0x71] sm:$0xff] }
0x2485   : > { %4553 = vmatprep.mubr.msk.bf16.mxu1 %vm4812_vm1, %v4811_v7  ;;  %4546 = vmatpush3.bf16.msra.mxu1 %v4694_v44  ;;  %v4587_v16 = vpack.c.bf16 %v3582_v15, %v3581_v14  ;;  %v3583_v17 = vld [vmem:[%s5712_s2 + $0x81] sm:$0xff] }
0x2486   : > { %4547 = vmatprep.subr.bf16.mxu1 %v4811_v7 }
0x2489   : > { %4548 = vmatpush3.bf16.msra.mxu1 %v4695_v46 }
0x248a   : > { %4549 = vmatprep.subr.bf16.mxu1 %v4811_v7 }
0x248d   : > { %4550 = vmatpush3.bf16.msra.mxu1 %v4696_v47 }
0x248e   : > { %4551 = vmatprep.subr.bf16.mxu1 %v4811_v7 }
0x2491   : > { %4552 = vmatpush3.bf16.msra.mxu1 %v4697_v54 }
0x2557   : > { %v3361_v18 = vpop.f32.mrb[104].mxu1 }
0x2558   : > { %v3367_v20 = vadd.f32 %v3361_v18, %v3025_v45  ;;  %v4535_v21 = vpop.f32.mrb[105].mxu1  ;;  %v3584_v18 = vld [vmem:[%s5712_s2 + $0x89] sm:$0xff] }
0x2559   : > { %v3364_v22 = vpop.f32.mrb[106].mxu1 }
0x255a   : > { %v3373_v24 = vadd.f32 %v3978_v19, %v3367_v20  ;;  %v4536_v25 = vpop.f32.mrb[107].mxu1  ;;  %v4590_v19 = vpack.c.bf16 %v3584_v18, %v3583_v17 }
0x255c   : > { %v3374_v26 = vadd.f32 %v3373_v24, %v5333_v43  ;;  %v4693_v43 = vld [vmem:[%s5714_s4 + $0x58] sm:$0xff]  }
0x255d   : > { %4540 = vmatpush3.bf16.msra.mxu0 %v4693_v43 }
0x255e   : > { %v3377_v27 = vsel %vm382_vm6, %v3374_v26, 0.0  ;;  %4586 = vmatprep.subr.bf16.mxu0 %v4810_v4 }
0x255f   : > { %3378 = vadd.xlane.f32.xlu0 %v3377_v27 }
0x25ec   : > { %v3379_v28 = vpop.xlane.xlu0 %3378 }
0x25ed   : > { %v3380_v23 = vmul.f32 0.03125, %v3379_v28 }
0x25ef   : > { %v3381_v29 = vsub.f32 %v3374_v26, %v3380_v23  ;;  %v3992_v26 = vld [vmem:[%s5715_s5 + $0x25] ss:$0 sm:$0xff]  ;;  %v3585_v23 = vld [vmem:[%s5712_s2 + $0x70] sm:$0x1] }
0x25f1   : > { %v3382_v30 = vmul.f32 %v3381_v29, %v3381_v29 }
0x25f3   : > { %v3383_v31 = vsel %vm382_vm6, %v3382_v30, 0.0 }
0x25f4   : > { %3384 = vadd.xlane.f32.xlu1 %v3383_v31 }
0x2681   : > { %v3385_v33 = vpop.xlane.xlu1 %3384 }
0x2682   : > { %v3386_v34 = vmul.f32 0.03125, %v3385_v33 }
0x2684   : > { %v3387_v35 = vadd.f32 1e-12, %v3386_v34 }
0x2686   : > { %4738 = vrsqrt.f32 %v3387_v35 }
0x2690   : > { %v4739_v36 = vpop.eup %4738 }
0x2691   : > { %v3389_v38 = vmul.f32 %v4739_v36, %v3381_v29 }
0x2693   : > { %v3394_v40 = vmul.f32 %v3979_v37, %v3389_v38 }
0x2695   : > { %v3399_v42 = vadd.f32 %v3980_v39, %v3394_v40 }
0x2697   : > { %v3412_v45 = vpack.c.bf16 %v3399_v42, %v3399_v42 }
0x2699   : > { %4542 = vmatmul.mubr.msk.bf16.vlgmr.msra.gmra.mrb[96].mxu0 %vm382_vm6, %v3412_v45 }
0x269a   : > { %4565 = vmatprep.mubr.msk.f32.mxu0 %vm4812_vm1, %v4811_v7  ;;  %4588 = vmatpush3.bf16.msra.mxu0 %v4587_v16 }
0x269b   : > { %4589 = vmatprep.subr.bf16.mxu0 %v4810_v4  ;;  %v3991_v4 = vld [vmem:[%s5715_s5 + $0x24] ss:$0 sm:$0xff] }
0x269e   : > { %4591 = vmatpush3.bf16.msra.mxu0 %v4590_v19 }
0x276c   : > { %v3467_v49 = vpop.f32.mrb[96].mxu0 }
0x276d   : > { %v3468_v50 = vadd.f32 %v3981_v48, %v3467_v49  ;;  %v4543_v51 = vpop.f32.mrb[97].mxu0 }
0x276e   : > { %v3470_v52 = vpop.f32.mrb[98].mxu0 }
0x276f   : > { %v3474_v53 = vmul.f32 0.044715, %v3468_v50  ;;  %v4544_v55 = vpop.f32.mrb[99].mxu0  ;;  %v3473_v62 = vmul.f32 0.5, %v3468_v50 }
0x2771   : > { %v3475_v58 = vmul.f32 %v3474_v53, %v3468_v50 }
0x2773   : > { %v3476_v41 = vmul.f32 %v3475_v58, %v3468_v50 }
0x2775   : > { %v3477_v56 = vadd.f32 %v3476_v41, %v3468_v50 }
0x2777   : > { %v3478_v59 = vmul.f32 0.7978846, %v3477_v56 }
0x2779   : > { %4740 = vtanh.f32 %v3478_v59 }
0x2783   : > { %v4741_v61 = vpop.eup %4740 }
0x2784   : > { %v3480_v63 = vadd.f32 1.0, %v4741_v61 }
0x2786   : > { %v3481_v7 = vmul.f32 %v3480_v63, %v3473_v62 }
0x2788   : > { %v3482_v0 = vpack.c.bf16 %v3481_v7, %v3481_v7 }
0x278a   : > { %4554 = vmatmul.mubr.msk.bf16.vlgmr.msra.gmra.mrb[108].mxu1 %vm1928_vm8, %v3482_v0 }
0x285d   : > { %v3549_v2 = vpop.f32.mrb[108].mxu1 }
0x285e   : > { %v3550_v3 = vadd.f32 %v3985_v1, %v3549_v2  ;;  %v4555_v5 = vpop.f32.mrb[109].mxu1 }
0x285f   : > { %v3552_v6 = vpop.f32.mrb[110].mxu1 }
0x2860   : > { %v4556_v8 = vpop.f32.mrb[111].mxu1  ;;  %v3555_v57 = vadd.f32 %v3550_v3, %v3399_v42 }
0x2862   : > { %v3558_v60 = vsel %vm382_vm6, %v3555_v57, 0.0 }
0x2863   : > { %3559 = vadd.xlane.f32.xlu0 %v3558_v60 }
0x28f0   : > { %v3560_v9 = vpop.xlane.xlu0 %3559 }
0x28f1   : > { %v3561_v10 = vmul.f32 0.03125, %v3560_v9 }
0x28f3   : > { %v3562_v11 = vsub.f32 %v3555_v57, %v3561_v10 }
0x28f5   : > { %v3563_v12 = vmul.f32 %v3562_v11, %v3562_v11 }
0x28f7   : > { %v3564_v13 = vsel %vm382_vm6, %v3563_v12, 0.0 }
0x28f8   : > { %3565 = vadd.xlane.f32.xlu1 %v3564_v13 }
0x2985   : > { %v3566_v20 = vpop.xlane.xlu1 %3565 }
0x2986   : > { %v3567_v21 = vmul.f32 0.03125, %v3566_v20 }
0x2988   : > { %v3568_v22 = vadd.f32 1e-12, %v3567_v21 }
0x298a   : > { %4742 = vrsqrt.f32 %v3568_v22 }
0x2994   : > { %v4743_v24 = vpop.eup %4742 }
0x2995   : > { %v3570_v25 = vmul.f32 %v4743_v24, %v3562_v11 }
0x2997   : > { %v3575_v27 = vmul.f32 %v3991_v4, %v3570_v25 }
0x2999   : > { %v3580_v28 = vadd.f32 %v3992_v26, %v3575_v27 }
0x299b   : > { %4566 = vmatmul.mubr.msk.f32.vlgmr.msra.gmra.mrb[2].mxu0 %vm382_vm6, %v3580_v28 }
0x2a6e   : > { %v3655_v29 = vpop.f32.mrb[2].mxu0 }
0x2a6f   : > { %v3656_v30 = vadd.f32 %v3655_v29, %v3585_v23  ;;  %v4567_v31 = vpop.f32.mrb[3].mxu0 }
0x2a71   : > { %3660 = vst.msk [vmem:[%s252_s19] sm:$0x1] %vm3659_vm9, %v3656_v30 }
0x2a72   : > { %4758 = shalt.err (!%p4755_p3)
}
0x2a73   : > { %s4759_s12 = scalar_lea.hbm %s5668_s28, 16  ;;  %s4763_s14 = scalar_lea.hbm %s5716_s6, 32 }
0x2a74   : > { %p4760_p4 = scmp.ne.s32.totalorder %s5668_s28, %s4759_s12  ;;  %p4764_p9 = scmp.lt.u32.totalorder %s5668_s28, %s5716_s6 }
0x2a75   : > { %p4765_p10 = scmp.lt.u32.totalorder %s4763_s14, %s4759_s12  ;;  %p4767_p12 = scmp.lt.u32.totalorder %s4759_s12, %s5668_s28 }
0x2a76   : > { %p4761_p7 = pnand %p4760_p4, %p4888_p5 }
0x2a77   : > { %p4766_p11 = por %p4765_p10, %p4764_p9 }
0x2a78   : > { %p4762_p8 = pneg %p4761_p7 }
0x2a79   : > { %p4768_p13 = por %p4767_p12, %p4766_p11 }
0x2a7b   : > { %p4769_p0 = pnand %p4768_p13, %p4762_p8 }
0x2a7d   : > { %4772 = shalt.err (!%p4769_p0)
}
0x2a7e   : > { %4592 = dma.vmem_to_hbm [thread:$0]  (%p4888_p5), %s5670_s20, 16, %s5668_s28, %s3662_s29  }
0x2a7f PF: > { %p4598_p1 = scmp.ge.s32.totalorder %s4807_s24, 2  ;;  %s3686_s19 = sand.u32 1, %s4795_s21  }
0x2a80   : > { %s3687_s17 = scalar_lea.sflag [#allocation3], %s3686_s19 }
0x2a81   : > { %p4595_p2 = pnand %p4598_p1, %p4892_p6 }
0x2a83   : > { %4790 = dma.done.wait (!%p4595_p2), %s3687_s17, 16  }
0x2a84   : > { %4792 = vsyncadd (!%p4595_p2), %s3687_s17, 4294967280  ;;  %p16_p3 = scmp.ge.s32.totalorder %s4875_s27, 4   ;;  %s5719_s21 = smov %s4799_s22 }
0x2a85   : > { %s5720_s22 = smov %s4803_s23  ;;  %s5721_s23 = smov %s4886_s30 }
0x2a86   : > { %s5722_s24 = smov %s4875_s27  ;;  %18 = sbr.rel (!%p16_p3) target bundleno = 3 (0x3), region = 105 }
0x2a8d   :  { %3691 = vsyncpa [#allocation3], 1 }
0x2a8e   :  { %3693 = vsyncpa [#allocation3 + $0x1], 1 }

</bundles_post_ra>
